<compile_context>
chip_gen: v7x
topology: tpu7x:2x2x1
jax: 0.10.0
libtpu: 0.0.40
codegen_flags: <defaults>
</compile_context>

<pallas_src>
import jax
import jax.numpy as jnp
from jax.experimental import pallas as pl
from jax.experimental.pallas import tpu as pltpu

_ALIGN = 16  # bf16 sublane packing: interior store into the mid scratch is aligned


def _double_conv_kernel(xs_ref, w1_ref, b1_ref, w2_ref, b2_ref, o_ref, mid_ref):
    """Fused (conv3x3 + folded-BN + ReLU) x 2 for one H-strip of one image.

    xs_ref : (SH+4, W+2, Cin_p)       bf16 input strip, 2-row / 1-col zero halo
    w1_ref : (9*Cin_p, Cmid_p)        bf16, BN1 scale folded in, im2col K order
    b1_ref : (1, Cmid_p)              f32 folded BN1 shift (incl. conv1 bias)
    w2_ref : (3, 3, Cmid_p, Cout_p)   bf16, BN2 scale folded in
    b2_ref : (1, Cout_p)              f32 folded BN2 shift (incl. conv2 bias)
    o_ref  : (SH*W, Cout_p)           bf16 lane-dense output strip
    mid_ref: (SH+2, _ALIGN+W+1, Cmid_p) bf16 scratch: stage-1 act + 1-col halo
    """
    SH = xs_ref.shape[0] - 4
    W = xs_ref.shape[1] - 2
    Cin = xs_ref.shape[2]
    Cmid = mid_ref.shape[2]
    Cout = o_ref.shape[1]
    c0 = _ALIGN
    M1 = (SH + 2) * W  # stage-1 rows: strip rows + 1 recomputed halo row per side

    # ---- Stage 1: im2col (in registers) -> ONE MXU matmul, K = 9*Cin_p ----
    # For tiny Cin (first UNet convs) nine K=Cin matmuls waste the MXU systolic
    # depth; for Cin >= 64 the 9-tap form used in stage 2 is preferable.
    taps = []
    for ky in range(3):
        for kx in range(3):
            taps.append(xs_ref[ky:ky + SH + 2, kx:kx + W, :].reshape(M1, Cin))
    lhs = jnp.concatenate(taps, axis=1)                      # (M1, 9*Cin_p) bf16
    y1 = jnp.dot(lhs, w1_ref[...], preferred_element_type=jnp.float32)
    y1 = jnp.maximum(y1 + b1_ref[0], 0.0)                    # BN scale already in w1

    # ---- Stash stage-1 activation (with zero W-halo) in VMEM for stage 2 ----
    # Only the two 1-wide halo columns are zeroed (cheap, and re-done every step
    # so it stays correct under megacore grid splitting); the interior is fully
    # overwritten each step with a sublane-aligned bf16 store.
    zero_col = jnp.zeros((SH + 2, 1, Cmid), mid_ref.dtype)
    mid_ref[:, c0 - 1:c0, :] = zero_col
    mid_ref[:, c0 + W:c0 + W + 1, :] = zero_col
    mid_ref[:, c0:c0 + W, :] = y1.reshape(SH + 2, W, Cmid).astype(mid_ref.dtype)

    # Rows outside the image must be ZERO for conv2's zero padding (not
    # conv-of-zeros + BN shift), so mask the halo row on image-boundary strips.
    s = pl.program_id(1)
    zero_row = jnp.zeros((1, W, Cmid), mid_ref.dtype)

    @pl.when(s == 0)
    def _():
        mid_ref[0:1, c0:c0 + W, :] = zero_row

    @pl.when(s == pl.num_programs(1) - 1)
    def _():
        mid_ref[SH + 1:SH + 2, c0:c0 + W, :] = zero_row

    # ---- Stage 2: 9-tap conv, each tap a lane-dense K = Cmid_p matmul ----
    acc = jnp.zeros((SH * W, Cout), jnp.float32)
    for ky in range(3):
        for kx in range(3):
            patch = mid_ref[ky:ky + SH, c0 - 1 + kx:c0 - 1 + kx + W, :]
            acc = acc + jnp.dot(patch.reshape(SH * W, Cmid), w2_ref[ky, kx],
                                preferred_element_type=jnp.float32)
    y2 = jnp.maximum(acc + b2_ref[0], 0.0)

    # Lane-dense (Cout_p multiple of 128), bf16 writeback (halves HBM bytes).
    o_ref[...] = y2.astype(o_ref.dtype)


def _round_up(x, m):
    return (x + m - 1) // m * m


def _fold_bn(conv_bias, gamma, beta, running_mean, running_var, eps=1e-5):
    """Fold eval-mode BatchNorm (+ conv bias) into per-channel scale / shift."""
    inv_std = 1.0 / jnp.sqrt(running_var + eps)
    scale = gamma * inv_std
    shift = (conv_bias - running_mean) * scale + beta
    return scale.astype(jnp.float32), shift.astype(jnp.float32)


def double_conv(x_nchw, params, strip_h=8):
    """Forward pass equivalent to DoubleConv.forward (eval-mode BN).

    x_nchw: (N, Cin, H, W) float32  ->  (N, Cout, H, W) float32
    """
    N, Cin, H, W = x_nchw.shape
    Cmid = params["w1"].shape[-1]
    Cout = params["w2"].shape[-1]
    # Lane-friendly channel padding: 128 for big channel counts, 8 for tiny Cin
    # (padding Cin=3/4 all the way to 128 would waste ~30x input DMA bytes).
    Cin_p = _round_up(Cin, 128) if Cin >= 64 else _round_up(Cin, 8)
    Cmid_p = _round_up(Cmid, 128)
    Cout_p = _round_up(Cout, 128)

    # H-strip tiling: bounds per-step accumulators/scratch and gives the grid
    # enough parallel steps to use both v7x TensorCores and hide the input DMA.
    SH = strip_h if (H % strip_h == 0 and H > strip_h) else H
    S = H // SH

    s1, sh1 = _fold_bn(params["b1"], params["gamma1"], params["beta1"],
                       params["mean1"], params["var1"])
    s2, sh2 = _fold_bn(params["b2"], params["gamma2"], params["beta2"],
                       params["mean2"], params["var2"])

    # Fold the BN scales into the conv weights (in f32, one bf16 cast at the end)
    # and pad channel dims to lane width (zero pad -> padded channels stay 0).
    w1 = params["w1"].astype(jnp.float32) * s1[None, None, None, :]
    w1 = jnp.pad(w1, ((0, 0), (0, 0), (0, Cin_p - Cin), (0, Cmid_p - Cmid)))
    w1 = w1.reshape(9 * Cin_p, Cmid_p).astype(jnp.bfloat16)   # im2col (ky,kx,cin) K order
    w2 = params["w2"].astype(jnp.float32) * s2[None, None, None, :]
    w2 = jnp.pad(w2, ((0, 0), (0, 0), (0, Cmid_p - Cmid), (0, Cout_p - Cout)))
    w2 = w2.astype(jnp.bfloat16)
    sh1 = jnp.pad(sh1, (0, Cmid_p - Cmid)).reshape(1, Cmid_p)
    sh2 = jnp.pad(sh2, (0, Cout_p - Cout)).reshape(1, Cout_p)

    # NCHW -> NHWC + bf16 cast, zero conv halo (2 rows / 1 col) + channel pad,
    # then gather overlapping (SH+4)-row strips so plain blocked BlockSpecs
    # (and automatic double-buffered pipelining) work per strip.
    x = jnp.transpose(x_nchw, (0, 2, 3, 1)).astype(jnp.bfloat16)
    x = jnp.pad(x, ((0, 0), (2, 2), (1, 1), (0, Cin_p - Cin)))
    row_idx = jnp.arange(S)[:, None] * SH + jnp.arange(SH + 4)[None, :]
    xs = x[:, row_idx]                                  # (N, S, SH+4, W+2, Cin_p)

    out = pl.pallas_call(
        _double_conv_kernel,
        out_shape=jax.ShapeDtypeStruct((N, S, SH * W, Cout_p), jnp.bfloat16),
        grid_spec=pltpu.PrefetchScalarGridSpec(
            num_scalar_prefetch=0,
            grid=(N, S),
            in_specs=[
                pl.BlockSpec((None, None, SH + 4, W + 2, Cin_p),
                             lambda n, s: (n, s, 0, 0, 0)),
                pl.BlockSpec((9 * Cin_p, Cmid_p), lambda n, s: (0, 0)),
                pl.BlockSpec((1, Cmid_p), lambda n, s: (0, 0)),
                pl.BlockSpec((3, 3, Cmid_p, Cout_p), lambda n, s: (0, 0, 0, 0)),
                pl.BlockSpec((1, Cout_p), lambda n, s: (0, 0)),
            ],
            out_specs=pl.BlockSpec((None, None, SH * W, Cout_p),
                                   lambda n, s: (n, s, 0, 0)),
            scratch_shapes=[
                pltpu.VMEM((SH + 2, _ALIGN + W + 1, Cmid_p), jnp.bfloat16),
            ],
        ),
        compiler_params=pltpu.CompilerParams(
            # Strips are fully independent (the 1-row stage-1 halo is recomputed),
            # so both grid axes are parallel -> both v7x TensorCores get work.
            dimension_semantics=("parallel", "parallel"),
            # Explicit limit (v5e's default scoped VMEM is only 16 MiB); strip
            # sizing should keep total live VMEM well under v7x's 64 MiB/core.
            vmem_limit_bytes=32 * 1024 * 1024,
        ),
    )(xs, w1, sh1, w2, sh2)

    # (N, S, SH*W, Cout_p) -> (N, H, W, Cout) -> NCHW, upcast from bf16.
    out = out.reshape(N, S, SH, W, Cout_p).reshape(N, H, W, Cout_p)[..., :Cout]
    return jnp.transpose(out, (0, 3, 1, 2)).astype(x_nchw.dtype)


def init_double_conv_params(key, in_channels, out_channels):
    """Deterministic synthetic parameters (shapes match nn.Conv2d/BatchNorm2d)."""
    ks = jax.random.split(key, 6)
    # Conv weights in HWIO layout: (3, 3, Cin, Cout).
    w1 = 0.1 * jax.random.normal(ks[0], (3, 3, in_channels, out_channels), jnp.float32)
    b1 = 0.1 * jax.random.normal(ks[1], (out_channels,), jnp.float32)
    w2 = 0.1 * jax.random.normal(ks[2], (3, 3, out_channels, out_channels), jnp.float32)
    b2 = 0.1 * jax.random.normal(ks[3], (out_channels,), jnp.float32)
    # BatchNorm params / running stats (eval mode).
    gamma1 = 1.0 + 0.1 * jax.random.normal(ks[4], (out_channels,), jnp.float32)
    beta1 = jnp.zeros((out_channels,), jnp.float32) + 0.05
    mean1 = jnp.zeros((out_channels,), jnp.float32)
    var1 = jnp.ones((out_channels,), jnp.float32)
    gamma2 = 1.0 + 0.1 * jax.random.normal(ks[5], (out_channels,), jnp.float32)
    beta2 = jnp.zeros((out_channels,), jnp.float32) - 0.05
    mean2 = jnp.zeros((out_channels,), jnp.float32)
    var2 = jnp.ones((out_channels,), jnp.float32)
    return dict(
        w1=w1, b1=b1, gamma1=gamma1, beta1=beta1, mean1=mean1, var1=var1,
        w2=w2, b2=b2, gamma2=gamma2, beta2=beta2, mean2=mean2, var2=var2,
    )


if __name__ == "__main__":
    key = jax.random.PRNGKey(0)
    k_x, k_p = jax.random.split(key)

    N, Cin, Cout, H, W = 2, 4, 8, 16, 16
    x = jax.random.normal(k_x, (N, Cin, H, W), jnp.float32)
    params = init_double_conv_params(k_p, Cin, Cout)

    out = jax.block_until_ready(double_conv(x, params))

    # Reference in plain JAX: same math as the PyTorch module (eval-mode BN),
    # with bf16 conv operands / f32 accumulation to match the kernel precision.
    def ref_forward(x_nchw):
        y = x_nchw
        for (w, b, g, bt, m, v) in [
            (params["w1"], params["b1"], params["gamma1"], params["beta1"],
             params["mean1"], params["var1"]),
            (params["w2"], params["b2"], params["gamma2"], params["beta2"],
             params["mean2"], params["var2"]),
        ]:
            w_oihw = jnp.transpose(w, (3, 2, 0, 1)).astype(jnp.bfloat16)
            y = jax.lax.conv_general_dilated(
                y.astype(jnp.bfloat16), w_oihw, window_strides=(1, 1),
                padding=((1, 1), (1, 1)),
                dimension_numbers=("NCHW", "OIHW", "NCHW"),
                preferred_element_type=jnp.float32)
            y = y + b[None, :, None, None]
            y = (y - m[None, :, None, None]) / jnp.sqrt(v[None, :, None, None] + 1e-5)
            y = y * g[None, :, None, None] + bt[None, :, None, None]
            y = jnp.maximum(y, 0.0)
        return y

    ref = ref_forward(x)
    assert out.shape == (N, Cout, H, W)
    assert jnp.allclose(out, ref, atol=3e-2, rtol=3e-2), (
        float(jnp.max(jnp.abs(out - ref))))

    print("KERNEL_OK")
</pallas_src>

<mosaic_0001>
module attributes {stable_mosaic.version = 11 : i64} {
  func.func @_double_conv_kernel(%arg0: i32, %arg1: i32, %arg2: memref<1x1x12x18x8xbf16, #tpu.memory_space<vmem>>, %arg3: memref<72x128xbf16, #tpu.memory_space<vmem>>, %arg4: memref<1x128xf32, #tpu.memory_space<vmem>>, %arg5: memref<3x3x128x128xbf16, #tpu.memory_space<vmem>>, %arg6: memref<1x128xf32, #tpu.memory_space<vmem>>, %arg7: memref<1x1x128x128xbf16, #tpu.memory_space<vmem>>, %arg8: memref<10x33x128xbf16, #tpu.memory_space<vmem>>) attributes {dimension_semantics = [#tpu.dimension_semantics<parallel>, #tpu.dimension_semantics<parallel>], iteration_bounds = array<i64: 2, 2>, scalar_prefetch = 0 : i64, scratch_operands = 1 : i64, tpu.core_type = #tpu.core_type<tc>, window_params = [{transform_indices = @transform_0, window_bounds = array<i64: 1, 1, 12, 18, 8>}, {pipeline_mode = #tpu.pipeline_mode<synchronous>, transform_indices = @transform_1, window_bounds = array<i64: 72, 128>}, {pipeline_mode = #tpu.pipeline_mode<synchronous>, transform_indices = @transform_2, window_bounds = array<i64: 1, 128>}, {pipeline_mode = #tpu.pipeline_mode<synchronous>, transform_indices = @transform_3, window_bounds = array<i64: 3, 3, 128, 128>}, {pipeline_mode = #tpu.pipeline_mode<synchronous>, transform_indices = @transform_4, window_bounds = array<i64: 1, 128>}, {transform_indices = @transform_5, window_bounds = array<i64: 1, 1, 128, 128>}]} {
    %c0 = arith.constant 0 : index
    %c0_0 = arith.constant 0 : index
    %c0_1 = arith.constant 0 : index
    %c0_2 = arith.constant 0 : index
    %c0_3 = arith.constant 0 : index
    %0 = vector.load %arg2[%c0, %c0_0, %c0_1, %c0_2, %c0_3] : memref<1x1x12x18x8xbf16, #tpu.memory_space<vmem>>, vector<1x1x10x16x8xbf16>
    %1 = vector.shape_cast %0 : vector<1x1x10x16x8xbf16> to vector<10x16x8xbf16>
    %2 = vector.shape_cast %1 : vector<10x16x8xbf16> to vector<160x8xbf16>
    %c0_4 = arith.constant 0 : index
    %c0_5 = arith.constant 0 : index
    %c0_6 = arith.constant 0 : index
    %c1 = arith.constant 1 : index
    %c0_7 = arith.constant 0 : index
    %3 = vector.load %arg2[%c0_4, %c0_5, %c0_6, %c1, %c0_7] : memref<1x1x12x18x8xbf16, #tpu.memory_space<vmem>>, vector<1x1x10x16x8xbf16>
    %4 = vector.shape_cast %3 : vector<1x1x10x16x8xbf16> to vector<10x16x8xbf16>
    %5 = vector.shape_cast %4 : vector<10x16x8xbf16> to vector<160x8xbf16>
    %c0_8 = arith.constant 0 : index
    %c0_9 = arith.constant 0 : index
    %c0_10 = arith.constant 0 : index
    %c2 = arith.constant 2 : index
    %c0_11 = arith.constant 0 : index
    %6 = vector.load %arg2[%c0_8, %c0_9, %c0_10, %c2, %c0_11] : memref<1x1x12x18x8xbf16, #tpu.memory_space<vmem>>, vector<1x1x10x16x8xbf16>
    %7 = vector.shape_cast %6 : vector<1x1x10x16x8xbf16> to vector<10x16x8xbf16>
    %8 = vector.shape_cast %7 : vector<10x16x8xbf16> to vector<160x8xbf16>
    %c0_12 = arith.constant 0 : index
    %c0_13 = arith.constant 0 : index
    %c1_14 = arith.constant 1 : index
    %c0_15 = arith.constant 0 : index
    %c0_16 = arith.constant 0 : index
    %9 = vector.load %arg2[%c0_12, %c0_13, %c1_14, %c0_15, %c0_16] : memref<1x1x12x18x8xbf16, #tpu.memory_space<vmem>>, vector<1x1x10x16x8xbf16>
    %10 = vector.shape_cast %9 : vector<1x1x10x16x8xbf16> to vector<10x16x8xbf16>
    %11 = vector.shape_cast %10 : vector<10x16x8xbf16> to vector<160x8xbf16>
    %c0_17 = arith.constant 0 : index
    %c0_18 = arith.constant 0 : index
    %c1_19 = arith.constant 1 : index
    %c1_20 = arith.constant 1 : index
    %c0_21 = arith.constant 0 : index
    %12 = vector.load %arg2[%c0_17, %c0_18, %c1_19, %c1_20, %c0_21] : memref<1x1x12x18x8xbf16, #tpu.memory_space<vmem>>, vector<1x1x10x16x8xbf16>
    %13 = vector.shape_cast %12 : vector<1x1x10x16x8xbf16> to vector<10x16x8xbf16>
    %14 = vector.shape_cast %13 : vector<10x16x8xbf16> to vector<160x8xbf16>
    %c0_22 = arith.constant 0 : index
    %c0_23 = arith.constant 0 : index
    %c1_24 = arith.constant 1 : index
    %c2_25 = arith.constant 2 : index
    %c0_26 = arith.constant 0 : index
    %15 = vector.load %arg2[%c0_22, %c0_23, %c1_24, %c2_25, %c0_26] : memref<1x1x12x18x8xbf16, #tpu.memory_space<vmem>>, vector<1x1x10x16x8xbf16>
    %16 = vector.shape_cast %15 : vector<1x1x10x16x8xbf16> to vector<10x16x8xbf16>
    %17 = vector.shape_cast %16 : vector<10x16x8xbf16> to vector<160x8xbf16>
    %c0_27 = arith.constant 0 : index
    %c0_28 = arith.constant 0 : index
    %c2_29 = arith.constant 2 : index
    %c0_30 = arith.constant 0 : index
    %c0_31 = arith.constant 0 : index
    %18 = vector.load %arg2[%c0_27, %c0_28, %c2_29, %c0_30, %c0_31] : memref<1x1x12x18x8xbf16, #tpu.memory_space<vmem>>, vector<1x1x10x16x8xbf16>
    %19 = vector.shape_cast %18 : vector<1x1x10x16x8xbf16> to vector<10x16x8xbf16>
    %20 = vector.shape_cast %19 : vector<10x16x8xbf16> to vector<160x8xbf16>
    %c0_32 = arith.constant 0 : index
    %c0_33 = arith.constant 0 : index
    %c2_34 = arith.constant 2 : index
    %c1_35 = arith.constant 1 : index
    %c0_36 = arith.constant 0 : index
    %21 = vector.load %arg2[%c0_32, %c0_33, %c2_34, %c1_35, %c0_36] : memref<1x1x12x18x8xbf16, #tpu.memory_space<vmem>>, vector<1x1x10x16x8xbf16>
    %22 = vector.shape_cast %21 : vector<1x1x10x16x8xbf16> to vector<10x16x8xbf16>
    %23 = vector.shape_cast %22 : vector<10x16x8xbf16> to vector<160x8xbf16>
    %c0_37 = arith.constant 0 : index
    %c0_38 = arith.constant 0 : index
    %c2_39 = arith.constant 2 : index
    %c2_40 = arith.constant 2 : index
    %c0_41 = arith.constant 0 : index
    %24 = vector.load %arg2[%c0_37, %c0_38, %c2_39, %c2_40, %c0_41] : memref<1x1x12x18x8xbf16, #tpu.memory_space<vmem>>, vector<1x1x10x16x8xbf16>
    %25 = vector.shape_cast %24 : vector<1x1x10x16x8xbf16> to vector<10x16x8xbf16>
    %26 = vector.shape_cast %25 : vector<10x16x8xbf16> to vector<160x8xbf16>
    %27 = tpu.concatenate %2, %5, %8, %11, %14, %17, %20, %23, %26 in 1 : vector<160x8xbf16>, vector<160x8xbf16>, vector<160x8xbf16>, vector<160x8xbf16>, vector<160x8xbf16>, vector<160x8xbf16>, vector<160x8xbf16>, vector<160x8xbf16>, vector<160x8xbf16> -> vector<160x72xbf16>
    %c0_42 = arith.constant 0 : index
    %c0_43 = arith.constant 0 : index
    %28 = vector.load %arg3[%c0_42, %c0_43] : memref<72x128xbf16, #tpu.memory_space<vmem>>, vector<72x128xbf16>
    %cst = arith.constant dense<0.000000e+00> : vector<160x128xf32>
    %29 = tpu.matmul %27, %28, %cst {dimension_numbers = #tpu.dot_dimension_numbers<[1], [0], [0], [1], [0, 0, 1, 1], [], []>} : vector<160x72xbf16>, vector<72x128xbf16>, vector<160x128xf32> -> vector<160x128xf32>
    %c0_44 = arith.constant 0 : index
    %c0_45 = arith.constant 0 : index
    %30 = vector.load %arg4[%c0_44, %c0_45] : memref<1x128xf32, #tpu.memory_space<vmem>>, vector<1x128xf32>
    %31 = vector.shape_cast %30 : vector<1x128xf32> to vector<128xf32>
    %32 = vector.shape_cast %31 : vector<128xf32> to vector<1x128xf32>
    %33 = vector.broadcast %32 : vector<1x128xf32> to vector<160x128xf32>
    %34 = arith.addf %29, %33 : vector<160x128xf32>
    %cst_46 = arith.constant 0.000000e+00 : f32
    %35 = vector.broadcast %cst_46 : f32 to vector<160x128xf32>
    %36 = arith.maximumf %34, %35 : vector<160x128xf32>
    %cst_47 = arith.constant 0.000000e+00 : bf16
    %37 = vector.broadcast %cst_47 : bf16 to vector<10x1x128xbf16>
    %c0_48 = arith.constant 0 : index
    %c15 = arith.constant 15 : index
    %c0_49 = arith.constant 0 : index
    %38 = vector.load %arg8[%c0_48, %c15, %c0_49] : memref<10x33x128xbf16, #tpu.memory_space<vmem>>, vector<10x1x128xbf16>
    tpu.vector_store %arg8[%c0_48, %c15, %c0_49], %37 {strides = array<i32>} : memref<10x33x128xbf16, #tpu.memory_space<vmem>>, vector<10x1x128xbf16>,
    %c0_50 = arith.constant 0 : index
    %c32 = arith.constant 32 : index
    %c0_51 = arith.constant 0 : index
    %39 = vector.load %arg8[%c0_50, %c32, %c0_51] : memref<10x33x128xbf16, #tpu.memory_space<vmem>>, vector<10x1x128xbf16>
    tpu.vector_store %arg8[%c0_50, %c32, %c0_51], %37 {strides = array<i32>} : memref<10x33x128xbf16, #tpu.memory_space<vmem>>, vector<10x1x128xbf16>,
    %40 = vector.shape_cast %36 : vector<160x128xf32> to vector<10x16x128xf32>
    %41 = arith.truncf %40 : vector<10x16x128xf32> to vector<10x16x128xbf16>
    %c0_52 = arith.constant 0 : index
    %c16 = arith.constant 16 : index
    %c0_53 = arith.constant 0 : index
    %42 = vector.load %arg8[%c0_52, %c16, %c0_53] : memref<10x33x128xbf16, #tpu.memory_space<vmem>>, vector<10x16x128xbf16>
    tpu.vector_store %arg8[%c0_52, %c16, %c0_53], %41 {strides = array<i32>} : memref<10x33x128xbf16, #tpu.memory_space<vmem>>, vector<10x16x128xbf16>,
    %cst_54 = arith.constant 0.000000e+00 : bf16
    %43 = vector.broadcast %cst_54 : bf16 to vector<1x16x128xbf16>
    %c0_i32 = arith.constant 0 : i32
    %44 = arith.cmpi eq, %arg1, %c0_i32 : i32
    %45 = arith.extui %44 : i1 to i32
    %c0_i32_55 = arith.constant 0 : i32
    %46 = arith.cmpi ne, %45, %c0_i32_55 : i32
    scf.if %46 {
      %c0_136 = arith.constant 0 : index
      %c16_137 = arith.constant 16 : index
      %c0_138 = arith.constant 0 : index
      %116 = vector.load %arg8[%c0_136, %c16_137, %c0_138] : memref<10x33x128xbf16, #tpu.memory_space<vmem>>, vector<1x16x128xbf16>
      tpu.vector_store %arg8[%c0_136, %c16_137, %c0_138], %43 {strides = array<i32>} : memref<10x33x128xbf16, #tpu.memory_space<vmem>>, vector<1x16x128xbf16>,
    } else {
    }
    %c1_i32 = arith.constant 1 : i32
    %47 = arith.cmpi eq, %arg1, %c1_i32 : i32
    %48 = arith.extui %47 : i1 to i32
    %c0_i32_56 = arith.constant 0 : i32
    %49 = arith.cmpi ne, %48, %c0_i32_56 : i32
    scf.if %49 {
      %c9 = arith.constant 9 : index
      %c16_136 = arith.constant 16 : index
      %c0_137 = arith.constant 0 : index
      %116 = vector.load %arg8[%c9, %c16_136, %c0_137] : memref<10x33x128xbf16, #tpu.memory_space<vmem>>, vector<1x16x128xbf16>
      tpu.vector_store %arg8[%c9, %c16_136, %c0_137], %43 {strides = array<i32>} : memref<10x33x128xbf16, #tpu.memory_space<vmem>>, vector<1x16x128xbf16>,
    } else {
    }
    %cst_57 = arith.constant 0.000000e+00 : f32
    %50 = vector.broadcast %cst_57 : f32 to vector<128x128xf32>
    %c0_58 = arith.constant 0 : index
    %c15_59 = arith.constant 15 : index
    %c0_60 = arith.constant 0 : index
    %51 = vector.load %arg8[%c0_58, %c15_59, %c0_60] : memref<10x33x128xbf16, #tpu.memory_space<vmem>>, vector<8x16x128xbf16>
    %52 = vector.shape_cast %51 : vector<8x16x128xbf16> to vector<128x128xbf16>
    %c0_61 = arith.constant 0 : index
    %c0_62 = arith.constant 0 : index
    %c0_63 = arith.constant 0 : index
    %c0_64 = arith.constant 0 : index
    %53 = vector.load %arg5[%c0_61, %c0_62, %c0_63, %c0_64] : memref<3x3x128x128xbf16, #tpu.memory_space<vmem>>, vector<1x1x128x128xbf16>
    %54 = vector.shape_cast %53 : vector<1x1x128x128xbf16> to vector<128x128xbf16>
    %cst_65 = arith.constant dense<0.000000e+00> : vector<128x128xf32>
    %55 = tpu.matmul %52, %54, %cst_65 {dimension_numbers = #tpu.dot_dimension_numbers<[1], [0], [0], [1], [0, 0, 1, 1], [], []>} : vector<128x128xbf16>, vector<128x128xbf16>, vector<128x128xf32> -> vector<128x128xf32>
    %56 = arith.addf %50, %55 : vector<128x128xf32>
    %c0_66 = arith.constant 0 : index
    %c16_67 = arith.constant 16 : index
    %c0_68 = arith.constant 0 : index
    %57 = vector.load %arg8[%c0_66, %c16_67, %c0_68] : memref<10x33x128xbf16, #tpu.memory_space<vmem>>, vector<8x16x128xbf16>
    %58 = vector.shape_cast %57 : vector<8x16x128xbf16> to vector<128x128xbf16>
    %c0_69 = arith.constant 0 : index
    %c1_70 = arith.constant 1 : index
    %c0_71 = arith.constant 0 : index
    %c0_72 = arith.constant 0 : index
    %59 = vector.load %arg5[%c0_69, %c1_70, %c0_71, %c0_72] : memref<3x3x128x128xbf16, #tpu.memory_space<vmem>>, vector<1x1x128x128xbf16>
    %60 = vector.shape_cast %59 : vector<1x1x128x128xbf16> to vector<128x128xbf16>
    %cst_73 = arith.constant dense<0.000000e+00> : vector<128x128xf32>
    %61 = tpu.matmul %58, %60, %cst_73 {dimension_numbers = #tpu.dot_dimension_numbers<[1], [0], [0], [1], [0, 0, 1, 1], [], []>} : vector<128x128xbf16>, vector<128x128xbf16>, vector<128x128xf32> -> vector<128x128xf32>
    %62 = arith.addf %56, %61 : vector<128x128xf32>
    %c0_74 = arith.constant 0 : index
    %c17 = arith.constant 17 : index
    %c0_75 = arith.constant 0 : index
    %63 = vector.load %arg8[%c0_74, %c17, %c0_75] : memref<10x33x128xbf16, #tpu.memory_space<vmem>>, vector<8x16x128xbf16>
    %64 = vector.shape_cast %63 : vector<8x16x128xbf16> to vector<128x128xbf16>
    %c0_76 = arith.constant 0 : index
    %c2_77 = arith.constant 2 : index
    %c0_78 = arith.constant 0 : index
    %c0_79 = arith.constant 0 : index
    %65 = vector.load %arg5[%c0_76, %c2_77, %c0_78, %c0_79] : memref<3x3x128x128xbf16, #tpu.memory_space<vmem>>, vector<1x1x128x128xbf16>
    %66 = vector.shape_cast %65 : vector<1x1x128x128xbf16> to vector<128x128xbf16>
    %cst_80 = arith.constant dense<0.000000e+00> : vector<128x128xf32>
    %67 = tpu.matmul %64, %66, %cst_80 {dimension_numbers = #tpu.dot_dimension_numbers<[1], [0], [0], [1], [0, 0, 1, 1], [], []>} : vector<128x128xbf16>, vector<128x128xbf16>, vector<128x128xf32> -> vector<128x128xf32>
    %68 = arith.addf %62, %67 : vector<128x128xf32>
    %c1_81 = arith.constant 1 : index
    %c15_82 = arith.constant 15 : index
    %c0_83 = arith.constant 0 : index
    %69 = vector.load %arg8[%c1_81, %c15_82, %c0_83] : memref<10x33x128xbf16, #tpu.memory_space<vmem>>, vector<8x16x128xbf16>
    %70 = vector.shape_cast %69 : vector<8x16x128xbf16> to vector<128x128xbf16>
    %c1_84 = arith.constant 1 : index
    %c0_85 = arith.constant 0 : index
    %c0_86 = arith.constant 0 : index
    %c0_87 = arith.constant 0 : index
    %71 = vector.load %arg5[%c1_84, %c0_85, %c0_86, %c0_87] : memref<3x3x128x128xbf16, #tpu.memory_space<vmem>>, vector<1x1x128x128xbf16>
    %72 = vector.shape_cast %71 : vector<1x1x128x128xbf16> to vector<128x128xbf16>
    %cst_88 = arith.constant dense<0.000000e+00> : vector<128x128xf32>
    %73 = tpu.matmul %70, %72, %cst_88 {dimension_numbers = #tpu.dot_dimension_numbers<[1], [0], [0], [1], [0, 0, 1, 1], [], []>} : vector<128x128xbf16>, vector<128x128xbf16>, vector<128x128xf32> -> vector<128x128xf32>
    %74 = arith.addf %68, %73 : vector<128x128xf32>
    %c1_89 = arith.constant 1 : index
    %c16_90 = arith.constant 16 : index
    %c0_91 = arith.constant 0 : index
    %75 = vector.load %arg8[%c1_89, %c16_90, %c0_91] : memref<10x33x128xbf16, #tpu.memory_space<vmem>>, vector<8x16x128xbf16>
    %76 = vector.shape_cast %75 : vector<8x16x128xbf16> to vector<128x128xbf16>
    %c1_92 = arith.constant 1 : index
    %c1_93 = arith.constant 1 : index
    %c0_94 = arith.constant 0 : index
    %c0_95 = arith.constant 0 : index
    %77 = vector.load %arg5[%c1_92, %c1_93, %c0_94, %c0_95] : memref<3x3x128x128xbf16, #tpu.memory_space<vmem>>, vector<1x1x128x128xbf16>
    %78 = vector.shape_cast %77 : vector<1x1x128x128xbf16> to vector<128x128xbf16>
    %cst_96 = arith.constant dense<0.000000e+00> : vector<128x128xf32>
    %79 = tpu.matmul %76, %78, %cst_96 {dimension_numbers = #tpu.dot_dimension_numbers<[1], [0], [0], [1], [0, 0, 1, 1], [], []>} : vector<128x128xbf16>, vector<128x128xbf16>, vector<128x128xf32> -> vector<128x128xf32>
    %80 = arith.addf %74, %79 : vector<128x128xf32>
    %c1_97 = arith.constant 1 : index
    %c17_98 = arith.constant 17 : index
    %c0_99 = arith.constant 0 : index
    %81 = vector.load %arg8[%c1_97, %c17_98, %c0_99] : memref<10x33x128xbf16, #tpu.memory_space<vmem>>, vector<8x16x128xbf16>
    %82 = vector.shape_cast %81 : vector<8x16x128xbf16> to vector<128x128xbf16>
    %c1_100 = arith.constant 1 : index
    %c2_101 = arith.constant 2 : index
    %c0_102 = arith.constant 0 : index
    %c0_103 = arith.constant 0 : index
    %83 = vector.load %arg5[%c1_100, %c2_101, %c0_102, %c0_103] : memref<3x3x128x128xbf16, #tpu.memory_space<vmem>>, vector<1x1x128x128xbf16>
    %84 = vector.shape_cast %83 : vector<1x1x128x128xbf16> to vector<128x128xbf16>
    %cst_104 = arith.constant dense<0.000000e+00> : vector<128x128xf32>
    %85 = tpu.matmul %82, %84, %cst_104 {dimension_numbers = #tpu.dot_dimension_numbers<[1], [0], [0], [1], [0, 0, 1, 1], [], []>} : vector<128x128xbf16>, vector<128x128xbf16>, vector<128x128xf32> -> vector<128x128xf32>
    %86 = arith.addf %80, %85 : vector<128x128xf32>
    %c2_105 = arith.constant 2 : index
    %c15_106 = arith.constant 15 : index
    %c0_107 = arith.constant 0 : index
    %87 = vector.load %arg8[%c2_105, %c15_106, %c0_107] : memref<10x33x128xbf16, #tpu.memory_space<vmem>>, vector<8x16x128xbf16>
    %88 = vector.shape_cast %87 : vector<8x16x128xbf16> to vector<128x128xbf16>
    %c2_108 = arith.constant 2 : index
    %c0_109 = arith.constant 0 : index
    %c0_110 = arith.constant 0 : index
    %c0_111 = arith.constant 0 : index
    %89 = vector.load %arg5[%c2_108, %c0_109, %c0_110, %c0_111] : memref<3x3x128x128xbf16, #tpu.memory_space<vmem>>, vector<1x1x128x128xbf16>
    %90 = vector.shape_cast %89 : vector<1x1x128x128xbf16> to vector<128x128xbf16>
    %cst_112 = arith.constant dense<0.000000e+00> : vector<128x128xf32>
    %91 = tpu.matmul %88, %90, %cst_112 {dimension_numbers = #tpu.dot_dimension_numbers<[1], [0], [0], [1], [0, 0, 1, 1], [], []>} : vector<128x128xbf16>, vector<128x128xbf16>, vector<128x128xf32> -> vector<128x128xf32>
    %92 = arith.addf %86, %91 : vector<128x128xf32>
    %c2_113 = arith.constant 2 : index
    %c16_114 = arith.constant 16 : index
    %c0_115 = arith.constant 0 : index
    %93 = vector.load %arg8[%c2_113, %c16_114, %c0_115] : memref<10x33x128xbf16, #tpu.memory_space<vmem>>, vector<8x16x128xbf16>
    %94 = vector.shape_cast %93 : vector<8x16x128xbf16> to vector<128x128xbf16>
    %c2_116 = arith.constant 2 : index
    %c1_117 = arith.constant 1 : index
    %c0_118 = arith.constant 0 : index
    %c0_119 = arith.constant 0 : index
    %95 = vector.load %arg5[%c2_116, %c1_117, %c0_118, %c0_119] : memref<3x3x128x128xbf16, #tpu.memory_space<vmem>>, vector<1x1x128x128xbf16>
    %96 = vector.shape_cast %95 : vector<1x1x128x128xbf16> to vector<128x128xbf16>
    %cst_120 = arith.constant dense<0.000000e+00> : vector<128x128xf32>
    %97 = tpu.matmul %94, %96, %cst_120 {dimension_numbers = #tpu.dot_dimension_numbers<[1], [0], [0], [1], [0, 0, 1, 1], [], []>} : vector<128x128xbf16>, vector<128x128xbf16>, vector<128x128xf32> -> vector<128x128xf32>
    %98 = arith.addf %92, %97 : vector<128x128xf32>
    %c2_121 = arith.constant 2 : index
    %c17_122 = arith.constant 17 : index
    %c0_123 = arith.constant 0 : index
    %99 = vector.load %arg8[%c2_121, %c17_122, %c0_123] : memref<10x33x128xbf16, #tpu.memory_space<vmem>>, vector<8x16x128xbf16>
    %100 = vector.shape_cast %99 : vector<8x16x128xbf16> to vector<128x128xbf16>
    %c2_124 = arith.constant 2 : index
    %c2_125 = arith.constant 2 : index
    %c0_126 = arith.constant 0 : index
    %c0_127 = arith.constant 0 : index
    %101 = vector.load %arg5[%c2_124, %c2_125, %c0_126, %c0_127] : memref<3x3x128x128xbf16, #tpu.memory_space<vmem>>, vector<1x1x128x128xbf16>
    %102 = vector.shape_cast %101 : vector<1x1x128x128xbf16> to vector<128x128xbf16>
    %cst_128 = arith.constant dense<0.000000e+00> : vector<128x128xf32>
    %103 = tpu.matmul %100, %102, %cst_128 {dimension_numbers = #tpu.dot_dimension_numbers<[1], [0], [0], [1], [0, 0, 1, 1], [], []>} : vector<128x128xbf16>, vector<128x128xbf16>, vector<128x128xf32> -> vector<128x128xf32>
    %104 = arith.addf %98, %103 : vector<128x128xf32>
    %c0_129 = arith.constant 0 : index
    %c0_130 = arith.constant 0 : index
    %105 = vector.load %arg6[%c0_129, %c0_130] : memref<1x128xf32, #tpu.memory_space<vmem>>, vector<1x128xf32>
    %106 = vector.shape_cast %105 : vector<1x128xf32> to vector<128xf32>
    %107 = vector.shape_cast %106 : vector<128xf32> to vector<1x128xf32>
    %108 = vector.broadcast %107 : vector<1x128xf32> to vector<128x128xf32>
    %109 = arith.addf %104, %108 : vector<128x128xf32>
    %cst_131 = arith.constant 0.000000e+00 : f32
    %110 = vector.broadcast %cst_131 : f32 to vector<128x128xf32>
    %111 = arith.maximumf %109, %110 : vector<128x128xf32>
    %112 = arith.truncf %111 : vector<128x128xf32> to vector<128x128xbf16>
    %c0_132 = arith.constant 0 : index
    %c0_133 = arith.constant 0 : index
    %c0_134 = arith.constant 0 : index
    %c0_135 = arith.constant 0 : index
    %113 = vector.load %arg7[%c0_132, %c0_133, %c0_134, %c0_135] : memref<1x1x128x128xbf16, #tpu.memory_space<vmem>>, vector<1x1x128x128xbf16>
    %114 = vector.shape_cast %113 : vector<1x1x128x128xbf16> to vector<128x128xbf16>
    %115 = vector.shape_cast %112 : vector<128x128xbf16> to vector<1x1x128x128xbf16>
    tpu.vector_store %arg7[%c0_132, %c0_133, %c0_134, %c0_135], %115 {strides = array<i32>} : memref<1x1x128x128xbf16, #tpu.memory_space<vmem>>, vector<1x1x128x128xbf16>,
    return
  }
  func.func @transform_0(%arg0: i32, %arg1: i32) -> (i32, i32, i32, i32, i32) {
    %c0_i32 = arith.constant 0 : i32
    %c0_i32_0 = arith.constant 0 : i32
    %c0_i32_1 = arith.constant 0 : i32
    %c0_i32_2 = arith.constant 0 : i32
    return %arg0, %arg1, %c0_i32, %c0_i32_0, %c0_i32_1 : i32, i32, i32, i32, i32
  }
  func.func @transform_1(%arg0: i32, %arg1: i32) -> (i32, i32) {
    %c0_i32 = arith.constant 0 : i32
    %c0_i32_0 = arith.constant 0 : i32
    %c0_i32_1 = arith.constant 0 : i32
    return %c0_i32, %c0_i32_0 : i32, i32
  }
  func.func @transform_2(%arg0: i32, %arg1: i32) -> (i32, i32) {
    %c0_i32 = arith.constant 0 : i32
    %c0_i32_0 = arith.constant 0 : i32
    %c0_i32_1 = arith.constant 0 : i32
    return %c0_i32, %c0_i32_0 : i32, i32
  }
  func.func @transform_3(%arg0: i32, %arg1: i32) -> (i32, i32, i32, i32) {
    %c0_i32 = arith.constant 0 : i32
    %c0_i32_0 = arith.constant 0 : i32
    %c0_i32_1 = arith.constant 0 : i32
    %c0_i32_2 = arith.constant 0 : i32
    %c0_i32_3 = arith.constant 0 : i32
    return %c0_i32, %c0_i32_0, %c0_i32_1, %c0_i32_2 : i32, i32, i32, i32
  }
  func.func @transform_4(%arg0: i32, %arg1: i32) -> (i32, i32) {
    %c0_i32 = arith.constant 0 : i32
    %c0_i32_0 = arith.constant 0 : i32
    %c0_i32_1 = arith.constant 0 : i32
    return %c0_i32, %c0_i32_0 : i32, i32
  }
  func.func @transform_5(%arg0: i32, %arg1: i32) -> (i32, i32, i32, i32) {
    %c0_i32 = arith.constant 0 : i32
    %c0_i32_0 = arith.constant 0 : i32
    %c0_i32_1 = arith.constant 0 : i32
    return %arg0, %arg1, %c0_i32, %c0_i32_0 : i32, i32, i32, i32
  }
}

</mosaic_0001>

<bundles_post_ra>
// kernel: tpu_custom_call.1
= control target key start
LH: loop header
LB: loop body
LE: loop exit
PB: predicated region body
PF: predicated region fallthrough
CT: control target
= control target key end

     0   :  { %10 = vsyncpa [#allocation4], 0  ;;  %s9590_s0 = inlined_call_operand.vmem [shape: bf16[2,2,12,18,8], index: 0, kind: input, shape index: {}]   ;;  %s9591_s1 = inlined_call_operand.vmem [shape: bf16[72,128], index: 1, kind: input, shape index: {}]   ;;  %s9592_s2 = inlined_call_operand.vmem [shape: f32[1,128], index: 2, kind: input, shape index: {}]   ;;  %s9593_s3 = inlined_call_operand.vmem [shape: bf16[3,3,128,128], index: 3, kind: input, shape index: {}]   ;;  %s9594_s4 = inlined_call_operand.vmem [shape: f32[1,128], index: 4, kind: input, shape index: {}]   ;;  %s9595_s5 = inlined_call_operand.hbm [shape: bf16[2,2,128,128], index: 5, kind: output, shape index: {}]  }
   0x1   :  { %12 = vsyncpa [#allocation4 + $0x1], 0  ;;  %s7447_s18 = smov 0   ;;  %s7449_s19 = smov 0  }
   0x2   :  { %s7451_s20 = smov 0   ;;  %s7453_s21 = smov 0  }
   0x3   :  { %s7455_s22 = smov 0   ;;  %s7457_s23 = smov 0  }
   0x4   :  { %s7459_s24 = smov 0   ;;  %s7461_s25 = smov 0  }
   0x5 LB: > { %s5795_s26 = sadd.s32 4294967295, %s7403_s25   ;;  %s5796_s27 = sadd.s32 4294967294, %s7403_s25   ;;  %s7403_s25 = sphi %s7461_s25, %s18_s25   ;;  %s7399_s24 = sphi %s7459_s24, %s9680_s24   ;;  %s7395_s23 = sphi %s7457_s23, %s9679_s23   ;;  %s7391_s22 = sphi %s7455_s22, %s9678_s22   ;;  %s7387_s21 = sphi %s7453_s21, %s9677_s21   ;;  %s7383_s20 = sphi %s7451_s20, %s9676_s20   ;;  %s7379_s19 = sphi %s7449_s19, %s9675_s19   ;;  %s7375_s18 = sphi %s7447_s18, %s9674_s18  }
   0x6   : > { %s27_s28 = sadd.s32 1, %s7395_s23  ;;  %s30_s29 = sadd.s32 1, %s7399_s24 }
   0x7   : > { %p28_p0 = scmp.ge.s32.totalorder %s27_s28, 2  ;;  %p161_p1 = scmp.ne.s32.totalorder %s7383_s20, %s7379_s19 }
   0x8   : > { %p162_p2 = scmp.eq.s32.totalorder %s5795_s26, 3  ;;  %p167_p5 = scmp.ne.s32.totalorder %s7379_s19, %s7375_s18 }
   0x9   : > { %s9682_s28 = smov (%p28_p0, %s27_s28), 0  ;;  %s9684_s29 = smov (!%p28_p0, %s30_s29), %s7399_s24 }
   0xa   : > { %s147_s30 = ssub.s32 %s7395_s23, %s9682_s28  ;;  %p7498_p3 = por %p162_p2, %p161_p1 }
   0xb   : > { %p32_p4 = scmp.ge.s32.totalorder %s9684_s29, 2  ;;  %p168_p6 = scmp.eq.s32.totalorder %s5796_s27, 3 }
   0xc   : > { %p5799_p7 = scmp.ge.s32.totalorder %s7403_s25, 1  ;;  %p210_p9 = scmp.lt.s32.totalorder %s7403_s25, 5 }
   0xd   : > { %s9686_s29 = smov (%p32_p4, %s9684_s29), 0  ;;  %p7507_p8 = por %p168_p6, %p167_p5 }
   0xe   : > { %s146_s8 = ssub.s32 %s7399_s24, %s9686_s29  ;;  %s151_s9 = sadd.s32 1, %s7383_s20 }
   0xf   : > { %s148_s10 = sor.u32 %s147_s30, %s146_s8  ;;  %p211_p10 = pnand %p5799_p7, %p210_p9 }
  0x10   : > { %p149_p11 = scmp.eq.s32.totalorder %s148_s10, 0 }
  0x11   : > { %214 = sbr.rel (%p211_p10) target bundleno = 1052 (0x41c), region = 40 }
  0x12   : > { %s7516_s11 = scalar_select %p149_p11, %s7383_s20, %s151_s9  }
  0x18   : > { %p242_p12 = scmp.lt.s32.totalorder %s7391_s22, 1  ;;  %p244_p13 = scmp.lt.s32.totalorder %s7387_s21, 1  ;;  %vm565_vm0 = vcmask 1042432   ;;  %vm566_vm1 = vcmask 1046532   ;;  %vm282_vm3 = vsmask.f32 3328 }
  0x19   : > { %s7405_s8 = smov 24   ;;  %s9597_s9 = smov 48   ;;  %vm7569_vm2 = vmor %vm565_vm0, %vm566_vm1  ;;  %vm283_vm4 = vsmask.f32 7440  ;;  %vm1860_vm6 = vcmask 64512   ;;  %vm1891_vm7 = vcmask 130048  }
  0x1a   : > { %s243_s12 = scalar_select %p242_p12, %s7391_s22, 1  ;;  %vm7616_vm5 = vmor %vm282_vm3, %vm283_vm4  ;;  %vm1912_vm8 = vcmask 195584   ;;  %vm1933_vm9 = vcmask 261120   ;;  %vm1954_vm10 = vcmask 326656   ;;  %vm1975_vm11 = vcmask 392192  }
  0x1b   : > { %s245_s13 = scalar_select %p244_p13, %s7387_s21, 1  ;;  %vm1996_vm12 = vcmask 457728   ;;  %vm2102_vm13 = vcmask 1043456   ;;  %vm2017_vm14 = vcmask 523264   ;;  %vm2081_vm15 = vcmask 588800  }
  0x1c   : > { %s7079_s14 = smul.u32 72, %s243_s12  ;;  %s7407_s10 = smov 40   ;;  %vm2239_vm0 = vcmask 1043459   ;;  %vm2240_vm1 = vsmask.f32 7950 }
  0x1d   : > { %s7078_s15 = smul.u32 36, %s245_s13  ;;  %s7408_s12 = smov 16   ;;  %vm8482_vm3 = vmand %vm2239_vm0, %vm2240_vm1  ;;  %vm2273_vm4 = vsmask.f32 256 }
  0x1e   : > { %s7409_s13 = smov 8   ;;  %p6038_p0 = scmp.ne.s32.totalorder %s7387_s21, 0 }
  0x1f   : > { %s248_s16 = sadd.s32 %s7079_s14, %s7078_s15  ;;  %s9596_s14 = sand.u32 1, %s7379_s19  }
  0x20   : > { %s5801_s17 = sshll.u32 %s248_s16, 2  ;;  %s7410_s15 = smov 32  }
  0x21   : > { %s7525_s30 = scalar_lea.vmem %s9590_s0, %s5801_s17  ;;  %s7683_s16 = sshll.u32 %s9596_s14, 6 }
  0x22   : > { %v5814_v0 = vld [vmem:[%s7525_s30 + $0x18] sm:$0xf]  ;;  %v7529_v1 = vld [vmem:[%s7525_s30 + $0x1c] sm:$0xf]  ;;  %v5812_v2 = vld [vmem:[%s7525_s30 + $0xc] sm:$0xf] }
  0x23   : > { %v703_v3 = vshll.u32 %v7529_v1, 16  ;;  %v707_v4 = vshrl.u32 %v7529_v1, 16  ;;  %v5943_v5 = vcombine.low %v5814_v0, %v7529_v1  ;;  %v694_v6 = vshrl.u32 %v5814_v0, 16  ;;  %v7536_v7 = vld [vmem:[%s7525_s30 + $0x10] sm:$0xf]  ;;  %s7412_s14 = smov 64  }
  0x24   : > { %v697_v8 = vshll.u32 %v5814_v0, 16  ;;  %v679_v9 = vshll.u32 %v7536_v7, 16  ;;  %v683_v10 = vshrl.u32 %v7536_v7, 16  ;;  %v5942_v11 = vcombine.low %v5812_v2, %v7536_v7  ;;  %v5864_v12 = vld [vmem:[%s7525_s30 + $0x24] sm:$0xf]  ;;  %s9615_s17 = smov 48  }
  0x25   : > { %v7542_v13 = vrot.slane %v707_v4, 4  ;;  %1582 = vrot.lane.b32.xlu1 %v5943_v5, %s7405_s8  ;;  %v696_v14 = vrot.slane %v694_v6, 4  ;;  %v670_v15 = vshrl.u32 %v5812_v2, 16  ;;  %v673_v16 = vshll.u32 %v5812_v2, 16  ;;  %v7546_v17 = vld [vmem:[%s7525_s30 + $0x28] sm:$0xf] }
  0x26   : > { %v699_v18 = vrot.slane %v697_v8, 5  ;;  %v7548_v19 = vrot.slane %v683_v10, 4  ;;  %1580 = vrot.lane.b32.xlu0 %v5942_v11, %s7405_s8  ;;  %v1075_v20 = vshrl.u32 %v5864_v12, 16  ;;  %v1078_v21 = vshll.u32 %v5864_v12, 16  ;;  %v5862_v22 = vld [vmem:[%s7525_s30 + $0x18] sm:$0xf] }
  0x27   : > { %v672_v23 = vrot.slane %v670_v15, 4  ;;  %v675_v24 = vrot.slane %v673_v16, 5  ;;  %v1088_v25 = vshrl.u32 %v7546_v17, 16  ;;  %v5973_v26 = vcombine.low %v5864_v12, %v7546_v17  ;;  %v7555_v27 = vld [vmem:[%s7525_s30 + $0x1c] sm:$0xf] }
  0x28   : > { %v700_v28 = vor.u32 %v699_v18, %v696_v14  ;;  %v7557_v29 = vrot.slane %v1075_v20, 4  ;;  %v7559_v30 = vrot.slane %v1078_v21, 5  ;;  %v1051_v31 = vshrl.u32 %v5862_v22, 16  ;;  %v7562_v32 = vld [vmem:[%s7525_s30 + $0x14] sm:$0x1] }
  0x29   : > { %v676_v33 = vor.u32 %v675_v24, %v672_v23  ;;  %1742 = vrot.lane.b32.xlu1 %v5973_v26, %s9597_s9  ;;  %v1054_v34 = vshll.u32 %v5862_v22, 16  ;;  %v1064_v35 = vshrl.u32 %v7555_v27, 16  ;;  %v5972_v36 = vcombine.low %v5862_v22, %v7555_v27  ;;  %v5842_v38 = vld [vmem:[%s7525_s30 + $0xc] sm:$0xe]  ;;  %v253_v39 = vld [vmem:[%s7525_s30 + $0x4] sm:$0xf] }
  0x2a   : > { %v7575_v40 = vrot.slane %v700_v28, 4  ;;  %v7577_v41 = vrot.slane %v1051_v31, 4  ;;  %v5852_v42 = vrot.slane %v5842_v38, 9  ;;  %v951_v43 = vrot.slane %v7536_v7, 5  ;;  %v272_v44 = vld [vmem:[%s7525_s30 + $0x8] sm:$0x1] }
  0x2b   : > { %v7581_v45 = vrot.slane %v676_v33, 4  ;;  %v7583_v46 = vrot.slane %v1054_v34, 5  ;;  %1740 = vrot.lane.b32.xlu0 %v5972_v36, %s9597_s9  ;;  %v954_v47 = vrot.slane %v7562_v32, 5  ;;  %v525_v48 = vld [vmem:[%s7525_s30] sm:$0xe]  ;;  %v570_v49 = vrot.slane %v253_v39, 5 }
  0x2c   : > { %v952_v50 = vsel %vm7569_vm2, %v5852_v42, %v951_v43  ;;  %v953_v51 = vrot.slane %v951_v43, 4  ;;  %v5802_v52 = vrot.slane %v525_v48, 9  ;;  %v573_v53 = vrot.slane %v272_v44, 5  ;;  %v255_v54 = vld [vmem:[%s7525_s30 + $0x10] sm:$0xf]  ;;  %s7411_s9 = smov 56  }
  0x2d   : > { %v572_v55 = vrot.slane %v570_v49, 4  ;;  %v273_v56 = vld [vmem:[%s7525_s30 + $0x14] sm:$0x1]  ;;  %v526_v57 = vld [vmem:[%s7525_s30 + $0xc] sm:$0xe]  ;;  %v577_v58 = vrot.slane %v255_v54, 5  ;;  %v1081_v59 = vor.u32 %v7559_v30, %v7557_v29  ;;  %v1057_v60 = vor.u32 %v7583_v46, %v7577_v41 }
  0x2e   : > { %v955_v61 = vsel %vm7569_vm2, %v953_v51, %v954_v47  ;;  %v571_v62 = vsel %vm7569_vm2, %v5802_v52, %v570_v49  ;;  %v5803_v63 = vrot.slane %v526_v57, 9  ;;  %v580_v0 = vrot.slane %v273_v56, 5  ;;  %v252_v2 = vld [vmem:[%s7525_s30] sm:$0xf]  ;;  %v5843_v10 = vld [vmem:[%s7525_s30 + $0x18] sm:$0xe] }
  0x2f   : > { %v5962_v4 = vcombine.low %v952_v50, %v955_v61  ;;  %v574_v5 = vsel %vm7569_vm2, %v572_v55, %v573_v53  ;;  %v579_v6 = vrot.slane %v577_v58, 4  ;;  %v286_v8 = vshrl.u32 %v252_v2, 16  ;;  %v5833_v16 = vld [vmem:[%s7525_s30 + $0x20] sm:$0x1]  ;;  %v254_v23 = vld [vmem:[%s7525_s30 + $0xc] sm:$0xf] }
  0x30   : > { %v5932_v11 = vcombine.low %v571_v62, %v574_v5  ;;  %v578_v12 = vsel %vm7569_vm2, %v5803_v63, %v577_v58  ;;  %v289_v14 = vshll.u32 %v252_v2, 16  ;;  %v295_v15 = vshll.u32 %v253_v39, 16 }
  0x31   : > { %1680 = vrot.lane.b32.xlu0 %v5962_v4, %s7407_s10  ;;  %v581_v18 = vsel %vm7569_vm2, %v579_v6, %v580_v0  ;;  %v288_v20 = vrot.slane %v286_v8, 4  ;;  %v299_v21 = vshrl.u32 %v253_v39, 16  ;;  %v305_v22 = vshll.u32 %v272_v44, 16 }
  0x32   : > { %1520 = vrot.lane.b32.xlu1 %v5932_v11, %s7408_s12  ;;  %v5933_v24 = vcombine.low %v578_v12, %v581_v18  ;;  %v291_v26 = vrot.slane %v289_v14, 5  ;;  %v297_v28 = vrot.slane %v295_v15, 5  ;;  %v5853_v31 = vrot.slane %v5843_v10, 9 }
  0x33   : > { %v301_v33 = vrot.slane %v299_v21, 4  ;;  %v307_v34 = vrot.slane %v305_v22, 5  ;;  %v958_v36 = vrot.slane %v7529_v1, 5  ;;  %v961_v38 = vrot.slane %v5833_v16, 5  ;;  %v7643_v21 = vld [vmem:[%s7525_s30 + $0x2c] sm:$0x1] }
  0x34   : > { %v292_v42 = vor.u32 %v291_v26, %v288_v20  ;;  %v310_v43 = vshrl.u32 %v254_v23, 16  ;;  %v313_v47 = vshll.u32 %v254_v23, 16  ;;  %v319_v48 = vshll.u32 %v255_v54, 16  ;;  %v256_v26 = vld [vmem:[%s7525_s30 + $0x18] sm:$0xf] }
  0x35   : > { %v302_v44 = vor.u32 %v301_v33, %v297_v28  ;;  %v959_v49 = vsel %vm7569_vm2, %v5853_v31, %v958_v36  ;;  %v960_v50 = vrot.slane %v958_v36, 4  ;;  %v323_v51 = vshrl.u32 %v255_v54, 16 }
  0x36   : > { %1522 = vrot.lane.b32.xlu1 %v5933_v24, %s7408_s12  ;;  %v293_v52 = vrot.slane %v292_v42, 4  ;;  %v312_v53 = vrot.slane %v310_v43, 4  ;;  %v315_v55 = vrot.slane %v313_v47, 5  ;;  %v321_v57 = vrot.slane %v319_v48, 5  ;;  %v7686_v48 = vld [vmem:[%s7525_s30 + $0x20] sm:$0x1] }
  0x37   : > { %v303_v58 = vrot.slane %v302_v44, 4  ;;  %v962_v61 = vsel %vm7569_vm2, %v960_v50, %v961_v38  ;;  %v325_v62 = vrot.slane %v323_v51, 4  ;;  %v329_v63 = vshll.u32 %v273_v56, 16  ;;  %v7675_v38 = vld [vmem:[%s7525_s30 + $0x1c] sm:$0xf] }
  0x38   : > { %v298_v0 = vsel %vm7616_vm5, %v293_v52, %v297_v28  ;;  %v5963_v2 = vcombine.low %v959_v49, %v962_v61  ;;  %v316_v4 = vor.u32 %v315_v55, %v312_v53  ;;  %v705_v54 = vrot.slane %v703_v3, 5  ;;  %v5892_v53 = vld [vmem:[%s7525_s30 + $0x18] sm:$0xe] }
  0x39   : > { %v308_v5 = vsel %vm7616_vm5, %v303_v58, %v307_v34  ;;  %v326_v6 = vor.u32 %v325_v62, %v321_v57  ;;  %v331_v8 = vrot.slane %v329_v63, 5  ;;  %v713_v10 = vshll.u32 %v5833_v16, 16  ;;  %v258_v62 = vld [vmem:[%s7525_s30 + $0x24] sm:$0xf] }
  0x3a   : > { %v5922_v11 = vcombine.low %v298_v0, %v308_v5  ;;  %1682 = vrot.lane.b32.xlu1 %v5963_v2, %s7407_s10  ;;  %v317_v12 = vrot.slane %v316_v4, 4  ;;  %v706_v56 = vsel %vm7616_vm5, %v7575_v40, %v705_v54  ;;  %v710_v14 = vor.u32 %v7542_v13, %v705_v54  ;;  %v7179_v63 = vld [vmem:[%s9591_s1] sm:$0xff]   ;;  %v7181_v5 = vld [vmem:[%s9591_s1 + $0x8] sm:$0xff]  }
  0x3b   : > { %v327_v15 = vrot.slane %v326_v6, 4  ;;  %v715_v1 = vrot.slane %v713_v10, 5  ;;  %v681_v3 = vrot.slane %v679_v9, 5  ;;  %v689_v18 = vshll.u32 %v7562_v32, 16  ;;  %6631 = vmatprep.subr.bf16.mxu0 %v7179_v63 }
  0x3c   : > { %1470 = vrot.lane.b32.xlu0 %v5922_v11, %s7409_s13  ;;  %v322_v16 = vsel %vm7616_vm5, %v317_v12, %v321_v57  ;;  %v711_v20 = vrot.slane %v710_v14, 4  ;;  %v1082_v13 = vrot.slane %v1081_v59, 4  ;;  %v1084_v7 = vshll.u32 %v7546_v17, 16  ;;  %v7660_v59 = vld [vmem:[%s7525_s30 + $0x20] sm:$0x1]  ;;  %6632 = vmatpush3.bf16.msra.mxu0 %v7179_v63 }
  0x3d   : > { %v332_v9 = vsel %vm7616_vm5, %v327_v15, %v331_v8  ;;  %v682_v32 = vsel %vm7616_vm5, %v7581_v45, %v681_v3  ;;  %v686_v40 = vor.u32 %v7548_v19, %v681_v3  ;;  %v691_v22 = vrot.slane %v689_v18, 5  ;;  %v259_v15 = vld [vmem:[%s7525_s30 + $0x28] sm:$0xf]  ;;  %6633 = vmatprep.subr.bf16.mxu0 %v7181_v5 }
  0x3e   : > { %v5923_v23 = vcombine.low %v322_v16, %v332_v9  ;;  %v716_v24 = vsel %vm7616_vm5, %v711_v20, %v715_v1  ;;  %v1086_v29 = vrot.slane %v1084_v7, 5  ;;  %v1090_v30 = vrot.slane %v1088_v25, 4  ;;  %v275_v20 = vld [vmem:[%s7525_s30 + $0x2c] sm:$0x1] }
  0x3f   : > { %v5953_v28 = vcombine.low %v706_v56, %v716_v24  ;;  %v687_v31 = vrot.slane %v686_v40, 4  ;;  %v1094_v45 = vshll.u32 %v7643_v21, 16  ;;  %v1058_v19 = vrot.slane %v1057_v60, 4  ;;  %v5893_v40 = vld [vmem:[%s7525_s30 + $0x24] sm:$0xe] }
  0x40   : > { %1472 = vrot.lane.b32.xlu0 %v5923_v23, %s7409_s13  ;;  %v1087_v33 = vsel %vm7616_vm5, %v1082_v13, %v1086_v29  ;;  %v1091_v25 = vor.u32 %v1090_v30, %v1086_v29  ;;  %v1060_v34 = vshll.u32 %v7555_v27, 16  ;;  %v1066_v36 = vrot.slane %v1064_v35, 4  ;;  %6634 = vmatpush3.bf16.msra.mxu0 %v7181_v5 }
  0x41   : > { %1632 = vrot.lane.b32.xlu1 %v5953_v28, %s7410_s15  ;;  %v692_v41 = vsel %vm7616_vm5, %v687_v31, %v691_v22  ;;  %v1096_v46 = vrot.slane %v1094_v45, 5  ;;  %v1070_v60 = vshll.u32 %v7660_v59, 16  ;;  %v334_v42 = vshrl.u32 %v256_v26, 16  ;;  %v7182_v22 = vld [vmem:[%s9591_s1 + $0x10] sm:$0xff]   ;;  %v528_v45 = vld [vmem:[%s7525_s30 + $0x24] sm:$0xe] }
  0x42   : > { %v5952_v43 = vcombine.low %v682_v32, %v692_v41  ;;  %v1092_v47 = vrot.slane %v1091_v25, 4  ;;  %v1062_v35 = vrot.slane %v1060_v34, 5  ;;  %v337_v44 = vshll.u32 %v256_v26, 16  ;;  %6635 = vmatprep.subr.bf16.mxu0 %v7182_v22 }
  0x43   : > { %v1072_v49 = vrot.slane %v1070_v60, 5  ;;  %v336_v50 = vrot.slane %v334_v42, 4  ;;  %v343_v51 = vshll.u32 %v7675_v38, 16  ;;  %v347_v52 = vshrl.u32 %v7675_v38, 16 }
  0x44   : > { %1630 = vrot.lane.b32.xlu0 %v5952_v43, %s7410_s15  ;;  %v1097_v55 = vsel %vm7616_vm5, %v1092_v47, %v1096_v46  ;;  %v1063_v57 = vsel %vm7616_vm5, %v1058_v19, %v1062_v35  ;;  %v1067_v58 = vor.u32 %v1066_v36, %v1062_v35  ;;  %v339_v61 = vrot.slane %v337_v44, 5  ;;  %v527_v36 = vld [vmem:[%s7525_s30 + $0x18] sm:$0xe]  ;;  %6636 = vmatpush3.bf16.msra.mxu0 %v7182_v22  ;;  %v5845_v22 = vld [vmem:[%s7525_s30 + $0x30] sm:$0xe] }
  0x45   : > { %v5983_v0 = vcombine.low %v1087_v33, %v1097_v55  ;;  %v345_v2 = vrot.slane %v343_v51, 5  ;;  %v349_v4 = vrot.slane %v347_v52, 4  ;;  %v353_v54 = vshll.u32 %v7686_v48, 16  ;;  %v7185_v43 = vld [vmem:[%s9591_s1 + $0x18] sm:$0xff]  }
  0x46   : > { %v1068_v6 = vrot.slane %v1067_v58, 4  ;;  %v340_v8 = vor.u32 %v339_v61, %v336_v50  ;;  %v5902_v10 = vrot.slane %v5892_v53, 9  ;;  %v1332_v11 = vrot.slane %v7555_v27, 5  ;;  %v7733_v50 = vld [vmem:[%s7525_s30 + $0x30] sm:$0xf]  ;;  %6637 = vmatprep.subr.bf16.mxu0 %v7185_v43 }
  0x47   : > { %1792 = vrot.lane.b32.xlu1 %v5983_v0, %s7411_s9  ;;  %v350_v12 = vor.u32 %v349_v4, %v345_v2  ;;  %v355_v56 = vrot.slane %v353_v54, 5  ;;  %v1335_v14 = vrot.slane %v7660_v59, 5  ;;  %v358_v1 = vshrl.u32 %v258_v62, 16  ;;  %v5819_v0 = vld [vmem:[%s7525_s30 + $0x34] sm:$0xf] }
  0x48   : > { %v1073_v3 = vsel %vm7616_vm5, %v1068_v6, %v1072_v49  ;;  %v341_v18 = vrot.slane %v340_v8, 4  ;;  %v1333_v16 = vsel %vm7569_vm2, %v5902_v10, %v1332_v11  ;;  %v1334_v27 = vrot.slane %v1332_v11, 4  ;;  %v5816_v4 = vld [vmem:[%s7525_s30 + $0x24] sm:$0xf]  ;;  %v7756_v8 = vld [vmem:[%s7525_s30 + $0x28] sm:$0xf]  ;;  %6638 = vmatpush3.bf16.msra.mxu0 %v7185_v43 }
  0x49   : > { %v5982_v13 = vcombine.low %v1063_v57, %v1073_v3  ;;  %v351_v7 = vrot.slane %v350_v12, 4  ;;  %v360_v9 = vrot.slane %v358_v1, 4  ;;  %v361_v32 = vshll.u32 %v258_v62, 16  ;;  %v5835_v3 = vld [vmem:[%s7525_s30 + $0x38] sm:$0x1] }
  0x4a   : > { %v346_v23 = vsel %vm7616_vm5, %v341_v18, %v345_v2  ;;  %v1336_v24 = vsel %vm7569_vm2, %v1334_v27, %v1335_v14  ;;  %v367_v29 = vshll.u32 %v259_v15, 16  ;;  %v371_v30 = vshrl.u32 %v259_v15, 16 }
  0x4b   : > { %1790 = vrot.lane.b32.xlu0 %v5982_v13, %s7411_s9  ;;  %v356_v59 = vsel %vm7616_vm5, %v351_v7, %v355_v56  ;;  %v5992_v26 = vcombine.low %v1333_v16, %v1336_v24  ;;  %v363_v28 = vrot.slane %v361_v32, 5  ;;  %v377_v31 = vshll.u32 %v275_v20, 16  ;;  %v7768_v13 = vld [vmem:[%s7525_s30 + $0x2c] sm:$0x1] }
  0x4c   : > { %v5924_v19 = vcombine.low %v346_v23, %v356_v59  ;;  %v369_v33 = vrot.slane %v367_v29, 5  ;;  %v373_v25 = vrot.slane %v371_v30, 4  ;;  %v5903_v34 = vrot.slane %v5893_v40, 9 }
  0x4d   : > { %v364_v41 = vor.u32 %v363_v28, %v360_v9  ;;  %v379_v46 = vrot.slane %v377_v31, 5  ;;  %v1339_v60 = vrot.slane %v7546_v17, 5  ;;  %v1342_v42 = vrot.slane %v7643_v21, 5 }
  0x4e   : > { %1474 = vrot.lane.b32.xlu1 %v5924_v19, %s7409_s13  ;;  %v374_v47 = vor.u32 %v373_v25, %v369_v33  ;;  %v5805_v35 = vrot.slane %v528_v45, 9  ;;  %v591_v44 = vrot.slane %v259_v15, 5  ;;  %v594_v49 = vrot.slane %v275_v20, 5  ;;  %v5844_v45 = vld [vmem:[%s7525_s30 + $0x24] sm:$0xe] }
  0x4f   : > { %1840 = vrot.lane.b32.xlu0 %v5992_v26, %s7412_s14  ;;  %v365_v17 = vrot.slane %v364_v41, 4  ;;  %v1340_v21 = vsel %vm7569_vm2, %v5903_v34, %v1339_v60  ;;  %v1341_v51 = vrot.slane %v1339_v60, 4  ;;  %v5804_v52 = vrot.slane %v527_v36, 9 }
  0x50   : > { %v375_v53 = vrot.slane %v374_v47, 4  ;;  %v592_v55 = vsel %vm7569_vm2, %v5805_v35, %v591_v44  ;;  %v593_v57 = vrot.slane %v591_v44, 4  ;;  %v584_v58 = vrot.slane %v7675_v38, 5  ;;  %v7777_v44 = vld [vmem:[%s7525_s30 + $0x3c] sm:$0xf] }
  0x51   : > { %v370_v61 = vsel %vm7616_vm5, %v365_v17, %v369_v33  ;;  %v1343_v62 = vsel %vm7569_vm2, %v1341_v51, %v1342_v42  ;;  %v587_v63 = vrot.slane %v7686_v48, 5  ;;  %v742_v2 = vshrl.u32 %v7733_v50, 16 }
  0x52   : > { %v380_v54 = vsel %vm7616_vm5, %v375_v53, %v379_v46  ;;  %v5993_v5 = vcombine.low %v1340_v21, %v1343_v62  ;;  %v595_v38 = vsel %vm7569_vm2, %v593_v57, %v594_v49  ;;  %v585_v6 = vsel %vm7569_vm2, %v5804_v52, %v584_v58 }
  0x53   : > { %v5925_v10 = vcombine.low %v370_v61, %v380_v54  ;;  %v5935_v48 = vcombine.low %v592_v55, %v595_v38  ;;  %v586_v11 = vrot.slane %v584_v58, 4  ;;  %v744_v12 = vrot.slane %v742_v2, 4  ;;  %v7794_v61 = vld [vmem:[%s7525_s30 + $0x40] sm:$0xf]  ;;  %v7804_v38 = vld [vmem:[%s7525_s30 + $0x34] sm:$0xf] }
  0x54   : > { %1842 = vrot.lane.b32.xlu0 %v5993_v5, %s7412_s14  ;;  %v745_v56 = vshll.u32 %v7733_v50, 16  ;;  %v755_v14 = vshrl.u32 %v5819_v0, 16  ;;  %v5945_v15 = vcombine.low %v7733_v50, %v5819_v0  ;;  %v718_v1 = vshrl.u32 %v5816_v4, 16 }
  0x55   : > { %1476 = vrot.lane.b32.xlu1 %v5925_v10, %s7409_s13  ;;  %v588_v18 = vsel %vm7569_vm2, %v586_v11, %v587_v63  ;;  %v721_v16 = vshll.u32 %v5816_v4, 16  ;;  %v731_v27 = vshrl.u32 %v7756_v8, 16  ;;  %v5944_v20 = vcombine.low %v5816_v4, %v7756_v8 }
  0x56   : > { %v5934_v7 = vcombine.low %v585_v6, %v588_v18  ;;  %v747_v9 = vrot.slane %v745_v56, 5  ;;  %v720_v32 = vrot.slane %v718_v1, 4  ;;  %v751_v40 = vshll.u32 %v5819_v0, 16 }
  0x57   : > { %v723_v23 = vrot.slane %v721_v16, 5  ;;  %v757_v24 = vrot.slane %v755_v14, 4  ;;  %v761_v29 = vshll.u32 %v5835_v3, 16  ;;  %v727_v30 = vshll.u32 %v7756_v8, 16 }
  0x58   : > { %1524 = vrot.lane.b32.xlu0 %v5934_v7, %s7408_s12  ;;  %v748_v59 = vor.u32 %v747_v9, %v744_v12  ;;  %v753_v26 = vrot.slane %v751_v40, 5  ;;  %v733_v28 = vrot.slane %v731_v27, 4  ;;  %v737_v31 = vshll.u32 %v7768_v13, 16  ;;  %v7819_v27 = vld [vmem:[%s7525_s30 + $0x38] sm:$0x1] }
  0x59   : > { %1526 = vrot.lane.b32.xlu1 %v5935_v48, %s7408_s12  ;;  %v763_v19 = vrot.slane %v761_v29, 5  ;;  %v724_v33 = vor.u32 %v723_v23, %v720_v32  ;;  %v729_v25 = vrot.slane %v727_v30, 5  ;;  %v5855_v34 = vrot.slane %v5845_v22, 9  ;;  %v260_v32 = vld [vmem:[%s7525_s30 + $0x30] sm:$0xf] }
  0x5a   : > { %v749_v36 = vrot.slane %v748_v59, 4  ;;  %v758_v41 = vor.u32 %v757_v24, %v753_v26  ;;  %v739_v46 = vrot.slane %v737_v31, 5  ;;  %v972_v60 = vrot.slane %v5819_v0, 5  ;;  %v5866_v0 = vld [vmem:[%s7525_s30 + $0x30] sm:$0xf] }
  0x5b   : > { %v725_v42 = vrot.slane %v724_v33, 4  ;;  %v734_v43 = vor.u32 %v733_v28, %v729_v25  ;;  %v975_v47 = vrot.slane %v5835_v3, 5  ;;  %v5854_v35 = vrot.slane %v5844_v45, 9  ;;  %v7828_v28 = vld [vmem:[%s7525_s30 + $0x34] sm:$0xf] }
  0x5c   : > { %1584 = vrot.lane.b32.xlu0 %v5944_v20, %s7405_s8  ;;  %v754_v49 = vsel %vm7616_vm5, %v749_v36, %v753_v26  ;;  %v759_v50 = vrot.slane %v758_v41, 4  ;;  %v973_v17 = vsel %vm7569_vm2, %v5855_v34, %v972_v60  ;;  %v974_v21 = vrot.slane %v972_v60, 4  ;;  %v5894_v60 = vld [vmem:[%s7525_s30 + $0x30] sm:$0xe] }
  0x5d   : > { %1586 = vrot.lane.b32.xlu1 %v5945_v15, %s7405_s8  ;;  %v730_v51 = vsel %vm7616_vm5, %v725_v42, %v729_v25  ;;  %v735_v52 = vrot.slane %v734_v43, 4  ;;  %v965_v53 = vrot.slane %v7756_v8, 5  ;;  %v968_v55 = vrot.slane %v7768_v13, 5  ;;  %v7811_v15 = vld [vmem:[%s7525_s30 + $0x44] sm:$0x1] }
  0x5e   : > { %v764_v57 = vsel %vm7616_vm5, %v759_v50, %v763_v19  ;;  %v976_v58 = vsel %vm7569_vm2, %v974_v21, %v975_v47  ;;  %v1123_v62 = vshrl.u32 %v7777_v44, 16  ;;  %v1126_v63 = vshll.u32 %v7777_v44, 16  ;;  %v7832_v19 = vld [vmem:[%s7525_s30 + $0x38] sm:$0x1] }
  0x5f   : > { %v5955_v2 = vcombine.low %v754_v49, %v764_v57  ;;  %v740_v4 = vsel %vm7616_vm5, %v735_v52, %v739_v46  ;;  %v5965_v54 = vcombine.low %v973_v17, %v976_v58  ;;  %v966_v5 = vsel %vm7569_vm2, %v5854_v35, %v965_v53 }
  0x60   : > { %v5954_v6 = vcombine.low %v730_v51, %v740_v4  ;;  %v967_v8 = vrot.slane %v965_v53, 4  ;;  %v1125_v10 = vrot.slane %v1123_v62, 4  ;;  %v1128_v48 = vrot.slane %v1126_v63, 5 }
  0x61   : > { %1636 = vrot.lane.b32.xlu1 %v5955_v2, %s7410_s15  ;;  %v1136_v11 = vshrl.u32 %v7794_v61, 16  ;;  %v5975_v12 = vcombine.low %v7777_v44, %v7794_v61  ;;  %v1099_v56 = vshrl.u32 %v5866_v0, 16  ;;  %v1102_v14 = vshll.u32 %v5866_v0, 16 }
  0x62   : > { %1634 = vrot.lane.b32.xlu0 %v5954_v6, %s7410_s15  ;;  %v969_v1 = vsel %vm7569_vm2, %v967_v8, %v968_v55  ;;  %v1112_v3 = vshrl.u32 %v7804_v38, 16  ;;  %v5974_v18 = vcombine.low %v5866_v0, %v7804_v38  ;;  %v1129_v16 = vor.u32 %v1128_v48, %v1125_v10  ;;  %v262_v55 = vld [vmem:[%s7525_s30 + $0x3c] sm:$0xf]  ;;  %v263_v0 = vld [vmem:[%s7525_s30 + $0x40] sm:$0xf] }
  0x63   : > { %v5964_v20 = vcombine.low %v966_v5, %v969_v1  ;;  %v1101_v13 = vrot.slane %v1099_v56, 4  ;;  %v1104_v7 = vrot.slane %v1102_v14, 5  ;;  %v1132_v9 = vshll.u32 %v7794_v61, 16  ;;  %v277_v6 = vld [vmem:[%s7525_s30 + $0x44] sm:$0x1] }
  0x64   : > { %v1130_v40 = vrot.slane %v1129_v16, 4  ;;  %v1138_v22 = vrot.slane %v1136_v11, 4  ;;  %v1142_v23 = vshll.u32 %v7811_v15, 16  ;;  %v1108_v24 = vshll.u32 %v7804_v38, 16  ;;  %v5895_v1 = vld [vmem:[%s7525_s30 + $0x3c] sm:$0xe] }
  0x65   : > { %1686 = vrot.lane.b32.xlu1 %v5965_v54, %s7407_s10  ;;  %v1134_v29 = vrot.slane %v1132_v9, 5  ;;  %v1105_v30 = vor.u32 %v1104_v7, %v1101_v13  ;;  %v1114_v59 = vrot.slane %v1112_v3, 4  ;;  %v1118_v26 = vshll.u32 %v7819_v27, 16 }
  0x66   : > { %1684 = vrot.lane.b32.xlu0 %v5964_v20, %s7407_s10  ;;  %v1144_v31 = vrot.slane %v1142_v23, 5  ;;  %v1110_v45 = vrot.slane %v1108_v24, 5  ;;  %v382_v33 = vshrl.u32 %v260_v32, 16  ;;  %v385_v25 = vshll.u32 %v260_v32, 16  ;;  %v530_v32 = vld [vmem:[%s7525_s30 + $0x3c] sm:$0xe] }
  0x67   : > { %v1135_v34 = vsel %vm7616_vm5, %v1130_v40, %v1134_v29  ;;  %v1139_v36 = vor.u32 %v1138_v22, %v1134_v29  ;;  %v1106_v41 = vrot.slane %v1105_v30, 4  ;;  %v1120_v46 = vrot.slane %v1118_v26, 5  ;;  %v529_v29 = vld [vmem:[%s7525_s30 + $0x30] sm:$0xe] }
  0x68   : > { %v1115_v42 = vor.u32 %v1114_v59, %v1110_v45  ;;  %v384_v43 = vrot.slane %v382_v33, 4  ;;  %v387_v47 = vrot.slane %v385_v25, 5  ;;  %v391_v35 = vshll.u32 %v7828_v28, 16 }
  0x69   : > { %1746 = vrot.lane.b32.xlu1 %v5975_v12, %s9615_s17  ;;  %v1140_v44 = vrot.slane %v1139_v36, 4  ;;  %v1111_v49 = vsel %vm7616_vm5, %v1106_v41, %v1110_v45  ;;  %v395_v50 = vshrl.u32 %v7828_v28, 16  ;;  %v401_v17 = vshll.u32 %v7832_v19, 16  ;;  %v7870_v36 = vld [vmem:[%s7525_s30 + $0x48] sm:$0xf] }
  0x6a   : > { %1744 = vrot.lane.b32.xlu0 %v5974_v18, %s9615_s17  ;;  %v1116_v21 = vrot.slane %v1115_v42, 4  ;;  %v388_v51 = vor.u32 %v387_v47, %v384_v43  ;;  %v393_v52 = vrot.slane %v391_v35, 5  ;;  %v5904_v53 = vrot.slane %v5894_v60, 9 }
  0x6b   : > { %v1145_v57 = vsel %vm7616_vm5, %v1140_v44, %v1144_v31  ;;  %v397_v58 = vrot.slane %v395_v50, 4  ;;  %v403_v62 = vrot.slane %v401_v17, 5  ;;  %v1346_v63 = vrot.slane %v7804_v38, 5  ;;  %v5823_v50 = vld [vmem:[%s7525_s30 + $0x4c] sm:$0xf] }
  0x6c   : > { %v5985_v2 = vcombine.low %v1135_v34, %v1145_v57  ;;  %v1121_v4 = vsel %vm7616_vm5, %v1116_v21, %v1120_v46  ;;  %v389_v54 = vrot.slane %v388_v51, 4  ;;  %v1349_v5 = vrot.slane %v7819_v27, 5  ;;  %v5820_v21 = vld [vmem:[%s7525_s30 + $0x3c] sm:$0xf] }
  0x6d   : > { %v5984_v8 = vcombine.low %v1111_v49, %v1121_v4  ;;  %v398_v10 = vor.u32 %v397_v58, %v393_v52  ;;  %v1347_v48 = vsel %vm7569_vm2, %v5904_v53, %v1346_v63  ;;  %v1348_v11 = vrot.slane %v1346_v63, 4 }
  0x6e   : > { %1796 = vrot.lane.b32.xlu1 %v5985_v2, %s7411_s9  ;;  %v394_v38 = vsel %vm7616_vm5, %v389_v54, %v393_v52  ;;  %v406_v12 = vshrl.u32 %v262_v55, 16  ;;  %v409_v56 = vshll.u32 %v262_v55, 16  ;;  %v415_v14 = vshll.u32 %v263_v0, 16  ;;  %v7893_v55 = vld [vmem:[%s7525_s30 + $0x40] sm:$0xf] }
  0x6f   : > { %1794 = vrot.lane.b32.xlu0 %v5984_v8, %s7411_s9  ;;  %v399_v3 = vrot.slane %v398_v10, 4  ;;  %v1350_v18 = vsel %vm7569_vm2, %v1348_v11, %v1349_v5  ;;  %v419_v16 = vshrl.u32 %v263_v0, 16  ;;  %v425_v27 = vshll.u32 %v277_v6, 16  ;;  %v5837_v54 = vld [vmem:[%s7525_s30 + $0x50] sm:$0x1] }
  0x70   : > { %v5994_v20 = vcombine.low %v1347_v48, %v1350_v18  ;;  %v408_v13 = vrot.slane %v406_v12, 4  ;;  %v411_v7 = vrot.slane %v409_v56, 5  ;;  %v417_v9 = vrot.slane %v415_v14, 5  ;;  %v7905_v48 = vld [vmem:[%s7525_s30 + $0x44] sm:$0x1] }
  0x71   : > { %v404_v40 = vsel %vm7616_vm5, %v399_v3, %v403_v62  ;;  %v421_v22 = vrot.slane %v419_v16, 4  ;;  %v427_v23 = vrot.slane %v425_v27, 5  ;;  %v5905_v24 = vrot.slane %v5895_v1, 9  ;;  %v5847_v14 = vld [vmem:[%s7525_s30 + $0x48] sm:$0xe] }
  0x72   : > { %v5926_v30 = vcombine.low %v394_v38, %v404_v40  ;;  %v412_v59 = vor.u32 %v411_v7, %v408_v13  ;;  %v1353_v26 = vrot.slane %v7794_v61, 5  ;;  %v1356_v31 = vrot.slane %v7811_v15, 5 }
  0x73   : > { %1844 = vrot.lane.b32.xlu0 %v5994_v20, %s7412_s14  ;;  %v422_v45 = vor.u32 %v421_v22, %v417_v9  ;;  %v5807_v33 = vrot.slane %v530_v32, 9  ;;  %v605_v25 = vrot.slane %v263_v0, 5  ;;  %v608_v34 = vrot.slane %v277_v6, 5 }
  0x74   : > { %1478 = vrot.lane.b32.xlu1 %v5926_v30, %s7409_s13  ;;  %v413_v41 = vrot.slane %v412_v59, 4  ;;  %v1354_v46 = vsel %vm7569_vm2, %v5905_v24, %v1353_v26  ;;  %v1355_v60 = vrot.slane %v1353_v26, 4  ;;  %v5806_v61 = vrot.slane %v529_v29, 9 }
  0x75   : > { %v423_v15 = vrot.slane %v422_v45, 4  ;;  %v606_v42 = vsel %vm7569_vm2, %v5807_v33, %v605_v25  ;;  %v607_v43 = vrot.slane %v605_v25, 4  ;;  %v598_v47 = vrot.slane %v7828_v28, 5  ;;  %v7914_v25 = vld [vmem:[%s7525_s30 + $0x54] sm:$0xf] }
  0x76   : > { %v418_v35 = vsel %vm7616_vm5, %v413_v41, %v417_v9  ;;  %v1357_v44 = vsel %vm7569_vm2, %v1355_v60, %v1356_v31  ;;  %v601_v49 = vrot.slane %v7832_v19, 5  ;;  %v790_v17 = vshrl.u32 %v7870_v36, 16  ;;  %v5846_v9 = vld [vmem:[%s7525_s30 + $0x3c] sm:$0xe] }
  0x77   : > { %v428_v51 = vsel %vm7616_vm5, %v423_v15, %v427_v23  ;;  %v5995_v52 = vcombine.low %v1354_v46, %v1357_v44  ;;  %v609_v28 = vsel %vm7569_vm2, %v607_v43, %v608_v34  ;;  %v599_v53 = vsel %vm7569_vm2, %v5806_v61, %v598_v47 }
  0x78   : > { %v5927_v57 = vcombine.low %v418_v35, %v428_v51  ;;  %v5937_v19 = vcombine.low %v606_v42, %v609_v28  ;;  %v600_v58 = vrot.slane %v598_v47, 4  ;;  %v792_v62 = vrot.slane %v790_v17, 4  ;;  %v7931_v35 = vld [vmem:[%s7525_s30 + $0x58] sm:$0xf]  ;;  %v7941_v28 = vld [vmem:[%s7525_s30 + $0x4c] sm:$0xf] }
  0x79   : > { %1846 = vrot.lane.b32.xlu0 %v5995_v52, %s7412_s14  ;;  %v793_v63 = vshll.u32 %v7870_v36, 16  ;;  %v803_v0 = vshrl.u32 %v5823_v50, 16  ;;  %v5947_v2 = vcombine.low %v7870_v36, %v5823_v50  ;;  %v766_v4 = vshrl.u32 %v5820_v21, 16 }
  0x7a   : > { %1480 = vrot.lane.b32.xlu1 %v5927_v57, %s7409_s13  ;;  %v602_v5 = vsel %vm7569_vm2, %v600_v58, %v601_v49  ;;  %v769_v6 = vshll.u32 %v5820_v21, 16  ;;  %v779_v8 = vshrl.u32 %v7893_v55, 16  ;;  %v5946_v10 = vcombine.low %v5820_v21, %v7893_v55 }
  0x7b   : > { %v5936_v11 = vcombine.low %v599_v53, %v602_v5  ;;  %v795_v38 = vrot.slane %v793_v63, 5  ;;  %v768_v12 = vrot.slane %v766_v4, 4  ;;  %v799_v56 = vshll.u32 %v5823_v50, 16 }
  0x7c   : > { %v771_v1 = vrot.slane %v769_v6, 5  ;;  %v805_v3 = vrot.slane %v803_v0, 4  ;;  %v809_v18 = vshll.u32 %v5837_v54, 16  ;;  %v775_v16 = vshll.u32 %v7893_v55, 16 }
  0x7d   : > { %1528 = vrot.lane.b32.xlu0 %v5936_v11, %s7408_s12  ;;  %v796_v27 = vor.u32 %v795_v38, %v792_v62  ;;  %v801_v20 = vrot.slane %v799_v56, 5  ;;  %v781_v13 = vrot.slane %v779_v8, 4  ;;  %v785_v7 = vshll.u32 %v7905_v48, 16  ;;  %v7956_v8 = vld [vmem:[%s7525_s30 + $0x50] sm:$0x1] }
  0x7e   : > { %1530 = vrot.lane.b32.xlu1 %v5937_v19, %s7408_s12  ;;  %v811_v32 = vrot.slane %v809_v18, 5  ;;  %v772_v40 = vor.u32 %v771_v1, %v768_v12  ;;  %v777_v22 = vrot.slane %v775_v16, 5  ;;  %v5857_v23 = vrot.slane %v5847_v14, 9  ;;  %v264_v12 = vld [vmem:[%s7525_s30 + $0x48] sm:$0xf] }
  0x7f   : > { %v797_v24 = vrot.slane %v796_v27, 4  ;;  %v806_v29 = vor.u32 %v805_v3, %v801_v20  ;;  %v787_v30 = vrot.slane %v785_v7, 5  ;;  %v986_v59 = vrot.slane %v5823_v50, 5  ;;  %v5870_v50 = vld [vmem:[%s7525_s30 + $0x48] sm:$0xf] }
  0x80   : > { %v773_v26 = vrot.slane %v772_v40, 4  ;;  %v782_v31 = vor.u32 %v781_v13, %v777_v22  ;;  %v989_v45 = vrot.slane %v5837_v54, 5  ;;  %v5856_v33 = vrot.slane %v5846_v9, 9  ;;  %v7965_v13 = vld [vmem:[%s7525_s30 + $0x4c] sm:$0xf] }
  0x81   : > { %1588 = vrot.lane.b32.xlu0 %v5946_v10, %s7405_s8  ;;  %v802_v34 = vsel %vm7616_vm5, %v797_v24, %v801_v20  ;;  %v807_v36 = vrot.slane %v806_v29, 4  ;;  %v987_v41 = vsel %vm7569_vm2, %v5857_v23, %v986_v59  ;;  %v988_v46 = vrot.slane %v986_v59, 4  ;;  %v5896_v59 = vld [vmem:[%s7525_s30 + $0x48] sm:$0xe] }
  0x82   : > { %1590 = vrot.lane.b32.xlu1 %v5947_v2, %s7405_s8  ;;  %v778_v60 = vsel %vm7616_vm5, %v773_v26, %v777_v22  ;;  %v783_v61 = vrot.slane %v782_v31, 4  ;;  %v979_v15 = vrot.slane %v7893_v55, 5  ;;  %v982_v42 = vrot.slane %v7905_v48, 5  ;;  %v7948_v2 = vld [vmem:[%s7525_s30 + $0x5c] sm:$0x1] }
  0x83   : > { %v812_v43 = vsel %vm7616_vm5, %v807_v36, %v811_v32  ;;  %v990_v47 = vsel %vm7569_vm2, %v988_v46, %v989_v45  ;;  %v1171_v44 = vshrl.u32 %v7914_v25, 16  ;;  %v1174_v49 = vshll.u32 %v7914_v25, 16  ;;  %v7969_v32 = vld [vmem:[%s7525_s30 + $0x50] sm:$0x1] }
  0x84   : > { %v5957_v17 = vcombine.low %v802_v34, %v812_v43  ;;  %v788_v21 = vsel %vm7616_vm5, %v783_v61, %v787_v30  ;;  %v5967_v51 = vcombine.low %v987_v41, %v990_v47  ;;  %v980_v52 = vsel %vm7569_vm2, %v5856_v33, %v979_v15 }
  0x85   : > { %v5956_v53 = vcombine.low %v778_v60, %v788_v21  ;;  %v981_v55 = vrot.slane %v979_v15, 4  ;;  %v1173_v57 = vrot.slane %v1171_v44, 4  ;;  %v1176_v19 = vrot.slane %v1174_v49, 5 }
  0x86   : > { %1640 = vrot.lane.b32.xlu1 %v5957_v17, %s7410_s15  ;;  %v1184_v58 = vshrl.u32 %v7931_v35, 16  ;;  %v5977_v62 = vcombine.low %v7914_v25, %v7931_v35  ;;  %v1147_v63 = vshrl.u32 %v5870_v50, 16  ;;  %v1150_v0 = vshll.u32 %v5870_v50, 16 }
  0x87   : > { %1638 = vrot.lane.b32.xlu0 %v5956_v53, %s7410_s15  ;;  %v983_v4 = vsel %vm7569_vm2, %v981_v55, %v982_v42  ;;  %v1160_v54 = vshrl.u32 %v7941_v28, 16  ;;  %v5976_v5 = vcombine.low %v5870_v50, %v7941_v28  ;;  %v1177_v6 = vor.u32 %v1176_v19, %v1173_v57  ;;  %v266_v42 = vld [vmem:[%s7525_s30 + $0x54] sm:$0xf]  ;;  %v267_v50 = vld [vmem:[%s7525_s30 + $0x58] sm:$0xf] }
  0x88   : > { %v5966_v10 = vcombine.low %v980_v52, %v983_v4  ;;  %v1149_v48 = vrot.slane %v1147_v63, 4  ;;  %v1152_v11 = vrot.slane %v1150_v0, 5  ;;  %v1180_v38 = vshll.u32 %v7931_v35, 16  ;;  %v279_v53 = vld [vmem:[%s7525_s30 + $0x5c] sm:$0x1] }
  0x89   : > { %v1178_v56 = vrot.slane %v1177_v6, 4  ;;  %v1186_v14 = vrot.slane %v1184_v58, 4  ;;  %v1190_v1 = vshll.u32 %v7948_v2, 16  ;;  %v1156_v3 = vshll.u32 %v7941_v28, 16  ;;  %v5897_v4 = vld [vmem:[%s7525_s30 + $0x54] sm:$0xe] }
  0x8a   : > { %1690 = vrot.lane.b32.xlu1 %v5967_v51, %s7407_s10  ;;  %v1182_v18 = vrot.slane %v1180_v38, 5  ;;  %v1153_v16 = vor.u32 %v1152_v11, %v1149_v48  ;;  %v1162_v27 = vrot.slane %v1160_v54, 4  ;;  %v1166_v20 = vshll.u32 %v7956_v8, 16 }
  0x8b   : > { %1688 = vrot.lane.b32.xlu0 %v5966_v10, %s7407_s10  ;;  %v1192_v7 = vrot.slane %v1190_v1, 5  ;;  %v1158_v9 = vrot.slane %v1156_v3, 5  ;;  %v430_v40 = vshrl.u32 %v264_v12, 16  ;;  %v433_v22 = vshll.u32 %v264_v12, 16  ;;  %v532_v12 = vld [vmem:[%s7525_s30 + $0x54] sm:$0xe] }
  0x8c   : > { %v1183_v23 = vsel %vm7616_vm5, %v1178_v56, %v1182_v18  ;;  %v1187_v24 = vor.u32 %v1186_v14, %v1182_v18  ;;  %v1154_v29 = vrot.slane %v1153_v16, 4  ;;  %v1168_v30 = vrot.slane %v1166_v20, 5  ;;  %v531_v18 = vld [vmem:[%s7525_s30 + $0x48] sm:$0xe] }
  0x8d   : > { %v1163_v26 = vor.u32 %v1162_v27, %v1158_v9  ;;  %v432_v31 = vrot.slane %v430_v40, 4  ;;  %v435_v45 = vrot.slane %v433_v22, 5  ;;  %v439_v33 = vshll.u32 %v7965_v13, 16 }
  0x8e   : > { %1750 = vrot.lane.b32.xlu1 %v5977_v62, %s9615_s17  ;;  %v1188_v25 = vrot.slane %v1187_v24, 4  ;;  %v1159_v34 = vsel %vm7616_vm5, %v1154_v29, %v1158_v9  ;;  %v443_v36 = vshrl.u32 %v7965_v13, 16  ;;  %v449_v41 = vshll.u32 %v7969_v32, 16  ;;  %v8007_v24 = vld [vmem:[%s7525_s30 + $0x60] sm:$0xf] }
  0x8f   : > { %1748 = vrot.lane.b32.xlu0 %v5976_v5, %s9615_s17  ;;  %v1164_v46 = vrot.slane %v1163_v26, 4  ;;  %v436_v60 = vor.u32 %v435_v45, %v432_v31  ;;  %v441_v61 = vrot.slane %v439_v33, 5  ;;  %v5906_v15 = vrot.slane %v5896_v59, 9 }
  0x90   : > { %v1193_v43 = vsel %vm7616_vm5, %v1188_v25, %v1192_v7  ;;  %v445_v47 = vrot.slane %v443_v36, 4  ;;  %v451_v44 = vrot.slane %v449_v41, 5  ;;  %v1360_v49 = vrot.slane %v7941_v28, 5  ;;  %v5827_v41 = vld [vmem:[%s7525_s30 + $0x64] sm:$0xf] }
  0x91   : > { %v5987_v17 = vcombine.low %v1183_v23, %v1193_v43  ;;  %v1169_v21 = vsel %vm7616_vm5, %v1164_v46, %v1168_v30  ;;  %v437_v51 = vrot.slane %v436_v60, 4  ;;  %v1363_v52 = vrot.slane %v7956_v8, 5  ;;  %v5824_v60 = vld [vmem:[%s7525_s30 + $0x54] sm:$0xf]  ;;  %v8032_v43 = vld [vmem:[%s7525_s30 + $0x58] sm:$0xf] }
  0x92   : > { %v5986_v55 = vcombine.low %v1159_v34, %v1169_v21  ;;  %v446_v57 = vor.u32 %v445_v47, %v441_v61  ;;  %v1361_v19 = vsel %vm7569_vm2, %v5906_v15, %v1360_v49  ;;  %v1362_v58 = vrot.slane %v1360_v49, 4 }
  0x93   : > { %1800 = vrot.lane.b32.xlu1 %v5987_v17, %s7411_s9  ;;  %v442_v28 = vsel %vm7616_vm5, %v437_v51, %v441_v61  ;;  %v454_v62 = vshrl.u32 %v266_v42, 16  ;;  %v457_v63 = vshll.u32 %v266_v42, 16  ;;  %v463_v0 = vshll.u32 %v267_v50, 16 }
  0x94   : > { %1798 = vrot.lane.b32.xlu0 %v5986_v55, %s7411_s9  ;;  %v447_v54 = vrot.slane %v446_v57, 4  ;;  %v1364_v5 = vsel %vm7569_vm2, %v1362_v58, %v1363_v52  ;;  %v467_v6 = vshrl.u32 %v267_v50, 16  ;;  %v473_v8 = vshll.u32 %v279_v53, 16 }
  0x95   : > { %v5996_v10 = vcombine.low %v1361_v19, %v1364_v5  ;;  %v456_v48 = vrot.slane %v454_v62, 4  ;;  %v459_v11 = vrot.slane %v457_v63, 5  ;;  %v465_v38 = vrot.slane %v463_v0, 5  ;;  %v8048_v62 = vld [vmem:[%s7525_s30 + $0x5c] sm:$0x1] }
  0x96   : > { %v452_v56 = vsel %vm7616_vm5, %v447_v54, %v451_v44  ;;  %v469_v14 = vrot.slane %v467_v6, 4  ;;  %v475_v1 = vrot.slane %v473_v8, 5  ;;  %v5907_v3 = vrot.slane %v5897_v4, 9  ;;  %v5849_v5 = vld [vmem:[%s7525_s30 + $0x60] sm:$0xe] }
  0x97   : > { %v5928_v16 = vcombine.low %v442_v28, %v452_v56  ;;  %v460_v27 = vor.u32 %v459_v11, %v456_v48  ;;  %v1367_v20 = vrot.slane %v7931_v35, 5  ;;  %v1370_v7 = vrot.slane %v7948_v2, 5  ;;  %v8009_v29 = vpop.permute.xlu1 %1582 }
  0x98   : > { %1848 = vrot.lane.b32.xlu0 %v5996_v10, %s7412_s14  ;;  %v470_v9 = vor.u32 %v469_v14, %v465_v38  ;;  %v5809_v40 = vrot.slane %v532_v12, 9  ;;  %v619_v22 = vrot.slane %v267_v50, 5  ;;  %v622_v23 = vrot.slane %v279_v53, 5  ;;  %v8034_v47 = vpop.permute.xlu0 %1580  ;;  %v5839_v53 = vld [vmem:[%s7525_s30 + $0x68] sm:$0x1] }
  0x99   : > { %1482 = vrot.lane.b32.xlu1 %v5928_v16, %s7409_s13  ;;  %v461_v30 = vrot.slane %v460_v27, 4  ;;  %v1368_v35 = vsel %vm7569_vm2, %v5907_v3, %v1367_v20  ;;  %v1369_v59 = vrot.slane %v1367_v20, 4  ;;  %v5808_v2 = vrot.slane %v531_v18, 9  ;;  %v5848_v14 = vld [vmem:[%s7525_s30 + $0x54] sm:$0xe] }
  0x9a   : > { %v471_v26 = vrot.slane %v470_v9, 4  ;;  %v620_v31 = vsel %vm7569_vm2, %v5809_v40, %v619_v22  ;;  %v621_v45 = vrot.slane %v619_v22, 4  ;;  %v612_v33 = vrot.slane %v7965_v13, 5 }
  0x9b   : > { %v466_v25 = vsel %vm7616_vm5, %v461_v30, %v465_v38  ;;  %v1371_v34 = vsel %vm7569_vm2, %v1369_v59, %v1370_v7  ;;  %v615_v36 = vrot.slane %v7969_v32, 5  ;;  %v838_v46 = vshrl.u32 %v8007_v24, 16  ;;  %v8040_v55 = vpop.permute.xlu1 %1742  ;;  %v8061_v59 = vld [vmem:[%s7525_s30 + $0x6c] sm:$0xf] }
  0x9c   : > { %v476_v61 = vsel %vm7616_vm5, %v471_v26, %v475_v1  ;;  %v5997_v15 = vcombine.low %v1368_v35, %v1371_v34  ;;  %v623_v13 = vsel %vm7569_vm2, %v621_v45, %v622_v23  ;;  %v613_v42 = vsel %vm7569_vm2, %v5808_v2, %v612_v33 }
  0x9d   : > { %v5929_v32 = vcombine.low %v466_v25, %v476_v61  ;;  %v5939_v44 = vcombine.low %v620_v31, %v623_v13  ;;  %v614_v49 = vrot.slane %v612_v33, 4  ;;  %v840_v50 = vrot.slane %v838_v46, 4  ;;  %v8055_v1 = vpop.permute.xlu0 %1740  ;;  %v5874_v13 = vld [vmem:[%s7525_s30 + $0x60] sm:$0xf] }
  0x9e   : > { %1850 = vrot.lane.b32.xlu0 %v5997_v15, %s7412_s14  ;;  %v841_v17 = vshll.u32 %v8007_v24, 16  ;;  %v851_v21 = vshrl.u32 %v5827_v41, 16  ;;  %v5949_v51 = vcombine.low %v8007_v24, %v5827_v41  ;;  %v814_v52 = vshrl.u32 %v5824_v60, 16 }
  0x9f   : > { %1484 = vrot.lane.b32.xlu1 %v5929_v32, %s7409_s13  ;;  %v616_v57 = vsel %vm7569_vm2, %v614_v49, %v615_v36  ;;  %v817_v19 = vshll.u32 %v5824_v60, 16  ;;  %v827_v58 = vshrl.u32 %v8032_v43, 16  ;;  %v5948_v28 = vcombine.low %v5824_v60, %v8032_v43  ;;  %v8078_v60 = vld [vmem:[%s7525_s30 + $0x70] sm:$0xf] }
  0xa0   : > { %v5938_v63 = vcombine.low %v613_v42, %v616_v57  ;;  %v843_v0 = vrot.slane %v841_v17, 5  ;;  %v816_v4 = vrot.slane %v814_v52, 4  ;;  %v847_v54 = vshll.u32 %v5827_v41, 16 }
  0xa1   : > { %v819_v6 = vrot.slane %v817_v19, 5  ;;  %v853_v8 = vrot.slane %v851_v21, 4  ;;  %v857_v10 = vshll.u32 %v5839_v53, 16  ;;  %v823_v48 = vshll.u32 %v8032_v43, 16 }
  0xa2   : > { %1532 = vrot.lane.b32.xlu0 %v5938_v63, %s7408_s12  ;;  %v844_v11 = vor.u32 %v843_v0, %v840_v50  ;;  %v849_v38 = vrot.slane %v847_v54, 5  ;;  %v829_v12 = vrot.slane %v827_v58, 4  ;;  %v833_v56 = vshll.u32 %v8048_v62, 16  ;;  %v8090_v50 = vld [vmem:[%s7525_s30 + $0x64] sm:$0xf] }
  0xa3   : > { %1534 = vrot.lane.b32.xlu1 %v5939_v44, %s7408_s12  ;;  %v859_v3 = vrot.slane %v857_v10, 5  ;;  %v820_v18 = vor.u32 %v819_v6, %v816_v4  ;;  %v825_v16 = vrot.slane %v823_v48, 5  ;;  %v5859_v27 = vrot.slane %v5849_v5, 9  ;;  %v8083_v42 = vpop.permute.xlu0 %1680  ;;  %v8107_v5 = vld [vmem:[%s7525_s30 + $0x68] sm:$0x1] }
  0xa4   : > { %v845_v20 = vrot.slane %v844_v11, 4  ;;  %v854_v7 = vor.u32 %v853_v8, %v849_v38  ;;  %v835_v9 = vrot.slane %v833_v56, 5  ;;  %v1000_v40 = vrot.slane %v5827_v41, 5  ;;  %v8058_v22 = vpop.permute.xlu1 %1520  ;;  %v8111_v11 = vld [vmem:[%s7525_s30 + $0x60] sm:$0xf] }
  0xa5   : > { %v821_v23 = vrot.slane %v820_v18, 4  ;;  %v830_v24 = vor.u32 %v829_v12, %v825_v16  ;;  %v1003_v30 = vrot.slane %v5839_v53, 5  ;;  %v5858_v35 = vrot.slane %v5848_v14, 9 }
  0xa6   : > { %1592 = vrot.lane.b32.xlu0 %v5948_v28, %s7405_s8  ;;  %v850_v2 = vsel %vm7616_vm5, %v845_v20, %v849_v38  ;;  %v855_v26 = vrot.slane %v854_v7, 4  ;;  %v1001_v31 = vsel %vm7569_vm2, %v5859_v27, %v1000_v40  ;;  %v1002_v45 = vrot.slane %v1000_v40, 4  ;;  %v8120_v7 = vld [vmem:[%s7525_s30 + $0x64] sm:$0xf] }
  0xa7   : > { %1594 = vrot.lane.b32.xlu1 %v5949_v51, %s7405_s8  ;;  %v826_v33 = vsel %vm7616_vm5, %v821_v23, %v825_v16  ;;  %v831_v25 = vrot.slane %v830_v24, 4  ;;  %v993_v34 = vrot.slane %v8032_v43, 5  ;;  %v996_v36 = vrot.slane %v8048_v62, 5  ;;  %v8099_v62 = vld [vmem:[%s7525_s30 + $0x74] sm:$0x1] }
  0xa8   : > { %v860_v41 = vsel %vm7616_vm5, %v855_v26, %v859_v3  ;;  %v1004_v46 = vsel %vm7569_vm2, %v1002_v45, %v1003_v30  ;;  %v1219_v61 = vshrl.u32 %v8061_v59, 16  ;;  %v1222_v15 = vshll.u32 %v8061_v59, 16  ;;  %v8092_v17 = vpop.permute.xlu1 %1522  ;;  %v8126_v24 = vld [vmem:[%s7525_s30 + $0x68] sm:$0x1]  ;;  %v5898_v45 = vld [vmem:[%s7525_s30 + $0x60] sm:$0xe] }
  0xa9   : > { %v5959_v32 = vcombine.low %v850_v2, %v860_v41  ;;  %v836_v43 = vsel %vm7616_vm5, %v831_v25, %v835_v9  ;;  %v5969_v44 = vcombine.low %v1001_v31, %v1004_v46  ;;  %v994_v49 = vsel %vm7569_vm2, %v5858_v35, %v993_v34 }
  0xaa   : > { %v5958_v21 = vcombine.low %v826_v33, %v836_v43  ;;  %v995_v51 = vrot.slane %v993_v34, 4  ;;  %v1221_v52 = vrot.slane %v1219_v61, 4  ;;  %v1224_v53 = vrot.slane %v1222_v15, 5 }
  0xab   : > { %1644 = vrot.lane.b32.xlu1 %v5959_v32, %s7410_s15  ;;  %v1232_v57 = vshrl.u32 %v8078_v60, 16  ;;  %v5979_v19 = vcombine.low %v8061_v59, %v8078_v60  ;;  %v1195_v58 = vshrl.u32 %v5874_v13, 16  ;;  %v1198_v28 = vshll.u32 %v5874_v13, 16 }
  0xac   : > { %1642 = vrot.lane.b32.xlu0 %v5958_v21, %s7410_s15  ;;  %v997_v63 = vsel %vm7569_vm2, %v995_v51, %v996_v36  ;;  %v1208_v0 = vshrl.u32 %v8090_v50, 16  ;;  %v5978_v4 = vcombine.low %v5874_v13, %v8090_v50  ;;  %v1225_v54 = vor.u32 %v1224_v53, %v1221_v52  ;;  %v8122_v9 = vpop.permute.xlu1 %1682 }
  0xad   : > { %v5968_v6 = vcombine.low %v994_v49, %v997_v63  ;;  %v1197_v8 = vrot.slane %v1195_v58, 4  ;;  %v1200_v10 = vrot.slane %v1198_v28, 5  ;;  %v1228_v48 = vshll.u32 %v8078_v60, 16 }
  0xae   : > { %v1226_v38 = vrot.slane %v1225_v54, 4  ;;  %v1234_v12 = vrot.slane %v1232_v57, 4  ;;  %v1238_v56 = vshll.u32 %v8099_v62, 16  ;;  %v1204_v14 = vshll.u32 %v8090_v50, 16  ;;  %v8115_v3 = vpop.permute.xlu0 %1470 }
  0xaf   : > { %1694 = vrot.lane.b32.xlu1 %v5969_v44, %s7407_s10  ;;  %v1230_v18 = vrot.slane %v1228_v48, 5  ;;  %v1201_v16 = vor.u32 %v1200_v10, %v1197_v8  ;;  %v1210_v27 = vrot.slane %v1208_v0, 4  ;;  %v1214_v20 = vshll.u32 %v8107_v5, 16  ;;  %v8151_v0 = vld [vmem:[%s7525_s30 + $0x6c] sm:$0xf] }
  0xb0   : > { %1692 = vrot.lane.b32.xlu0 %v5968_v6, %s7407_s10  ;;  %v1240_v40 = vrot.slane %v1238_v56, 5  ;;  %v1206_v23 = vrot.slane %v1204_v14, 5  ;;  %v478_v30 = vshrl.u32 %v8111_v11, 16  ;;  %v481_v35 = vshll.u32 %v8111_v11, 16 }
  0xb1   : > { %v1231_v59 = vsel %vm7616_vm5, %v1226_v38, %v1230_v18  ;;  %v1235_v2 = vor.u32 %v1234_v12, %v1230_v18  ;;  %v1202_v26 = vrot.slane %v1201_v16, 4  ;;  %v1216_v31 = vrot.slane %v1214_v20, 5  ;;  %v7198_v38 = vld [vmem:[%s7525_s30] sm:$0xf]  ;;  %v281_v18 = vld [vmem:[%s7525_s30 + $0x74] sm:$0x1] }
  0xb2   : > { %v1211_v33 = vor.u32 %v1210_v27, %v1206_v23  ;;  %v480_v25 = vrot.slane %v478_v30, 4  ;;  %v483_v34 = vrot.slane %v481_v35, 5  ;;  %v487_v36 = vshll.u32 %v8120_v7, 16  ;;  %v8134_v41 = vpop.permute.xlu0 %1472  ;;  %v5899_v35 = vld [vmem:[%s7525_s30 + $0x6c] sm:$0xe] }
  0xb3   : > { %1754 = vrot.lane.b32.xlu1 %v5979_v19, %s9615_s17  ;;  %v1236_v46 = vrot.slane %v1235_v2, 4  ;;  %v1207_v61 = vsel %vm7616_vm5, %v1202_v26, %v1206_v23  ;;  %v491_v15 = vshrl.u32 %v8120_v7, 16  ;;  %v497_v13 = vshll.u32 %v8126_v24, 16  ;;  %v8145_v57 = vpop.permute.xlu1 %1632 }
  0xb4   : > { %1752 = vrot.lane.b32.xlu0 %v5978_v4, %s9615_s17  ;;  %v1212_v32 = vrot.slane %v1211_v33, 4  ;;  %v484_v43 = vor.u32 %v483_v34, %v480_v25  ;;  %v489_v44 = vrot.slane %v487_v36, 5  ;;  %v5908_v49 = vrot.slane %v5898_v45, 9  ;;  %v534_v45 = vld [vmem:[%s7525_s30 + $0x6c] sm:$0xe] }
  0xb5   : > { %v1241_v21 = vsel %vm7616_vm5, %v1236_v46, %v1240_v40  ;;  %v493_v51 = vrot.slane %v491_v15, 4  ;;  %v499_v52 = vrot.slane %v497_v13, 5  ;;  %v1374_v53 = vrot.slane %v8090_v50, 5  ;;  %v8156_v50 = vld [vmem:[%s7525_s30 + $0x70] sm:$0xf] }
  0xb6   : > { %v5989_v19 = vcombine.low %v1231_v59, %v1241_v21  ;;  %v1217_v58 = vsel %vm7616_vm5, %v1212_v32, %v1216_v31  ;;  %v485_v28 = vrot.slane %v484_v43, 4  ;;  %v1377_v63 = vrot.slane %v8107_v5, 5  ;;  %v8158_v10 = vpop.permute.xlu0 %1630  ;;  %v7197_v5 = vld [vmem:[%s7525_s30 + $0x4] sm:$0xf]  ;;  %v7200_v21 = vld [vmem:[%s7525_s30 + $0xc] sm:$0xf] }
  0xb7   : > { %v5988_v4 = vcombine.low %v1207_v61, %v1217_v58  ;;  %v494_v54 = vor.u32 %v493_v51, %v489_v44  ;;  %v1375_v6 = vsel %vm7569_vm2, %v5908_v49, %v1374_v53  ;;  %v1376_v8 = vrot.slane %v1374_v53, 4  ;;  %v7199_v49 = vld [vmem:[%s7525_s30 + $0x10] sm:$0xf] }
  0xb8   : > { %1804 = vrot.lane.b32.xlu1 %v5989_v19, %s7411_s9  ;;  %v490_v48 = vsel %vm7616_vm5, %v485_v28, %v489_v44  ;;  %v5912_v12 = vcombine.low %v7198_v38, %v7197_v5  ;;  %v502_v16 = vshrl.u32 %v8151_v0, 16  ;;  %v505_v27 = vshll.u32 %v8151_v0, 16 }
  0xb9   : > { %1802 = vrot.lane.b32.xlu0 %v5988_v4, %s7411_s9  ;;  %v495_v56 = vrot.slane %v494_v54, 4  ;;  %v1378_v14 = vsel %vm7569_vm2, %v1376_v8, %v1377_v63  ;;  %v511_v23 = vshll.u32 %v8156_v50, 16  ;;  %v515_v30 = vshrl.u32 %v8156_v50, 16  ;;  %v8181_v33 = vpop.permute.xlu1 %1792 }
  0xba   : > { %v5998_v20 = vcombine.low %v1375_v6, %v1378_v14  ;;  %v1863_v40 = vsel %vm1860_vm6, %v5912_v12, %v8115_v3  ;;  %v504_v26 = vrot.slane %v502_v16, 4  ;;  %v507_v31 = vrot.slane %v505_v27, 5 }
  0xbb   : > { %v500_v59 = vsel %vm7616_vm5, %v495_v56, %v499_v52  ;;  %v1893_v2 = vsel %vm1891_vm7, %v1863_v40, %v8058_v22  ;;  %v513_v25 = vrot.slane %v511_v23, 5  ;;  %v517_v34 = vrot.slane %v515_v30, 4  ;;  %v533_v22 = vld [vmem:[%s7525_s30 + $0x60] sm:$0xe] }
  0xbc   : > { %v5930_v3 = vcombine.low %v490_v48, %v500_v59  ;;  %v521_v36 = vshll.u32 %v281_v18, 16  ;;  %v508_v46 = vor.u32 %v507_v31, %v504_v26  ;;  %v5909_v61 = vrot.slane %v5899_v35, 9  ;;  %v8225_v35 = vld [vmem:[%s7525_s30 + $0x7c] sm:$0xf]  ;;  %v5828_v26 = vld [vmem:[%s7525_s30 + $0x6c] sm:$0xf] }
  0xbd   : > { %1852 = vrot.lane.b32.xlu0 %v5998_v20, %s7412_s14  ;;  %v1381_v15 = vrot.slane %v8078_v60, 5  ;;  %v1384_v13 = vrot.slane %v8099_v62, 5  ;;  %v8187_v32 = vpop.permute.xlu0 %1790  ;;  %v518_v43 = vor.u32 %v517_v34, %v513_v25  ;;  %v5913_v51 = vcombine.low %v7200_v21, %v7199_v49  ;;  %v8253_v21 = vld [vmem:[%s7525_s30 + $0x74] sm:$0x1] }
  0xbe   : > { %1486 = vrot.lane.b32.xlu1 %v5930_v3, %s7409_s13  ;;  %v523_v44 = vrot.slane %v521_v36, 5  ;;  %v5811_v52 = vrot.slane %v534_v45, 9  ;;  %v509_v53 = vrot.slane %v508_v46, 4  ;;  %v633_v60 = vrot.slane %v8156_v50, 5 }
  0xbf   : > { %v1382_v19 = vsel %vm7569_vm2, %v5909_v61, %v1381_v15  ;;  %v1383_v58 = vrot.slane %v1381_v15, 4  ;;  %v519_v62 = vrot.slane %v518_v43, 4  ;;  %v1866_v28 = vsel %vm1860_vm6, %v5913_v51, %v8134_v41 }
  0xc0   : > { %v636_v63 = vrot.slane %v281_v18, 5  ;;  %v5810_v4 = vrot.slane %v533_v22, 9  ;;  %v514_v54 = vsel %vm7616_vm5, %v509_v53, %v513_v25  ;;  %v1895_v8 = vsel %vm1891_vm7, %v1866_v28, %v8092_v17  ;;  %v8205_v5 = vpop.permute.xlu1 %1474  ;;  %v5830_v18 = vld [vmem:[%s7525_s30 + $0x78] sm:$0xf]  ;;  %v8233_v25 = vld [vmem:[%s7525_s30 + $0x70] sm:$0xf] }
  0xc1   : > { %v1385_v6 = vsel %vm7569_vm2, %v1383_v58, %v1384_v13  ;;  %v634_v48 = vsel %vm7569_vm2, %v5811_v52, %v633_v60  ;;  %v8207_v38 = vpop.permute.xlu0 %1840  ;;  %v524_v41 = vsel %vm7616_vm5, %v519_v62, %v523_v44  ;;  %v635_v56 = vrot.slane %v633_v60, 4  ;;  %v7187_v58 = vld [vmem:[%s9591_s1 + $0x20] ss:$0 sps:$4 sm:$0xff]  }
  0xc2   : > { %v5999_v12 = vcombine.low %v1382_v19, %v1385_v6  ;;  %v626_v14 = vrot.slane %v8120_v7, 5  ;;  %v5931_v16 = vcombine.low %v514_v54, %v524_v41  ;;  %v629_v17 = vrot.slane %v8126_v24, 5  ;;  %7077 = vmatprep.subr.msk.bf16.mxu0 %vm2102_vm13, %v7187_v58 }
  0xc3   : > { %v637_v27 = vsel %vm7569_vm2, %v635_v56, %v636_v63  ;;  %v1916_v30 = vsel %vm1912_vm8, %v1895_v8, %v8009_v29  ;;  %v1914_v24 = vsel %vm1912_vm8, %v1893_v2, %v8034_v47  ;;  %v886_v59 = vshrl.u32 %v5830_v18, 16 }
  0xc4   : > { %1854 = vrot.lane.b32.xlu0 %v5999_v12, %s7412_s14  ;;  %v627_v20 = vsel %vm7569_vm2, %v5810_v4, %v626_v14  ;;  %v628_v40 = vrot.slane %v626_v14, 4  ;;  %1488 = vrot.lane.b32.xlu1 %v5931_v16, %s7409_s13  ;;  %v5941_v23 = vcombine.low %v634_v48, %v637_v27  ;;  %v1935_v45 = vsel %vm1933_vm9, %v1914_v24, %v8158_v10  ;;  %v5851_v4 = vld [vmem:[%s7525_s30 + $0x78] sm:$0xe]  ;;  %v5850_v14 = vld [vmem:[%s7525_s30 + $0x6c] sm:$0xe] }
  0xc5   : > { %v889_v3 = vshll.u32 %v5830_v18, 16  ;;  %v1937_v47 = vsel %vm1933_vm9, %v1916_v30, %v8145_v57  ;;  %v1956_v2 = vsel %vm1954_vm10, %v1935_v45, %v8083_v42  ;;  %v888_v36 = vrot.slane %v886_v59, 4  ;;  %v5841_v42 = vld [vmem:[%s7525_s30 + $0x80] sm:$0x1] }
  0xc6   : > { %v630_v31 = vsel %vm7569_vm2, %v628_v40, %v629_v17  ;;  %v8235_v34 = vpop.permute.xlu0 %1842  ;;  %v899_v10 = vshrl.u32 %v8225_v35, 16  ;;  %v5951_v15 = vcombine.low %v5830_v18, %v8225_v35  ;;  %v862_v13 = vshrl.u32 %v5828_v26, 16 }
  0xc7   : > { %v5940_v29 = vcombine.low %v627_v20, %v630_v31  ;;  %v8241_v46 = vpop.permute.xlu1 %1476  ;;  %v891_v61 = vrot.slane %v889_v3, 5  ;;  %v865_v22 = vshll.u32 %v5828_v26, 16  ;;  %v875_v57 = vshrl.u32 %v8233_v25, 16 }
  0xc8   : > { %1538 = vrot.lane.b32.xlu1 %v5941_v23, %s7408_s12  ;;  %v5950_v43 = vcombine.low %v5828_v26, %v8233_v25  ;;  %v1958_v44 = vsel %vm1954_vm10, %v1937_v47, %v8122_v9  ;;  %v864_v49 = vrot.slane %v862_v13, 4  ;;  %v1977_v53 = vsel %vm1975_vm11, %v1956_v2, %v8055_v1 }
  0xc9   : > { %1536 = vrot.lane.b32.xlu0 %v5940_v29, %s7408_s12  ;;  %v867_v52 = vrot.slane %v865_v22, 5  ;;  %v892_v19 = vor.u32 %v891_v61, %v888_v36  ;;  %v895_v9 = vshll.u32 %v8225_v35, 16  ;;  %v901_v62 = vrot.slane %v899_v10, 4 }
  0xca   : > { %v8255_v51 = vpop.permute.xlu0 %1524  ;;  %v905_v28 = vshll.u32 %v5841_v42, 16  ;;  %v871_v63 = vshll.u32 %v8233_v25, 16  ;;  %v877_v6 = vrot.slane %v875_v57, 4  ;;  %v881_v8 = vshll.u32 %v8253_v21, 16 }
  0xcb   : > { %v8262_v60 = vpop.permute.xlu1 %1526  ;;  %v893_v1 = vrot.slane %v892_v19, 4  ;;  %v868_v54 = vor.u32 %v867_v52, %v864_v49  ;;  %v1979_v48 = vsel %vm1975_vm11, %v1958_v44, %v8040_v55  ;;  %v1998_v41 = vsel %vm1996_vm12, %v1977_v53, %v8187_v32  ;;  %v8305_v44 = vld [vmem:[%s7525_s30 + $0x88] sm:$0xf]  ;;  %v5878_v49 = vld [vmem:[%s7525_s30 + $0x78] sm:$0xf] }
  0xcc   : > { %1598 = vrot.lane.b32.xlu1 %v5951_v15, %s7405_s8  ;;  %v897_v12 = vrot.slane %v895_v9, 5  ;;  %v873_v56 = vrot.slane %v871_v63, 5  ;;  %v907_v16 = vrot.slane %v905_v28, 5  ;;  %v5861_v27 = vrot.slane %v5851_v4, 9  ;;  %v5880_v15 = vld [vmem:[%s7525_s30 + $0x84] sm:$0xf] }
  0xcd   : > { %1596 = vrot.lane.b32.xlu0 %v5950_v43, %s7405_s8  ;;  %v869_v17 = vrot.slane %v868_v54, 4  ;;  %v883_v55 = vrot.slane %v881_v8, 5  ;;  %v1014_v24 = vrot.slane %v8225_v35, 5  ;;  %v1017_v59 = vrot.slane %v5841_v42, 5  ;;  %v8315_v19 = vld [vmem:[%s7525_s30 + $0x7c] sm:$0xf] }
  0xce   : > { %v8275_v18 = vpop.permute.xlu0 %1584  ;;  %v898_v40 = vsel %vm7616_vm5, %v893_v1, %v897_v12  ;;  %v902_v23 = vor.u32 %v901_v62, %v897_v12  ;;  %v878_v30 = vor.u32 %v877_v6, %v873_v56  ;;  %v5860_v26 = vrot.slane %v5850_v14, 9  ;;  %v7201_v63 = vld [vmem:[%s7525_s30 + $0x18] sm:$0xf]  ;;  %v7202_v4 = vld [vmem:[%s7525_s30 + $0x1c] sm:$0xf] }
  0xcf   : > { %v8277_v20 = vpop.permute.xlu1 %1586  ;;  %v874_v32 = vsel %vm7616_vm5, %v869_v17, %v873_v56  ;;  %v1007_v3 = vrot.slane %v8233_v25, 5  ;;  %v1010_v29 = vrot.slane %v8253_v21, 5  ;;  %v1015_v47 = vsel %vm7569_vm2, %v5861_v27, %v1014_v24  ;;  %v8327_v8 = vld [vmem:[%s7525_s30 + $0x8c] sm:$0x1] }
  0xd0   : > { %v903_v31 = vrot.slane %v902_v23, 4  ;;  %v879_v45 = vrot.slane %v878_v30, 4  ;;  %v1016_v2 = vrot.slane %v1014_v24, 4  ;;  %v2019_v42 = vsel %vm2017_vm14, %v1998_v41, %v8207_v38 }
  0xd1   : > { %v1008_v25 = vsel %vm7569_vm2, %v5860_v26, %v1007_v3  ;;  %v1009_v10 = vrot.slane %v1007_v3, 4  ;;  %v2000_v21 = vsel %vm1996_vm12, %v1979_v48, %v8181_v33  ;;  %6641 = vmatprep.mubr.msk.bf16.mxu0 %vm2081_vm15, %v2019_v42  ;;  %v2104_v53 = vsel %vm2102_vm13, %v7187_v58, 0 }
  0xd2   : > { %v908_v35 = vsel %vm7616_vm5, %v903_v31, %v907_v16  ;;  %v884_v61 = vsel %vm7616_vm5, %v879_v45, %v883_v55  ;;  %v1018_v43 = vsel %vm7569_vm2, %v1016_v2, %v1017_v59  ;;  %v1267_v62 = vshrl.u32 %v5880_v15, 16  ;;  %6640 = vmatpush3.bf16.msra.mxu0 %v2104_v53  ;;  %v5890_v16 = vld [vmem:[%s7525_s30 + $0x80] sm:$0x1]  ;;  %v5901_v45 = vld [vmem:[%s7525_s30 + $0x84] sm:$0xe] }
  0xd3   : > { %v8289_v36 = vpop.permute.xlu1 %1636  ;;  %v5961_v22 = vcombine.low %v898_v40, %v908_v35  ;;  %v5960_v57 = vcombine.low %v874_v32, %v884_v61  ;;  %v1011_v52 = vsel %vm7569_vm2, %v1009_v10, %v1010_v29  ;;  %v5971_v38 = vcombine.low %v1015_v47, %v1018_v43  ;;  %v5900_v61 = vld [vmem:[%s7525_s30 + $0x78] sm:$0xe]  ;;  %v7204_v10 = vld [vmem:[%s7525_s30 + $0x28] sm:$0xf] }
  0xd4   : > { %v8298_v13 = vpop.permute.xlu0 %1634  ;;  %v5970_v9 = vcombine.low %v1008_v25, %v1011_v52  ;;  %v1270_v28 = vshll.u32 %v5880_v15, 16  ;;  %v5914_v1 = vcombine.low %v7201_v63, %v7202_v4  ;;  %v2021_v58 = vsel %vm2017_vm14, %v2000_v21, %v8235_v34  ;;  %v7203_v25 = vld [vmem:[%s7525_s30 + $0x24] sm:$0xf] }
  0xd5   : > { %1648 = vrot.lane.b32.xlu1 %v5961_v22, %s7410_s15  ;;  %1646 = vrot.lane.b32.xlu0 %v5960_v57, %s7410_s15  ;;  %v1280_v54 = vshrl.u32 %v8305_v44, 16  ;;  %v1243_v6 = vshrl.u32 %v5878_v49, 16  ;;  %v1269_v41 = vrot.slane %v1267_v62, 4  ;;  %v1246_v56 = vshll.u32 %v5878_v49, 16 }
  0xd6   : > { %v1272_v12 = vrot.slane %v1270_v28, 5  ;;  %v1256_v14 = vshrl.u32 %v8315_v19, 16  ;;  %v5981_v17 = vcombine.low %v5880_v15, %v8305_v44  ;;  %v5980_v40 = vcombine.low %v5878_v49, %v8315_v19  ;;  %6642 = vmatmul.mubr.msk.bf16.vlgmr.msra.gmra.mrb[0].mxu0 %vm2081_vm15, %v2021_v58 }
  0xd7   : > { %v8319_v33 = vpop.permute.xlu1 %1686  ;;  %v1245_v27 = vrot.slane %v1243_v6, 4  ;;  %v1248_v34 = vrot.slane %v1246_v56, 5  ;;  %v1276_v30 = vshll.u32 %v8305_v44, 16  ;;  %v1282_v55 = vrot.slane %v1280_v54, 4 }
  0xd8   : > { %v8329_v48 = vpop.permute.xlu0 %1684  ;;  %v1273_v23 = vor.u32 %v1272_v12, %v1269_v41  ;;  %v1286_v24 = vshll.u32 %v8327_v8, 16  ;;  %v1252_v59 = vshll.u32 %v8315_v19, 16  ;;  %v1258_v26 = vrot.slane %v1256_v14, 4 }
  0xd9   : > { %1698 = vrot.lane.b32.xlu1 %v5971_v38, %s7407_s10  ;;  %1696 = vrot.lane.b32.xlu0 %v5970_v9, %s7407_s10  ;;  %v1262_v31 = vshll.u32 %v5890_v16, 16  ;;  %v1869_v29 = vsel %vm1860_vm6, %v5914_v1, %v8205_v5  ;;  %v1278_v2 = vrot.slane %v1276_v30, 5  ;;  %v1249_v35 = vor.u32 %v1248_v34, %v1245_v27 }
  0xda   : > { %v1274_v47 = vrot.slane %v1273_v23, 4  ;;  %v5915_v15 = vcombine.low %v7203_v25, %v7204_v10  ;;  %v1897_v22 = vsel %vm1891_vm7, %v1869_v29, %v8255_v51  ;;  %v1288_v57 = vrot.slane %v1286_v24, 5 }
  0xdb   : > { %v8338_v32 = vpop.permute.xlu1 %1746  ;;  %v1254_v43 = vrot.slane %v1252_v59, 5  ;;  %v1283_v42 = vor.u32 %v1282_v55, %v1278_v2  ;;  %v1250_v49 = vrot.slane %v1249_v35, 4  ;;  %v1264_v21 = vrot.slane %v1262_v31, 5 }
  0xdc   : > { %v1745_v3 = vpop.permute.xlu0 %1744  ;;  %v5911_v5 = vrot.slane %v5901_v45, 9  ;;  %v1395_v53 = vrot.slane %v8305_v44, 5  ;;  %v1398_v38 = vrot.slane %v8327_v8, 5  ;;  %v5910_v9 = vrot.slane %v5900_v61, 9 }
  0xdd   : > { %1758 = vrot.lane.b32.xlu1 %v5981_v17, %s9615_s17  ;;  %1756 = vrot.lane.b32.xlu0 %v5980_v40, %s9615_s17  ;;  %v1259_v52 = vor.u32 %v1258_v26, %v1254_v43  ;;  %v1279_v51 = vsel %vm7616_vm5, %v1274_v47, %v1278_v2  ;;  %v1284_v28 = vrot.slane %v1283_v42, 4  ;;  %v1388_v63 = vrot.slane %v8315_v19, 5 }
  0xde   : > { %v1391_v4 = vrot.slane %v5890_v16, 5  ;;  %v1255_v58 = vsel %vm7616_vm5, %v1250_v49, %v1254_v43  ;;  %v1918_v6 = vsel %vm1912_vm8, %v1897_v22, %v8275_v18  ;;  %v1397_v44 = vrot.slane %v1395_v53, 4  ;;  %v7205_v22 = vld [vmem:[%s7525_s30 + $0x30] sm:$0xf] }
  0xdf   : > { %v1260_v54 = vrot.slane %v1259_v52, 4  ;;  %v1289_v8 = vsel %vm7616_vm5, %v1284_v28, %v1288_v57  ;;  %v1396_v41 = vsel %vm7569_vm2, %v5911_v5, %v1395_v53  ;;  %v1389_v12 = vsel %vm7569_vm2, %v5910_v9, %v1388_v63  ;;  %v7206_v57 = vld [vmem:[%s7525_s30 + $0x34] sm:$0xf]  ;;  %v7207_v53 = vld [vmem:[%s7525_s30 + $0x3c] sm:$0xf] }
  0xe0   : > { %v1797_v62 = vpop.permute.xlu1 %1796  ;;  %v1390_v19 = vrot.slane %v1388_v63, 4  ;;  %v5991_v56 = vcombine.low %v1279_v51, %v1289_v8  ;;  %v1399_v16 = vsel %vm7569_vm2, %v1397_v44, %v1398_v38  ;;  %v1939_v18 = vsel %vm1933_vm9, %v1918_v6, %v8298_v13  ;;  %v7208_v38 = vld [vmem:[%s7525_s30 + $0x40] sm:$0xf] }
  0xe1   : > { %v1795_v1 = vpop.permute.xlu0 %1794  ;;  %v1265_v14 = vsel %vm7616_vm5, %v1260_v54, %v1264_v21  ;;  %v1872_v17 = vsel %vm1860_vm6, %v5915_v15, %v8241_v46  ;;  %v1960_v34 = vsel %vm1954_vm10, %v1939_v18, %v8329_v48  ;;  %v6001_v55 = vcombine.low %v1396_v41, %v1399_v16 }
  0xe2   : > { %v5990_v27 = vcombine.low %v1255_v58, %v1265_v14  ;;  %v1392_v40 = vsel %vm7569_vm2, %v1390_v19, %v1391_v4  ;;  %v1899_v30 = vsel %vm1891_vm7, %v1872_v17, %v8262_v60  ;;  %1808 = vrot.lane.b32.xlu1 %v5991_v56, %s7411_s9  ;;  %v1981_v24 = vsel %vm1975_vm11, %v1960_v34, %v1745_v3 }
  0xe3   : > { %v1920_v46 = vsel %vm1912_vm8, %v1899_v30, %v8277_v20  ;;  %v6000_v37 = vcombine.low %v1389_v12, %v1392_v40  ;;  %v2002_v59 = vsel %vm1996_vm12, %v1981_v24, %v1795_v1  ;;  %v5920_v60 = vcombine.low %v8111_v11, %v8120_v7 }
  0xe4   : > { %1806 = vrot.lane.b32.xlu0 %v5990_v27, %s7411_s9  ;;  %v1941_v48 = vsel %vm1933_vm9, %v1920_v46, %v8289_v36  ;;  %v5921_v45 = vcombine.low %v8151_v0, %v8156_v50  ;;  %v5916_v43 = vcombine.low %v7205_v22, %v7206_v57  ;;  %v5917_v9 = vcombine.low %v7207_v53, %v7208_v38  ;;  %v7209_v46 = vld [vmem:[%s7525_s30 + $0x48] sm:$0xf]  ;;  %s8549_s9 = scalar_lea.vmem [#allocation3], %s7683_s16 }
  0xe5   : > { %v1845_v23 = vpop.permute.xlu0 %1844  ;;  %v1962_v31 = vsel %vm1954_vm10, %v1941_v48, %v8319_v33  ;;  %vm2272_vm2 = vcmask 1040384  }
  0xe6   : > { %v1479_v13 = vpop.permute.xlu1 %1478  ;;  %v2023_v26 = vsel %vm2017_vm14, %v2002_v59, %v1845_v23  ;;  %1858 = vrot.lane.b32.xlu1 %v6001_v55, %s7412_s14  ;;  %v1983_v20 = vsel %vm1975_vm11, %v1962_v31, %v8338_v32 }
  0xe7   : > { %6645 = vmatprep.mubr.msk.bf16.mxu0 %vm2081_vm15, %v2023_v26  ;;  %v2004_v36 = vsel %vm1996_vm12, %v1983_v20, %v1797_v62  ;;  %v1875_v21 = vsel %vm1860_vm6, %v5916_v43, %v1479_v13 }
  0xe8   : > { %1856 = vrot.lane.b32.xlu0 %v6000_v37, %s7412_s14  ;;  %v7210_v37 = vld [vmem:[%s7525_s30 + $0x4c] sm:$0xf] }
  0xe9   : > { %v5918_v59 = vcombine.low %v7209_v46, %v7210_v37 }
  0xeb   : > { %v1847_v3 = vpop.permute.xlu0 %1846 }
  0xec   : > { %v1481_v29 = vpop.permute.xlu1 %1480  ;;  %v2025_v33 = vsel %vm2017_vm14, %v2004_v36, %v1847_v3 }
  0xed   : > { %6646 = vmatmul.mubr.msk.bf16.gmra.mrb[4].mxu0 %vm2081_vm15, %v2025_v33  ;;  %v1878_v1 = vsel %vm1860_vm6, %v5917_v9, %v1481_v29  ;;  %v7211_v33 = vld [vmem:[%s7525_s30 + $0x54] sm:$0xf] }
  0xef   : > { %v1529_v47 = vpop.permute.xlu0 %1528 }
  0xf0   : > { %v1531_v2 = vpop.permute.xlu1 %1530  ;;  %v1901_v5 = vsel %vm1891_vm7, %v1875_v21, %v1529_v47  ;;  %v7212_v47 = vld [vmem:[%s7525_s30 + $0x58] sm:$0xf] }
  0xf1   : > { %v1903_v6 = vsel %vm1891_vm7, %v1878_v1, %v1531_v2  ;;  %v5919_v2 = vcombine.low %v7211_v33, %v7212_v47 }
  0xf3   : > { %v1589_v35 = vpop.permute.xlu0 %1588 }
  0xf4   : > { %v1591_v61 = vpop.permute.xlu1 %1590  ;;  %v1922_v62 = vsel %vm1912_vm8, %v1901_v5, %v1589_v35 }
  0xf5   : > { %v1924_v41 = vsel %vm1912_vm8, %v1903_v6, %v1591_v61 }
  0xf8   : > { %v1641_v25 = vpop.permute.xlu1 %1640 }
  0xf9   : > { %v1639_v10 = vpop.permute.xlu0 %1638  ;;  %v1945_v12 = vsel %vm1933_vm9, %v1924_v41, %v1641_v25 }
  0xfa   : > { %v1943_v28 = vsel %vm1933_vm9, %v1922_v62, %v1639_v10 }
  0xfc   : > { %v1691_v32 = vpop.permute.xlu1 %1690 }
  0xfd   : > { %v1689_v15 = vpop.permute.xlu0 %1688  ;;  %v1966_v19 = vsel %vm1954_vm10, %v1945_v12, %v1691_v32 }
  0xfe   : > { %v1964_v63 = vsel %vm1954_vm10, %v1943_v28, %v1689_v15 }
 0x100   : > { %v1751_v42 = vpop.permute.xlu1 %1750 }
 0x101   : > { %v1749_v49 = vpop.permute.xlu0 %1748  ;;  %v1987_v56 = vsel %vm1975_vm11, %v1966_v19, %v1751_v42 }
 0x102   : > { %v1985_v4 = vsel %vm1975_vm11, %v1964_v63, %v1749_v49 }
 0x105   : > { %v1801_v52 = vpop.permute.xlu1 %1800 }
 0x106   : > { %v1799_v51 = vpop.permute.xlu0 %1798  ;;  %v2008_v14 = vsel %vm1996_vm12, %v1987_v56, %v1801_v52 }
 0x107   : > { %v2006_v58 = vsel %vm1996_vm12, %v1985_v4, %v1799_v51 }
 0x10a   : > { %v1849_v54 = vpop.permute.xlu0 %1848 }
 0x10b   : > { %v1483_v44 = vpop.permute.xlu1 %1482  ;;  %v2027_v8 = vsel %vm2017_vm14, %v2006_v58, %v1849_v54 }
 0x10c   : > { %6649 = vmatprep.mubr.msk.bf16.mxu0 %vm2081_vm15, %v2027_v8  ;;  %v1881_v31 = vsel %vm1860_vm6, %v5918_v59, %v1483_v44 }
 0x110   : > { %v1851_v16 = vpop.permute.xlu0 %1850 }
 0x111   : > { %v1485_v18 = vpop.permute.xlu1 %1484  ;;  %v2029_v17 = vsel %vm2017_vm14, %v2008_v14, %v1851_v16 }
 0x112   : > { %6650 = vmatmul.mubr.msk.bf16.gmra.mrb[8].mxu0 %vm2081_vm15, %v2029_v17  ;;  %v1884_v15 = vsel %vm1860_vm6, %v5919_v2, %v1485_v18 }
 0x114   : > { %v1533_v27 = vpop.permute.xlu0 %1532 }
 0x115   : > { %v1535_v40 = vpop.permute.xlu1 %1534  ;;  %v1905_v20 = vsel %vm1891_vm7, %v1881_v31, %v1533_v27 }
 0x116   : > { %v1907_v57 = vsel %vm1891_vm7, %v1884_v15, %v1535_v40  ;;  %v2248_v15 = vld [vmem:[#allocation2 + $0x2c] sm:$0x8] }
 0x118   : > { %v1593_v34 = vpop.permute.xlu0 %1592 }
 0x119   : > { %v1595_v23 = vpop.permute.xlu1 %1594  ;;  %v1926_v36 = vsel %vm1912_vm8, %v1905_v20, %v1593_v34 }
 0x11a   : > { %v1928_v42 = vsel %vm1912_vm8, %v1907_v57, %v1595_v23  ;;  %v2249_v57 = vsel %vm8482_vm3, 0, %v2248_v15 }
 0x11b   : > { %2250 = vst [vmem:[#allocation2 + $0x2c] sm:$0x8] %v2249_v57 }
 0x11d   : > { %v1645_v30 = vpop.permute.xlu1 %1644 }
 0x11e   : > { %v1643_v55 = vpop.permute.xlu0 %1642  ;;  %v1949_v49 = vsel %vm1933_vm9, %v1928_v42, %v1645_v30  ;;  %v2254_v42 = vld [vmem:[#allocation2 + $0x54] sm:$0x8] }
 0x11f   : > { %v1947_v35 = vsel %vm1933_vm9, %v1926_v36, %v1643_v55  ;;  %v8476_v55 = vld [vmem:[%s9592_s2] ss:$0 sm:$0xff] }
 0x121   : > { %v1695_v24 = vpop.permute.xlu1 %1694 }
 0x122   : > { %v1693_v13 = vpop.permute.xlu0 %1692  ;;  %v1970_v21 = vsel %vm1954_vm10, %v1949_v49, %v1695_v24  ;;  %v2257_v49 = vld [vmem:[#allocation2 + $0x68] sm:$0x8] }
 0x123   : > { %v1968_v61 = vsel %vm1954_vm10, %v1947_v35, %v1693_v13 }
 0x125   : > { %v1755_v48 = vpop.permute.xlu1 %1754 }
 0x126   : > { %v1753_v26 = vpop.permute.xlu0 %1752  ;;  %v1991_v5 = vsel %vm1975_vm11, %v1970_v21, %v1755_v48  ;;  %v2255_v21 = vsel %vm8482_vm3, 0, %v2254_v42 }
 0x127   : > { %v1989_v25 = vsel %vm1975_vm11, %v1968_v61, %v1753_v26  ;;  %v2242_v61 = vld [vmem:[#allocation2 + $0x4] sm:$0x8]  ;;  %2256 = vst [vmem:[#allocation2 + $0x54] sm:$0x8] %v2255_v21 }
 0x12a   : > { %v1805_v3 = vpop.permute.xlu1 %1804 }
 0x12b   : > { %v1803_v29 = vpop.permute.xlu0 %1802  ;;  %v2012_v52 = vsel %vm1996_vm12, %v1991_v5, %v1805_v3  ;;  %v2258_v5 = vsel %vm8482_vm3, 0, %v2257_v49 }
 0x12c   : > { %v2010_v10 = vsel %vm1996_vm12, %v1989_v25, %v1803_v29  ;;  %v2245_v25 = vld [vmem:[#allocation2 + $0x18] sm:$0x8]  ;;  %2259 = vst [vmem:[#allocation2 + $0x68] sm:$0x8] %v2258_v5 }
 0x12f   : > { %v1853_v32 = vpop.permute.xlu0 %1852 }
 0x130   : > { %v2031_v22 = vsel %vm2017_vm14, %v2010_v10, %v1853_v32  ;;  %v1487_v43 = vpop.permute.xlu1 %1486  ;;  %v2243_v10 = vsel %vm8482_vm3, 0, %v2242_v61  ;;  %v2246_v32 = vsel %vm8482_vm3, 0, %v2245_v25 }
 0x131   : > { %6653 = vmatprep.mubr.msk.bf16.mxu0 %vm2081_vm15, %v2031_v22  ;;  %v1887_v41 = vsel %vm1860_vm6, %v5920_v60, %v1487_v43  ;;  %v2251_v22 = vld [vmem:[#allocation2 + $0x40] sm:$0x8]  ;;  %2244 = vst [vmem:[#allocation2 + $0x4] sm:$0x8] %v2243_v10  ;;  %2247 = vst [vmem:[#allocation2 + $0x18] sm:$0x8] %v2246_v32 }
 0x132   : > { %v2252_v43 = vsel %vm8482_vm3, 0, %v2251_v22 }
 0x133   : > { %2253 = vst [vmem:[#allocation2 + $0x40] sm:$0x8] %v2252_v43 }
 0x136   : > { %v1855_v53 = vpop.permute.xlu0 %1854  ;;  %v1489_v38 = vpop.permute.xlu1 %1488 }
 0x137   : > { %v2033_v9 = vsel %vm2017_vm14, %v2012_v52, %v1855_v53  ;;  %v1890_v8 = vsel %vm1860_vm6, %v5921_v45, %v1489_v38  ;;  %v2260_v52 = vld [vmem:[#allocation2 + $0x7c] sm:$0x8]  ;;  %v2263_v53 = vld [vmem:[#allocation2 + $0x90] sm:$0x8]  ;;  %vm8500_vm6 = vmand %vm2272_vm2, %vm2273_vm4 }
 0x138   : > { %6654 = vmatmul.mubr.msk.bf16.gmra.mrb[12].mxu0 %vm2081_vm15, %v2033_v9  ;;  %v2261_v9 = vsel %vm8482_vm3, 0, %v2260_v52 }
 0x139   : > { %2262 = vst [vmem:[#allocation2 + $0x7c] sm:$0x8] %v2261_v9 }
 0x13a   : > { %v1539_v62 = vpop.permute.xlu1 %1538 }
 0x13b   : > { %v1537_v51 = vpop.permute.xlu0 %1536  ;;  %v1911_v12 = vsel %vm1891_vm7, %v1890_v8, %v1539_v62  ;;  %v2264_v62 = vsel %vm8482_vm3, 0, %v2263_v53  ;;  %v2278_v8 = vld [vmem:[#allocation2 + $0x24] sm:$0x1] }
 0x13c   : > { %v1909_v19 = vsel %vm1891_vm7, %v1887_v41, %v1537_v51  ;;  %v2266_v51 = vld [vmem:[#allocation2 + $0xa4] sm:$0x8]  ;;  %2265 = vst [vmem:[#allocation2 + $0x90] sm:$0x8] %v2264_v62  ;;  %v2281_v41 = vld [vmem:[#allocation2 + $0x38] sm:$0x1] }
 0x13e   : > { %v1599_v28 = vpop.permute.xlu1 %1598 }
 0x13f   : > { %v1597_v63 = vpop.permute.xlu0 %1596  ;;  %v1932_v56 = vsel %vm1912_vm8, %v1911_v12, %v1599_v28  ;;  %v2269_v28 = vld [vmem:[#allocation2 + $0xb8] sm:$0x8] }
 0x140   : > { %v1930_v16 = vsel %vm1912_vm8, %v1909_v19, %v1597_v63 }
 0x147   : > { %v1649_v4 = vpop.permute.xlu1 %1648  ;;  %v1647_v1 = vpop.permute.xlu0 %1646 }
 0x148   : > { %v1953_v18 = vsel %vm1933_vm9, %v1932_v56, %v1649_v4  ;;  %v1951_v0 = vsel %vm1933_vm9, %v1930_v16, %v1647_v1  ;;  %v2267_v4 = vsel %vm8482_vm3, 0, %v2266_v51  ;;  %v2270_v1 = vsel %vm8482_vm3, 0, %v2269_v28  ;;  %v2284_v16 = vld [vmem:[#allocation2 + $0x4c] sm:$0x1] }
 0x149   : > { %2268 = vst [vmem:[#allocation2 + $0xa4] sm:$0x8] %v2267_v4  ;;  %2271 = vst [vmem:[#allocation2 + $0xb8] sm:$0x8] %v2270_v1  ;;  %v2279_v56 = vsel %vm8500_vm6, 0, %v2278_v8 }
 0x14a   : > { %2280 = vst [vmem:[#allocation2 + $0x24] sm:$0x1] %v2279_v56 }
 0x14b   : > { %v1699_v58 = vpop.permute.xlu1 %1698  ;;  %v1697_v54 = vpop.permute.xlu0 %1696 }
 0x14c   : > { %v1974_v50 = vsel %vm1954_vm10, %v1953_v18, %v1699_v58  ;;  %v1972_v11 = vsel %vm1954_vm10, %v1951_v0, %v1697_v54  ;;  %v2275_v58 = vld [vmem:[#allocation2 + $0x10] sm:$0x1] }
 0x14f   : > { %v1759_v6 = vpop.permute.xlu1 %1758  ;;  %v1757_v44 = vpop.permute.xlu0 %1756 }
 0x150   : > { %v1995_v7 = vsel %vm1975_vm11, %v1974_v50, %v1759_v6  ;;  %v1993_v60 = vsel %vm1975_vm11, %v1972_v11, %v1757_v44  ;;  %v2276_v44 = vsel %vm8500_vm6, 0, %v2275_v58  ;;  %v2285_v50 = vsel %vm8500_vm6, 0, %v2284_v16  ;;  %v2287_v11 = vld [vmem:[#allocation2 + $0x60] sm:$0x1] }
 0x151   : > { %2277 = vst [vmem:[#allocation2 + $0x10] sm:$0x1] %v2276_v44  ;;  %2286 = vst [vmem:[#allocation2 + $0x4c] sm:$0x1] %v2285_v50 }
 0x154   : > { %v1809_v14 = vpop.permute.xlu1 %1808 }
 0x155   : > { %v2016_v45 = vsel %vm1996_vm12, %v1995_v7, %v1809_v14  ;;  %v2282_v14 = vsel %vm8500_vm6, 0, %v2281_v41 }
 0x156   : > { %v1807_v17 = vpop.permute.xlu0 %1806  ;;  %2283 = vst [vmem:[#allocation2 + $0x38] sm:$0x1] %v2282_v14 }
 0x157   : > { %v2014_v40 = vsel %vm1996_vm12, %v1993_v60, %v1807_v17 }
 0x158   : > { %v1859_v27 = vpop.permute.xlu1 %1858 }
 0x159   : > { %v2037_v34 = vsel %vm2017_vm14, %v2016_v45, %v1859_v27  ;;  %v2288_v45 = vsel %vm8500_vm6, 0, %v2287_v11  ;;  %v2290_v27 = vld [vmem:[#allocation2 + $0x74] sm:$0x1] }
 0x15a   : > { %v1857_v23 = vpop.permute.xlu0 %1856  ;;  %2289 = vst [vmem:[#allocation2 + $0x60] sm:$0x1] %v2288_v45 }
 0x15b   : > { %v2035_v30 = vsel %vm2017_vm14, %v2014_v40, %v1857_v23  ;;  %v2293_v40 = vld [vmem:[#allocation2 + $0x88] sm:$0x1] }
 0x15c   : > { %6657 = vmatprep.mubr.msk.bf16.mxu0 %vm2081_vm15, %v2035_v30  ;;  %v2291_v30 = vsel %vm8500_vm6, 0, %v2290_v27 }
 0x15d   : > { %6658 = vmatmul.mubr.msk.bf16.gmra.mrb[16].mxu0 %vm2081_vm15, %v2037_v34  ;;  %2292 = vst [vmem:[#allocation2 + $0x74] sm:$0x1] %v2291_v30 }
 0x1a9   : > { %v6643_v24 = vpop.f32.mrb[0].mxu0 }
 0x1aa   : > { %v2149_v13 = vadd.f32 %v6643_v24, %v8476_v55  ;;  %v2140_v46 = vpop.f32.mrb[1].mxu0  ;;  %v2294_v24 = vsel %vm8500_vm6, 0, %v2293_v40 }
 0x1ab   : > { %v2141_v37 = vadd.f32 %v8476_v55, %v2140_v46  ;;  %v6644_v59 = vpop.f32.mrb[2].mxu0  ;;  %2295 = vst [vmem:[#allocation2 + $0x88] sm:$0x1] %v2294_v24 }
 0x1ac   : > { %v2221_v48 = vmax.f32 %v2149_v13, 0.0  ;;  %v2152_v26 = vadd.f32 %v6644_v59, %v8476_v55  ;;  %v2143_v31 = vpop.f32.mrb[3].mxu0  ;;  %v2296_v13 = vld [vmem:[#allocation2 + $0x9c] sm:$0x1]  ;;  %v2299_v59 = vld [vmem:[#allocation2 + $0xb0] sm:$0x1] }
 0x1ad   : > { %v2144_v20 = vadd.f32 %v8476_v55, %v2143_v31  ;;  %v2219_v29 = vmax.f32 %v2141_v37, 0.0  ;;  %v2297_v37 = vsel %vm8500_vm6, 0, %v2296_v13  ;;  %v2300_v31 = vsel %vm8500_vm6, 0, %v2299_v59 }
 0x1ae   : > { %v6361_v36 = vpack.c.bf16 %v2221_v48, %v2221_v48  ;;  %v2222_v3 = vmax.f32 %v2152_v26, 0.0  ;;  %v2302_v48 = vld [vmem:[#allocation2 + $0xc4] sm:$0x1]  ;;  %2298 = vst [vmem:[#allocation2 + $0x9c] sm:$0x1] %v2297_v37 }
 0x1af   : > { %v2220_v33 = vmax.f32 %v2144_v20, 0.0  ;;  %v2303_v20 = vsel %vm8500_vm6, 0, %v2302_v48  ;;  %2301 = vst [vmem:[#allocation2 + $0xb0] sm:$0x1] %v2300_v31 }
 0x1b0   : > { %2387 = vst [vmem:[#allocation2 + $0x1c] sm:$0xf] %v6361_v36  ;;  %v6362_v47 = vpack.c.bf16 %v2222_v3, %v2222_v3  ;;  %2304 = vst [vmem:[#allocation2 + $0xc4] sm:$0x1] %v2303_v20 }
 0x1b1   : > { %v6398_v2 = vpack.c.bf16 %v2220_v33, %v2219_v29 }
 0x1b2   : > { %2388 = vst [vmem:[#allocation2 + $0x20] sm:$0xf] %v6362_v47 }
 0x1b3   : > { %6460 = vst [vmem:[#allocation2 + $0x8] sm:$0xff] %v6398_v2  }
 0x1c0   : > { %v6647_v63 = vpop.f32.mrb[4].mxu0 }
 0x1c1   : > { %v2165_v54 = vadd.f32 %v6647_v63, %v8476_v55  ;;  %v2156_v6 = vpop.f32.mrb[5].mxu0 }
 0x1c2   : > { %v2157_v12 = vadd.f32 %v8476_v55, %v2156_v6  ;;  %v6648_v19 = vpop.f32.mrb[6].mxu0 }
 0x1c3   : > { %v2225_v18 = vmax.f32 %v2165_v54, 0.0  ;;  %v2168_v17 = vadd.f32 %v6648_v19, %v8476_v55  ;;  %v2159_v0 = vpop.f32.mrb[7].mxu0 }
 0x1c4   : > { %v2223_v7 = vmax.f32 %v2157_v12, 0.0  ;;  %v2160_v60 = vadd.f32 %v8476_v55, %v2159_v0 }
 0x1c5   : > { %v6365_v34 = vpack.c.bf16 %v2225_v18, %v2225_v18  ;;  %v2226_v23 = vmax.f32 %v2168_v17, 0.0 }
 0x1c6   : > { %v2224_v46 = vmax.f32 %v2160_v60, 0.0  ;;  %v7413_v60 = vmov (!%p6038_p0), 0  }
 0x1c7   : > { %2391 = vst [vmem:[#allocation2 + $0x44] sm:$0xf] %v6365_v34  ;;  %v6366_v26 = vpack.c.bf16 %v2226_v23, %v2226_v23  ;;  %2409 = vst [vmem:[#allocation2 + $0x8] sm:$0xf] (!%p6038_p0), %v7413_v60 }
 0x1c8   : > { %v6403_v36 = vpack.c.bf16 %v2224_v46, %v2223_v7  ;;  %2410 = vst [vmem:[#allocation2 + $0xc] sm:$0xf] (!%p6038_p0), %v7413_v60 }
 0x1c9   : > { %2392 = vst [vmem:[#allocation2 + $0x48] sm:$0xf] %v6366_v26 }
 0x1ca   : > { %6461 = vst [vmem:[#allocation2 + $0x30] sm:$0xff] %v6403_v36  }
 0x1e5   : > { %v6651_v3 = vpop.f32.mrb[8].mxu0 }
 0x1e6   : > { %v2181_v29 = vadd.f32 %v6651_v3, %v8476_v55  ;;  %v2172_v33 = vpop.f32.mrb[9].mxu0 }
 0x1e7   : > { %v2173_v47 = vadd.f32 %v8476_v55, %v2172_v33  ;;  %v6652_v2 = vpop.f32.mrb[10].mxu0 }
 0x1e8   : > { %v2229_v35 = vmax.f32 %v2181_v29, 0.0  ;;  %v2184_v61 = vadd.f32 %v6652_v2, %v8476_v55  ;;  %v2175_v25 = vpop.f32.mrb[11].mxu0 }
 0x1e9   : > { %v2176_v10 = vadd.f32 %v8476_v55, %v2175_v25  ;;  %v2227_v22 = vmax.f32 %v2173_v47, 0.0 }
 0x1ea   : > { %v6369_v32 = vpack.c.bf16 %v2229_v35, %v2229_v35  ;;  %v2230_v15 = vmax.f32 %v2184_v61, 0.0 }
 0x1eb   : > { %v2228_v57 = vmax.f32 %v2176_v10, 0.0 }
 0x1ec   : > { %2395 = vst [vmem:[#allocation2 + $0x6c] sm:$0xf] %v6369_v32  ;;  %v6370_v43 = vpack.c.bf16 %v2230_v15, %v2230_v15 }
 0x1ed   : > { %v6408_v42 = vpack.c.bf16 %v2228_v57, %v2227_v22 }
 0x1ee   : > { %2396 = vst [vmem:[#allocation2 + $0x70] sm:$0xf] %v6370_v43 }
 0x1ef   : > { %6462 = vst [vmem:[#allocation2 + $0x58] sm:$0xff] %v6408_v42  }
 0x20b   : > { %v6655_v49 = vpop.f32.mrb[12].mxu0 }
 0x20c   : > { %v2197_v21 = vadd.f32 %v6655_v49, %v8476_v55  ;;  %v2188_v5 = vpop.f32.mrb[13].mxu0 }
 0x20d   : > { %v2189_v52 = vadd.f32 %v8476_v55, %v2188_v5  ;;  %v6656_v53 = vpop.f32.mrb[14].mxu0 }
 0x20e   : > { %v2233_v38 = vmax.f32 %v2197_v21, 0.0  ;;  %v2200_v9 = vadd.f32 %v6656_v53, %v8476_v55  ;;  %v2191_v62 = vpop.f32.mrb[15].mxu0 }
 0x20f   : > { %v2192_v51 = vadd.f32 %v8476_v55, %v2191_v62  ;;  %v2231_v4 = vmax.f32 %v2189_v52, 0.0 }
 0x210   : > { %v6373_v28 = vpack.c.bf16 %v2233_v38, %v2233_v38  ;;  %v2234_v63 = vmax.f32 %v2200_v9, 0.0 }
 0x211   : > { %v2232_v1 = vmax.f32 %v2192_v51, 0.0 }
 0x212   : > { %2399 = vst [vmem:[#allocation2 + $0x94] sm:$0xf] %v6373_v28  ;;  %v6374_v58 = vpack.c.bf16 %v2234_v63, %v2234_v63 }
 0x213   : > { %v6413_v54 = vpack.c.bf16 %v2232_v1, %v2231_v4 }
 0x214   : > { %2400 = vst [vmem:[#allocation2 + $0x98] sm:$0xf] %v6374_v58 }
 0x215   : > { %6463 = vst [vmem:[#allocation2 + $0x80] sm:$0xff] %v6413_v54  }
 0x230   : > { %v6659_v6 = vpop.f32.mrb[16].mxu0 }
 0x231   : > { %v2213_v44 = vadd.f32 %v6659_v6, %v8476_v55  ;;  %v2204_v8 = vpop.f32.mrb[17].mxu0 }
 0x232   : > { %v2205_v41 = vadd.f32 %v8476_v55, %v2204_v8  ;;  %v6660_v12 = vpop.f32.mrb[18].mxu0 }
 0x233   : > { %v2237_v19 = vmax.f32 %v2213_v44, 0.0  ;;  %v2216_v56 = vadd.f32 %v6660_v12, %v8476_v55  ;;  %v2207_v14 = vpop.f32.mrb[19].mxu0 }
 0x234   : > { %v2208_v16 = vadd.f32 %v8476_v55, %v2207_v14  ;;  %v2235_v0 = vmax.f32 %v2205_v41, 0.0  ;;  %2408 = sbr.rel (%p6038_p0) target bundleno = 571 (0x23b), region = 44 }
 0x235   : > { %v6377_v18 = vpack.c.bf16 %v2237_v19, %v2237_v19  ;;  %v2238_v17 = vmax.f32 %v2216_v56, 0.0 }
 0x236   : > { %v2236_v50 = vmax.f32 %v2208_v16, 0.0 }
 0x237   : > { %2403 = vst [vmem:[#allocation2 + $0xbc] sm:$0xf] %v6377_v18  ;;  %v6378_v11 = vpack.c.bf16 %v2238_v17, %v2238_v17 }
 0x238   : > { %v6418_v7 = vpack.c.bf16 %v2236_v50, %v2235_v0 }
 0x239   : > { %2404 = vst [vmem:[#allocation2 + $0xc0] sm:$0xf] %v6378_v11 }
 0x23a   : > { %6464 = vst [vmem:[#allocation2 + $0xa8] sm:$0xff] %v6418_v7  }
 0x23b PF: > { %p6039_p1 = scmp.ne.s32.totalorder %s7387_s21, 1 }
 0x23c   : > { %v7414_v55 = vmov (!%p6039_p1), 0  }
 0x23d   : > { %2414 = sbr.rel (%p6039_p1) target bundleno = 580 (0x244), region = 48  ;;  %2416 = vst [vmem:[#allocation2 + $0xbc] sm:$0xf] (!%p6039_p1), %v7414_v55  ;;  %2417 = vst [vmem:[#allocation2 + $0xc0] sm:$0xf] (!%p6039_p1), %v7414_v55 }
 0x244 PF: > { %v7213_v45 = vld [vmem:[%s9593_s3 + $0x40] sm:$0xff]   ;;  %v7215_v40 = vld [vmem:[%s9593_s3 + $0x48] sm:$0xff]   ;;  %v7217_v23 = vld [vmem:[%s9593_s3 + $0x50] sm:$0xff]   ;;  %vm2442_vm7 = vsmask.f32 4368  ;;  %s6354_s12 = sshll.u32 %s7387_s21, 4 }
 0x245   : > { %v7214_v27 = vld [vmem:[%s9593_s3 + $0x100] sm:$0xff]   ;;  %6661 = vmatprep.subr.bf16.mxu0 %v7213_v45  ;;  %v7216_v34 = vld [vmem:[%s9593_s3 + $0x108] sm:$0xff]   ;;  %v7218_v30 = vld [vmem:[%s9593_s3 + $0x110] sm:$0xff]   ;;  %s6355_s13 = sshll.u32 %s7391_s22, 5  ;;  %s5710_s22 = sshll.u32 %s8549_s9, 4  ;;  %s9530_s22 = int_to_ptr.vmem [resolvable:$true] %s5710_s22 }
 0x246   : > { %6789 = vmatprep.subr.bf16.mxu1 %v7214_v27  ;;  %6662 = vmatpush3.bf16.msra.mxu0 %v7213_v45  ;;  %v7219_v24 = vld [vmem:[%s9593_s3 + $0x58] sm:$0xff]   ;;  %v7221_v46 = vld [vmem:[%s9593_s3 + $0x60] sm:$0xff]   ;;  %v7223_v59 = vld [vmem:[%s9593_s3 + $0x68] sm:$0xff]   ;;  %s5707_s30 = sadd.s32 %s6355_s13, %s6354_s12  ;;  %s9673_s16 = sand.u32 1, %s7379_s19  }
 0x247   : > { %6790 = vmatpush3.bf16.msra.mxu1 %v7214_v27  ;;  %6663 = vmatprep.subr.bf16.mxu0 %v7215_v40  ;;  %v7220_v13 = vld [vmem:[%s9593_s3 + $0x118] sm:$0xff]   ;;  %v7222_v37 = vld [vmem:[%s9593_s3 + $0x120] sm:$0xff]   ;;  %v8586_v48 = vld [vmem:[#allocation2 + $0x8] sm:$0xf]  ;;  %s6356_s21 = sshll.u32 %s5707_s30, 6  ;;  %s9536_s26 = scalar_lea.sflag [#allocation4], %s9673_s16 }
 0x248   : > { %6791 = vmatprep.subr.bf16.mxu1 %v7216_v34  ;;  %v8588_v26 = vld [vmem:[#allocation2 + $0xc] sm:$0xf]  ;;  %v8590_v31 = vld [vmem:[#allocation2 + $0x1c] sm:$0xf]  ;;  %v2450_v36 = vshrl.u32 %v8586_v48, 16  ;;  %v7225_v47 = vld [vmem:[%s9593_s3 + $0x70] sm:$0xff]   ;;  %s9528_s15 = scalar_lea.hbm %s9595_s5, %s6356_s21 }
 0x249   : > { %v7224_v20 = vld [vmem:[%s9593_s3 + $0x128] sm:$0xff]   ;;  %v2459_v3 = vshrl.u32 %v8588_v26, 16  ;;  %v8597_v29 = vld [vmem:[#allocation2 + $0x20] sm:$0xf]  ;;  %v6064_v33 = vcombine.low %v8586_v48, %v8588_v26  ;;  %v3480_v2 = vshrl.u32 %v8590_v31, 16  ;;  %v7226_v25 = vld [vmem:[%s9593_s3 + $0x130] sm:$0xff]  }
 0x24a   : > { %6664 = vmatpush3.bf16.msra.mxu0 %v7215_v40  ;;  %v6184_v35 = vcombine.low %v8590_v31, %v8597_v29  ;;  %v8607_v61 = vld [vmem:[#allocation2 + $0x1c] sm:$0xf]  ;;  %v8612_v10 = vrot.slane %v2450_v36, 7  ;;  %v3489_v32 = vshrl.u32 %v8597_v29, 16  ;;  %v2453_v22 = vshll.u32 %v8586_v48, 16  ;;  %v7232_v58 = vld [vmem:[%s9593_s3] sm:$0xff]   ;;  %vm8952_vm8 = vmor %vm2273_vm4, %vm2442_vm7 }
 0x24b   : > { %6792 = vmatpush3.bf16.msra.mxu1 %v7216_v34  ;;  %6665 = vmatprep.subr.bf16.mxu0 %v7217_v23  ;;  %v2472_v15 = vshrl.u32 %v8607_v61, 16  ;;  %v8617_v57 = vrot.slane %v2459_v3, 7  ;;  %v2462_v43 = vshll.u32 %v8588_v26, 16  ;;  %v3483_v42 = vshll.u32 %v8590_v31, 16  ;;  %v7227_v49 = vld [vmem:[%s9593_s3 + $0x78] sm:$0xff]   ;;  %v7234_v19 = vld [vmem:[%s9593_s3 + $0x140] sm:$0xff]  }
 0x24c   : > { %6793 = vmatprep.subr.bf16.mxu1 %v7218_v30  ;;  %6677 = vmatprep.mubr.bf16.mxu0 %v6064_v33  ;;  %v8624_v21 = vld [vmem:[#allocation2 + $0x20] sm:$0xf]  ;;  %v8626_v5 = vld [vmem:[#allocation2 + $0x30] sm:$0xf]  ;;  %v7228_v52 = vld [vmem:[%s9593_s3 + $0x138] sm:$0xff]   ;;  %v8631_v53 = vrot.slane %v3480_v2, 7 }
 0x24d   : > { %6805 = vmatprep.mubr.bf16.mxu1 %v6184_v35  ;;  %v3492_v38 = vshll.u32 %v8597_v29, 16  ;;  %v2481_v9 = vshrl.u32 %v8624_v21, 16  ;;  %v3502_v62 = vshrl.u32 %v8626_v5, 16  ;;  %v8637_v28 = vrot.slane %v3489_v32, 7  ;;  %v8642_v1 = vld [vmem:[#allocation2 + $0x34] sm:$0xf] }
 0x24e   : > { %6666 = vmatpush3.bf16.msra.mxu0 %v7217_v23  ;;  %v8639_v63 = vrot.slane %v2472_v15, 7  ;;  %v2475_v4 = vshll.u32 %v8607_v61, 16  ;;  %v3511_v6 = vshrl.u32 %v8642_v1, 16  ;;  %v8650_v44 = vld [vmem:[#allocation2 + $0x30] sm:$0xf]  ;;  %v2484_v12 = vshll.u32 %v8624_v21, 16 }
 0x24f   : > { %6794 = vmatpush3.bf16.msra.mxu1 %v7218_v30  ;;  %6667 = vmatprep.subr.bf16.mxu0 %v7219_v24  ;;  %v8647_v54 = vrot.slane %v3502_v62, 7  ;;  %v8653_v41 = vrot.slane %v2481_v9, 7  ;;  %v8659_v56 = vld [vmem:[#allocation2 + $0x34] sm:$0xf]  ;;  %v2494_v14 = vshrl.u32 %v8650_v44, 16  ;;  %v6065_v18 = vcombine.low %v8607_v61, %v8624_v21  ;;  %v7235_v34 = vld [vmem:[%s9593_s3 + $0x8] sm:$0xff]  }
 0x250   : > { %6795 = vmatprep.subr.bf16.mxu1 %v7220_v13  ;;  %v2503_v17 = vshrl.u32 %v8659_v56, 16  ;;  %v8666_v0 = vld [vmem:[#allocation2 + $0x44] sm:$0xf]  ;;  %v8668_v50 = vld [vmem:[#allocation2 + $0x48] sm:$0xf]  ;;  %v3505_v11 = vshll.u32 %v8626_v5, 16 }
 0x251   : > { %v3514_v7 = vshll.u32 %v8642_v1, 16  ;;  %v3524_v60 = vshrl.u32 %v8666_v0, 16  ;;  %v3533_v55 = vshrl.u32 %v8668_v50, 16  ;;  %v8674_v45 = vld [vmem:[#allocation2 + $0x44] sm:$0xf]  ;;  %v8677_v40 = vrot.slane %v3511_v6, 7 }
 0x252   : > { %6668 = vmatpush3.bf16.msra.mxu0 %v7219_v24  ;;  %v2516_v30 = vshrl.u32 %v8674_v45, 16  ;;  %v6185_v24 = vcombine.low %v8626_v5, %v8642_v1  ;;  %v8696_v36 = vrot.slane %v2503_v17, 7  ;;  %v8708_v15 = vld [vmem:[#allocation2 + $0x58] sm:$0xf]  ;;  %v8715_v9 = vld [vmem:[#allocation2 + $0x5c] sm:$0xf]  ;;  %v8815_v31 = vor.u32 %v2484_v12, %v8653_v41 }
 0x253   : > { %6796 = vmatpush3.bf16.msra.mxu1 %v7220_v13  ;;  %6669 = vmatprep.subr.bf16.mxu0 %v7221_v46  ;;  %v7236_v13 = vld [vmem:[%s9593_s3 + $0x148] sm:$0xff]   ;;  %v8701_v2 = vrot.slane %v3524_v60, 7  ;;  %v8703_v35 = vrot.slane %v3533_v55, 7  ;;  %v3546_v6 = vshrl.u32 %v8708_v15, 16  ;;  %v3555_v17 = vshrl.u32 %v8715_v9, 16  ;;  %v7256_v32 = vld [vmem:[%s9593_s3 + $0x30] sm:$0xff]  }
 0x254   : > { %6797 = vmatprep.subr.bf16.mxu1 %v7222_v37  ;;  %v8727_v55 = vld [vmem:[#allocation2 + $0x58] sm:$0xf]  ;;  %v8740_v60 = vld [vmem:[#allocation2 + $0x6c] sm:$0xf]  ;;  %v6187_v48 = vcombine.low %v8708_v15, %v8715_v9  ;;  %v8779_v23 = vld [vmem:[#allocation2 + $0x70] sm:$0xf]  ;;  %v8820_v29 = vor.u32 %v3505_v11, %v8647_v54 }
 0x255   : > { %9620 = vst [vmem:[#allocation6_spill] sm:$0xff] %v8740_v60  ;;  %v8744_v27 = vrot.slane %v3546_v6, 7  ;;  %v8753_v16 = vrot.slane %v3555_v17, 7  ;;  %v8762_v3 = vld [vmem:[#allocation2 + $0x6c] sm:$0xf]  ;;  %v8773_v6 = vor.u32 %v2462_v43, %v8617_v57  ;;  %v2569_v26 = vshrl.u32 %v8779_v23, 16 }
 0x256   : > { %6670 = vmatpush3.bf16.msra.mxu0 %v7221_v46  ;;  %v8689_v46 = vrot.slane %v2494_v14, 7  ;;  %v7242_v14 = vld [vmem:[%s9593_s3 + $0x150] sm:$0xff]   ;;  %v7248_v43 = vld [vmem:[%s9593_s3 + $0x20] sm:$0xff]   ;;  %v9625_v11 = vshll.u32 %v8650_v44, 16  ;;  %s7309_s27 = scalar_lea.vmem %s9530_s22, 1024  ;;  %s7415_s17 = smov [#allocation3]  }
 0x257   : > { %6798 = vmatpush3.bf16.msra.mxu1 %v7222_v37  ;;  %6671 = vmatprep.subr.bf16.mxu0 %v7223_v59  ;;  %v8810_v17 = vld [vmem:[#allocation2 + $0x84] sm:$0xf]  ;;  %v8839_v12 = vld [vmem:[#allocation2 + $0x80] sm:$0xf]  ;;  %p7310_p2 = scmp.ne.s32.totalorder %s9530_s22, %s7309_s27  ;;  %s7313_s12 = sshll.u32 %s7415_s17, 4  ;;  %s7314_s12 = int_to_ptr.vmem [resolvable:$false] %s7313_s12 }
 0x258   : > { %6799 = vmatprep.subr.bf16.mxu1 %v7224_v20  ;;  %9624 = vst [vmem:[#allocation10_spill] sm:$0xff] %v8810_v17  ;;  %v8841_v1 = vld [vmem:[#allocation2 + $0x84] sm:$0xf]  ;;  %v2582_v5 = vshrl.u32 %v8839_v12, 16  ;;  %s7315_s13 = scalar_lea.vmem %s7314_s12, 2048  ;;  %p7316_p6 = scmp.lt.s32.totalorder %s9530_s22, %s7314_s12 }
 0x259   : > { %p7311_p4 = pnand %p7310_p2, %p7498_p3  ;;  %p7317_p7 = scmp.lt.s32.totalorder %s7315_s13, %s7309_s27 }
 0x25a   : > { %6672 = vmatpush3.bf16.msra.mxu0 %v7223_v59  ;;  %v6066_v59 = vcombine.low %v8650_v44, %v8659_v56  ;;  %v2591_v44 = vshrl.u32 %v8841_v1, 16 }
 0x25b   : > { %6800 = vmatpush3.bf16.msra.mxu1 %v7224_v20  ;;  %6673 = vmatprep.subr.bf16.mxu0 %v7225_v47  ;;  %v8694_v20 = vld [vmem:[#allocation2 + $0x48] sm:$0xf]  ;;  %p7312_p5 = pneg %p7311_p4  ;;  %p7318_p9 = por %p7317_p7, %p7316_p6 }
 0x25c   : > { %6801 = vmatprep.subr.bf16.mxu1 %v7226_v25 }
 0x25d   : > { %p7319_p10 = pnand %p7318_p9, %p7312_p5 }
 0x25e   : > { %6674 = vmatpush3.bf16.msra.mxu0 %v7225_v47  ;;  %v2525_v47 = vshrl.u32 %v8694_v20, 16 }
 0x25f   : > { %6802 = vmatpush3.bf16.msra.mxu1 %v7226_v25  ;;  %6675 = vmatprep.subr.bf16.mxu0 %v7227_v49  ;;  %v8705_v25 = vrot.slane %v2516_v30, 7  ;;  %v8729_v30 = vld [vmem:[#allocation2 + $0x5c] sm:$0xf] }
 0x260   : > { %6803 = vmatprep.subr.bf16.mxu1 %v7228_v52  ;;  %v6068_v33 = vcombine.low %v8727_v55, %v8729_v30 }
 0x262   : > { %6676 = vmatpush3.bf16.msra.mxu0 %v7227_v49  ;;  %v6186_v49 = vcombine.low %v8666_v0, %v8668_v50 }
 0x263   : > { %6804 = vmatpush3.bf16.msra.mxu1 %v7228_v52  ;;  %6693 = vmatprep.subr.bf16.mxu0 %v7232_v58  ;;  %v7240_v52 = vld [vmem:[%s9593_s3 + $0x10] sm:$0xff]  }
 0x264   : > { %6821 = vmatprep.subr.bf16.mxu1 %v7234_v19 }
 0x265   : > { %6678 = vmatmul.mubr.bf16.vlgmr.msra.gmra.mrb[20].mxu0 %v6065_v18  ;;  %v8722_v18 = vrot.slane %v2525_v47, 7  ;;  %v2538_v47 = vshrl.u32 %v8727_v55, 16 }
 0x266   : > { %6806 = vmatmul.mubr.bf16.vlgmr.msra.gmra.mrb[0].mxu1 %v6185_v24  ;;  %6694 = vmatpush3.bf16.msra.mxu0 %v7232_v58  ;;  %v8734_v24 = vor.u32 %v2453_v22, %v8612_v10  ;;  %v8742_v58 = vld [vmem:[#allocation2 + $0x70] sm:$0xf]  ;;  %v7243_v22 = vld [vmem:[%s9593_s3 + $0x18] sm:$0xff]  }
 0x267   : > { %6822 = vmatpush3.bf16.msra.mxu1 %v7234_v19  ;;  %6695 = vmatprep.subr.bf16.mxu0 %v7235_v34  ;;  %v6067_v19 = vcombine.low %v8674_v45, %v8694_v20  ;;  %9621 = vst [vmem:[#allocation7_spill] sm:$0xff] %v8742_v58  ;;  %v3577_v8 = vshrl.u32 %v8742_v58, 16  ;;  %v8764_v62 = vrot.slane %v2538_v47, 7  ;;  %v6188_v37 = vcombine.low %v8740_v60, %v8742_v58 }
 0x268   : > { %6823 = vmatprep.subr.bf16.mxu1 %v7236_v13  ;;  %6681 = vmatprep.mubr.bf16.mxu0 %v6066_v59  ;;  %v2547_v59 = vshrl.u32 %v8729_v30, 16  ;;  %v2560_v47 = vshrl.u32 %v8762_v3, 16 }
 0x269   : > { %6809 = vmatprep.mubr.bf16.mxu1 %v6186_v49  ;;  %v3568_v49 = vshrl.u32 %v8740_v60, 16  ;;  %v8901_v60 = vld [vmem:[#allocation2 + $0xac] sm:$0xf] }
 0x26a   : > { %6696 = vmatpush3.bf16.msra.mxu0 %v7235_v34  ;;  %v7244_v34 = vld [vmem:[%s9593_s3 + $0x158] sm:$0xff]   ;;  %v8829_v21 = vrot.slane %v2560_v47, 7  ;;  %v2440_v47 = vld [vmem:[#allocation2 + $0x94] sm:$0xf] }
 0x26b   : > { %6824 = vmatpush3.bf16.msra.mxu1 %v7236_v13  ;;  %6697 = vmatprep.subr.bf16.mxu0 %v7240_v52  ;;  %v8766_v13 = vrot.slane %v2547_v59, 7  ;;  %v8775_v51 = vrot.slane %v3568_v49, 7  ;;  %v8782_v59 = vrot.slane %v3577_v8, 7  ;;  %v8801_v8 = vor.u32 %v3492_v38, %v8637_v28  ;;  %v8808_v49 = vld [vmem:[#allocation2 + $0x80] sm:$0xf] }
 0x26c   : > { %6825 = vmatprep.subr.bf16.mxu1 %v7242_v14  ;;  %9623 = vst [vmem:[#allocation9_spill] sm:$0xff] %v8808_v49  ;;  %v3590_v61 = vshrl.u32 %v8808_v49, 16  ;;  %v8827_v38 = vor.u32 %v3514_v7, %v8677_v40  ;;  %v6069_v28 = vcombine.low %v8762_v3, %v8779_v23  ;;  %v6189_v41 = vcombine.low %v8808_v49, %v8810_v17  ;;  %v7259_v49 = vld [vmem:[%s9593_s3 + $0x38] sm:$0xff]  }
 0x26d   : > { %6682 = vmatmul.mubr.bf16.gmra.mrb[24].mxu0 %v6067_v19  ;;  %9622 = vst [vmem:[#allocation8_spill] sm:$0xff] %v8782_v59  ;;  %v7250_v19 = vld [vmem:[%s9593_s3 + $0x160] sm:$0xff]   ;;  %v8846_v7 = vor.u32 %v9625_v11, %v8689_v46  ;;  %v9626_v40 = vshll.u32 %v8659_v56, 16  ;;  %v8861_v11 = vld [vmem:[#allocation2 + $0x94] sm:$0xf]  ;;  %v2607_v58 = vshll.u32 %v2440_v47, 16 }
 0x26e   : > { %6810 = vmatmul.mubr.bf16.gmra.mrb[4].mxu1 %v6187_v48  ;;  %6698 = vmatpush3.bf16.msra.mxu0 %v7240_v52  ;;  %v8796_v52 = vor.u32 %v3483_v42, %v8631_v53  ;;  %v8806_v48 = vor.u32 %v2475_v4, %v8639_v63  ;;  %v3599_v42 = vshrl.u32 %v8810_v17, 16  ;;  %v7251_v4 = vld [vmem:[%s9593_s3 + $0x28] sm:$0xff]   ;;  %9628 = vst [vmem:[#allocation11_spill] sm:$0xff] %v8861_v11  ;;  %v8863_v57 = vrot.slane %v3590_v61, 7 }
 0x26f   : > { %6826 = vmatpush3.bf16.msra.mxu1 %v7242_v14  ;;  %6699 = vmatprep.subr.bf16.mxu0 %v7243_v22  ;;  %v2585_v61 = vshll.u32 %v8839_v12, 16  ;;  %v8899_v59 = vld [vmem:[#allocation2 + $0xa8] sm:$0xf] }
 0x270   : > { %6827 = vmatprep.subr.bf16.mxu1 %v7244_v34  ;;  %6685 = vmatprep.mubr.bf16.mxu0 %v6068_v33  ;;  %v9627_v33 = vshll.u32 %v8674_v45, 16  ;;  %9629 = vst [vmem:[#allocation12_spill] sm:$0xff] %v8863_v57  ;;  %v8865_v56 = vrot.slane %v3599_v42, 7  ;;  %v7252_v45 = vld [vmem:[%s9593_s3 + $0x168] sm:$0xff]   ;;  %v2594_v42 = vshll.u32 %v8841_v1, 16  ;;  %9634 = vst [vmem:[#allocation16_spill] sm:$0xff] %v8899_v59 }
 0x271   : > { %6813 = vmatprep.mubr.bf16.mxu1 %v6188_v37  ;;  %v8851_v37 = vor.u32 %v9626_v40, %v8696_v36  ;;  %v6070_v36 = vcombine.low %v8839_v12, %v8841_v1  ;;  %v8875_v40 = vrot.slane %v2582_v5, 7  ;;  %v2441_v5 = vld [vmem:[#allocation2 + $0x98] sm:$0xf]  ;;  %v7258_v12 = vld [vmem:[%s9593_s3 + $0x170] sm:$0xff]   ;;  %v9632_v1 = vshll.u32 %v8694_v20, 16 }
 0x272   : > { %6700 = vmatpush3.bf16.msra.mxu0 %v7243_v22  ;;  %v8856_v14 = vor.u32 %v9627_v33, %v8705_v25  ;;  %v2571_v22 = vrot.slane %v2569_v26, 7  ;;  %9630 = vst [vmem:[#allocation13_spill] sm:$0xff] %v8865_v56  ;;  %v3612_v26 = vshrl.u32 %v8861_v11, 16  ;;  %v2604_v56 = vshrl.u32 %v2440_v47, 16 }
 0x273   : > { %6828 = vmatpush3.bf16.msra.mxu1 %v7244_v34  ;;  %6701 = vmatprep.subr.bf16.mxu0 %v7248_v43  ;;  %v8872_v34 = vld [vmem:[#allocation2 + $0x98] sm:$0xf]  ;;  %v8892_v33 = vor.u32 %v9632_v1, %v8722_v18  ;;  %v2613_v57 = vshrl.u32 %v2441_v5, 16  ;;  %v9635_v20 = vshll.u32 %v8727_v55, 16  ;;  %v3634_v1 = vshrl.u32 %v8899_v59, 16 }
 0x274   : > { %6829 = vmatprep.subr.bf16.mxu1 %v7250_v19  ;;  %9631 = vst [vmem:[#allocation14_spill] sm:$0xff] %v8872_v34  ;;  %v3621_v17 = vshrl.u32 %v8872_v34, 16 }
 0x275   : > { %6686 = vmatmul.mubr.bf16.gmra.mrb[28].mxu0 %v6069_v28  ;;  %v6190_v28 = vcombine.low %v8861_v11, %v8872_v34  ;;  %v8897_v11 = vrot.slane %v2604_v56, 7  ;;  %v8906_v18 = vor.u32 %v9635_v20, %v8764_v62  ;;  %v6071_v56 = vcombine.low %v2440_v47, %v2441_v5 }
 0x276   : > { %6814 = vmatmul.mubr.bf16.gmra.mrb[8].mxu1 %v6189_v41  ;;  %6702 = vmatpush3.bf16.msra.mxu0 %v7248_v43  ;;  %v2593_v41 = vrot.slane %v2591_v44, 7  ;;  %v8894_v43 = vrot.slane %v3612_v26, 7  ;;  %v2615_v26 = vrot.slane %v2613_v57, 7  ;;  %v8917_v34 = vrot.slane %v3621_v17, 7 }
 0x277   : > { %6830 = vmatpush3.bf16.msra.mxu1 %v7250_v19  ;;  %6703 = vmatprep.subr.bf16.mxu0 %v7251_v4  ;;  %v9636_v19 = vshll.u32 %v8729_v30, 16  ;;  %v6191_v30 = vcombine.low %v8899_v59, %v8901_v60  ;;  %v9638_v57 = vshll.u32 %v8762_v3, 16  ;;  %v8937_v20 = vor.u32 %v2585_v61, %v8875_v40 }
 0x278   : > { %9633 = vst [vmem:[#allocation15_spill] sm:$0xff] %v8894_v43  ;;  %6831 = vmatprep.subr.bf16.mxu1 %v7252_v45  ;;  %6689 = vmatprep.mubr.bf16.mxu0 %v6070_v36  ;;  %v2616_v36 = vshll.u32 %v2441_v5, 16  ;;  %9637 = vst [vmem:[#allocation17_spill] sm:$0xff] %v8917_v34  ;;  %v8939_v55 = vor.u32 %v2594_v42, %v2593_v41  ;;  %v8942_v3 = vor.u32 %v2607_v58, %v8897_v11  ;;  %v4087_v42 = vld [vmem:[#allocation2 + $0x20] sm:$0xf] }
 0x279   : > { %v8911_v44 = vor.u32 %v9636_v19, %v8766_v13  ;;  %6817 = vmatprep.mubr.bf16.mxu1 %v6190_v28  ;;  %v7260_v13 = vld [vmem:[%s9593_s3 + $0x178] sm:$0xff]   ;;  %v8928_v47 = vor.u32 %v9638_v57, %v8829_v21  ;;  %v9639_v28 = vshll.u32 %v8779_v23, 16  ;;  %v2418_v19 = vld [vmem:[#allocation2 + $0x4] sm:$0x8]  ;;  %v8949_v23 = vrot.slane %v3634_v1, 7 }
 0x27a   : > { %6704 = vmatpush3.bf16.msra.mxu0 %v7251_v4  ;;  %v2445_v61 = vshrl.u32 %v2418_v19, 16  ;;  %v8959_v58 = vld [vmem:[%s9593_s3 + $0x80] sm:$0xff]   ;;  %v8961_v41 = vor.u32 %v2616_v36, %v2615_v26  ;;  %v4120_v19 = vshll.u32 %v4087_v42, 16  ;;  %v2501_v4 = vrot.slane %v8689_v46, 4 }
 0x27b   : > { %6832 = vmatpush3.bf16.msra.mxu1 %v7252_v45  ;;  %6705 = vmatprep.subr.bf16.mxu0 %v7256_v32  ;;  %v8934_v5 = vor.u32 %v9639_v28, %v2571_v22  ;;  %v9640_v45 = vshll.u32 %v8666_v0, 16  ;;  %9641 = vst [vmem:[#allocation18_spill] sm:$0xff] %v8949_v23  ;;  %v4086_v28 = vld [vmem:[#allocation2 + $0x1c] sm:$0xf]  ;;  %v9644_v0 = vshll.u32 %v8668_v50, 16  ;;  %v9645_v26 = vrot.slane %v8612_v10, 4 }
 0x27c   : > { %6833 = vmatprep.subr.bf16.mxu1 %v7258_v12  ;;  %v4088_v1 = vld [vmem:[#allocation2 + $0x24] sm:$0x1]  ;;  %v4114_v17 = vshll.u32 %v4086_v28, 16  ;;  %v6040_v59 = vrot.slane %v2445_v61, 11  ;;  %v4124_v50 = vshrl.u32 %v4087_v42, 16 }
 0x27d   : > { %v8947_v57 = vor.u32 %v9640_v45, %v8701_v2  ;;  %6690 = vmatmul.mubr.bf16.gmra.mrb[32].mxu0 %v6071_v56  ;;  %v8966_v56 = vor.u32 %v9644_v0, %v8703_v35  ;;  %v4111_v45 = vshrl.u32 %v4086_v28, 16  ;;  %v2465_v36 = vsel %vm8952_vm8, %v9645_v26, %v8773_v6  ;;  %v2421_v0 = vld [vmem:[#allocation2 + $0x18] sm:$0x8] }
 0x27e   : > { %6818 = vmatmul.mubr.bf16.gmra.mrb[12].mxu1 %v6191_v30  ;;  %6706 = vmatpush3.bf16.msra.mxu0 %v7256_v32  ;;  %v4130_v35 = vshll.u32 %v4088_v1, 16  ;;  %v8977_v32 = vld [vmem:[%s9593_s3 + $0x180] sm:$0xff]   ;;  %v4116_v46 = vrot.slane %v4114_v17, 5  ;;  %v2467_v28 = vshrl.u32 %v2421_v0, 16  ;;  %v2456_v10 = vsel %vm8952_vm8, %v6040_v59, %v8734_v24  ;;  %v4089_v1 = vld [vmem:[#allocation2 + $0x30] sm:$0xf] }
 0x27f   : > { %6834 = vmatpush3.bf16.msra.mxu1 %v7258_v12  ;;  %6707 = vmatprep.subr.bf16.mxu0 %v7259_v49  ;;  %v4113_v30 = vrot.slane %v4111_v45, 4  ;;  %v4122_v12 = vrot.slane %v4120_v19, 5  ;;  %v4126_v61 = vrot.slane %v4124_v50, 4  ;;  %v9646_v6 = vrot.slane %v8639_v63, 4  ;;  %v4090_v17 = vld [vmem:[#allocation2 + $0x34] sm:$0xf] }
 0x280   : > { %6835 = vmatprep.subr.bf16.mxu1 %v7260_v13  ;;  %v4132_v23 = vrot.slane %v4130_v35, 5  ;;  %v6080_v26 = vcombine.low %v2456_v10, %v2465_v36  ;;  %v6041_v45 = vrot.slane %v2467_v28, 11  ;;  %v4091_v19 = vld [vmem:[#allocation2 + $0x38] sm:$0x1]  ;;  %v4135_v0 = vshrl.u32 %v4089_v1, 16  ;;  %v7263_v28 = vld [vmem:[%s9593_s3 + $0x88] sm:$0xff]  }
 0x281   : > { %v2487_v42 = vsel %vm8952_vm8, %v9646_v6, %v8815_v31  ;;  %v4117_v34 = vor.u32 %v4116_v46, %v4113_v30  ;;  %v4127_v43 = vor.u32 %v4126_v61, %v4122_v12  ;;  %v4138_v24 = vshll.u32 %v4089_v1, 16  ;;  %v2424_v1 = vld [vmem:[#allocation2 + $0x2c] sm:$0x8] }
 0x282   : > { %6708 = vmatpush3.bf16.msra.mxu0 %v7259_v49  ;;  %v4144_v59 = vshll.u32 %v4090_v17, 16  ;;  %v4148_v50 = vshrl.u32 %v4090_v17, 16  ;;  %6709 = vmatprep.mubr.bf16.mxu0 %v6080_v26  ;;  %v2478_v31 = vsel %vm8952_vm8, %v6041_v45, %v8806_v48  ;;  %v4137_v49 = vrot.slane %v4135_v0, 4  ;;  %v7265_v45 = vld [vmem:[%s9593_s3 + $0x90] sm:$0xff]   ;;  %v4093_v0 = vld [vmem:[#allocation2 + $0x48] sm:$0xf] }
 0x283   : > { %6836 = vmatpush3.bf16.msra.mxu1 %v7260_v13  ;;  %6725 = vmatprep.subr.bf16.mxu0 %v8959_v58  ;;  %v4118_v63 = vrot.slane %v4117_v34, 4  ;;  %v4154_v36 = vshll.u32 %v4091_v19, 16  ;;  %v4128_v35 = vrot.slane %v4127_v43, 4  ;;  %v6081_v30 = vcombine.low %v2478_v31, %v2487_v42  ;;  %v2427_v31 = vld [vmem:[#allocation2 + $0x40] sm:$0x8] }
 0x284   : > { %6853 = vmatprep.subr.bf16.mxu1 %v8977_v32  ;;  %v4140_v46 = vrot.slane %v4138_v24, 5  ;;  %v4146_v13 = vrot.slane %v4144_v59, 5  ;;  %v4150_v34 = vrot.slane %v4148_v50, 4  ;;  %v9647_v48 = vrot.slane %v8631_v53, 4  ;;  %v4094_v24 = vld [vmem:[#allocation2 + $0x4c] sm:$0x1] }
 0x285   : > { %v4123_v10 = vsel %vm7616_vm5, %v4118_v63, %v4122_v12  ;;  %v4156_v61 = vrot.slane %v4154_v36, 5  ;;  %v4133_v43 = vsel %vm7616_vm5, %v4128_v35, %v4132_v23  ;;  %6710 = vmatmul.mubr.bf16.vlgmr.msra.gmra.mrb[20].mxu0 %v6081_v30  ;;  %v2509_v26 = vsel %vm8952_vm8, %v2501_v4, %v8851_v37  ;;  %v4092_v12 = vld [vmem:[#allocation2 + $0x44] sm:$0xf] }
 0x286   : > { %v9002_v6 = vsel %vm8952_vm8, %v9647_v48, %v8801_v8  ;;  %v4141_v42 = vor.u32 %v4140_v46, %v4137_v49  ;;  %v9648_v53 = vrot.slane %v8647_v54, 4  ;;  %v6216_v23 = vcombine.low %v4123_v10, %v4133_v43  ;;  %6726 = vmatpush3.bf16.msra.mxu0 %v8959_v58  ;;  %v7264_v58 = vld [vmem:[%s9593_s3 + $0x188] sm:$0xff]  }
 0x287   : > { %v4151_v17 = vor.u32 %v4150_v34, %v4146_v13  ;;  %v2489_v19 = vshrl.u32 %v2424_v1, 16  ;;  %v4159_v37 = vshrl.u32 %v4092_v12, 16  ;;  %6727 = vmatprep.subr.bf16.mxu0 %v7263_v28  ;;  %v4162_v59 = vshll.u32 %v4092_v12, 16  ;;  %v7267_v34 = vld [vmem:[%s9593_s3 + $0x98] sm:$0xff]  }
 0x288   : > { %v9017_v8 = vsel %vm8952_vm8, %v9648_v53, %v8827_v38  ;;  %v4142_v4 = vrot.slane %v4141_v42, 4  ;;  %v4168_v50 = vshll.u32 %v4093_v0, 16  ;;  %v4172_v63 = vshrl.u32 %v4093_v0, 16  ;;  %6837 = vmatprep.mubr.bf16.mxu1 %v6216_v23  ;;  %v4095_v1 = vld [vmem:[#allocation2 + $0x58] sm:$0xf] }
 0x289   : > { %v4152_v54 = vrot.slane %v4151_v17, 4  ;;  %v6042_v49 = vrot.slane %v2489_v19, 11  ;;  %v4161_v36 = vrot.slane %v4159_v37, 4  ;;  %v4178_v38 = vshll.u32 %v4094_v24, 16  ;;  %v4096_v12 = vld [vmem:[#allocation2 + $0x5c] sm:$0xf] }
 0x28a   : > { %v4147_v35 = vsel %vm7616_vm5, %v4142_v4, %v4146_v13  ;;  %v4164_v30 = vrot.slane %v4162_v59, 5  ;;  %v4170_v46 = vrot.slane %v4168_v50, 5  ;;  %v4174_v10 = vrot.slane %v4172_v63, 4  ;;  %6728 = vmatpush3.bf16.msra.mxu0 %v7263_v28  ;;  %v4097_v0 = vld [vmem:[#allocation2 + $0x60] sm:$0x1]  ;;  %v7266_v63 = vld [vmem:[%s9593_s3 + $0x190] sm:$0xff]  }
 0x28b   : > { %v4157_v48 = vsel %vm7616_vm5, %v4152_v54, %v4156_v61  ;;  %v2500_v43 = vsel %vm8952_vm8, %v6042_v49, %v8846_v7  ;;  %v4180_v13 = vrot.slane %v4178_v38, 5  ;;  %v2511_v42 = vshrl.u32 %v2427_v31, 16  ;;  %6729 = vmatprep.subr.bf16.mxu0 %v7265_v45 }
 0x28c   : > { %v6217_v53 = vcombine.low %v4147_v35, %v4157_v48  ;;  %v6082_v23 = vcombine.low %v2500_v43, %v2509_v26  ;;  %v4165_v17 = vor.u32 %v4164_v30, %v4161_v36  ;;  %v4175_v19 = vor.u32 %v4174_v10, %v4170_v46  ;;  %v2430_v35 = vld [vmem:[#allocation2 + $0x54] sm:$0x8]  ;;  %v4098_v30 = vld [vmem:[#allocation2 + $0x6c] sm:$0xf]  ;;  %v4099_v43 = vld [vmem:[#allocation2 + $0x70] sm:$0xf] }
 0x28d   : > { %v6043_v24 = vrot.slane %v2511_v42, 11  ;;  %v2523_v37 = vrot.slane %v8705_v25, 4  ;;  %v4183_v4 = vshrl.u32 %v4095_v1, 16  ;;  %v4186_v61 = vshll.u32 %v4095_v1, 16  ;;  %v4100_v42 = vld [vmem:[#allocation2 + $0x74] sm:$0x1] }
 0x28e   : > { %6838 = vmatmul.mubr.bf16.vlgmr.msra.gmra.mrb[0].mxu1 %v6217_v53  ;;  %6713 = vmatprep.mubr.bf16.mxu0 %v6082_v23  ;;  %v4166_v28 = vrot.slane %v4165_v17, 4  ;;  %v4176_v59 = vrot.slane %v4175_v19, 4  ;;  %v4192_v7 = vshll.u32 %v4096_v12, 16  ;;  %v4196_v50 = vshrl.u32 %v4096_v12, 16  ;;  %v2433_v53 = vld [vmem:[#allocation2 + $0x68] sm:$0x8] }
 0x28f   : > { %6854 = vmatpush3.bf16.msra.mxu1 %v8977_v32  ;;  %v2522_v26 = vsel %vm8952_vm8, %v6043_v24, %v8856_v14  ;;  %v2531_v25 = vsel %vm8952_vm8, %v2523_v37, %v8892_v33  ;;  %v4185_v31 = vrot.slane %v4183_v4, 4  ;;  %v4188_v54 = vrot.slane %v4186_v61, 5  ;;  %6730 = vmatpush3.bf16.msra.mxu0 %v7265_v45  ;;  %v7269_v14 = vld [vmem:[%s9593_s3 + $0xa0] sm:$0xff]  }
 0x290   : > { %6855 = vmatprep.subr.bf16.mxu1 %v7264_v58  ;;  %v4171_v49 = vsel %vm7616_vm5, %v4166_v28, %v4170_v46  ;;  %v4181_v36 = vsel %vm7616_vm5, %v4176_v59, %v4180_v13  ;;  %v6083_v38 = vcombine.low %v2522_v26, %v2531_v25  ;;  %v4194_v32 = vrot.slane %v4192_v7, 5  ;;  %6731 = vmatprep.subr.bf16.mxu0 %v7267_v34 }
 0x291   : > { %v6218_v33 = vcombine.low %v4171_v49, %v4181_v36  ;;  %v4189_v10 = vor.u32 %v4188_v54, %v4185_v31  ;;  %v4198_v48 = vrot.slane %v4196_v50, 4  ;;  %v4202_v45 = vshll.u32 %v4097_v0, 16  ;;  %v7268_v0 = vld [vmem:[%s9593_s3 + $0x198] sm:$0xff]   ;;  %v7271_v50 = vld [vmem:[%s9593_s3 + $0xa8] sm:$0xff]   ;;  %v4101_v31 = vld [vmem:[#allocation2 + $0x80] sm:$0xf] }
 0x292   : > { %6714 = vmatmul.mubr.bf16.gmra.mrb[24].mxu0 %v6083_v38  ;;  %v2533_v46 = vshrl.u32 %v2430_v35, 16  ;;  %v2545_v1 = vrot.slane %v8764_v62, 4  ;;  %v4207_v13 = vshrl.u32 %v4098_v30, 16  ;;  %v4210_v12 = vshll.u32 %v4098_v30, 16  ;;  %v4102_v54 = vld [vmem:[#allocation2 + $0x84] sm:$0xf] }
 0x293   : > { %6856 = vmatpush3.bf16.msra.mxu1 %v7264_v58  ;;  %6841 = vmatprep.mubr.bf16.mxu1 %v6218_v33  ;;  %v4190_v23 = vrot.slane %v4189_v10, 4  ;;  %v4199_v17 = vor.u32 %v4198_v48, %v4194_v32  ;;  %v4204_v19 = vrot.slane %v4202_v45, 5  ;;  %v4216_v24 = vshll.u32 %v4099_v43, 16  ;;  %v7270_v49 = vld [vmem:[%s9593_s3 + $0x1a0] sm:$0xff]   ;;  %v4103_v30 = vld [vmem:[#allocation2 + $0x88] sm:$0x1] }
 0x294   : > { %6857 = vmatprep.subr.bf16.mxu1 %v7266_v63  ;;  %6732 = vmatpush3.bf16.msra.mxu0 %v7267_v34  ;;  %v6044_v37 = vrot.slane %v2533_v46, 11  ;;  %v2553_v62 = vsel %vm8952_vm8, %v2545_v1, %v8911_v44  ;;  %v4209_v4 = vrot.slane %v4207_v13, 4  ;;  %v4212_v61 = vrot.slane %v4210_v12, 5  ;;  %v7273_v45 = vld [vmem:[%s9593_s3 + $0xb0] sm:$0xff]   ;;  %v2436_v12 = vld [vmem:[#allocation2 + $0x7c] sm:$0x8] }
 0x295   : > { %v4195_v58 = vsel %vm7616_vm5, %v4190_v23, %v4194_v32  ;;  %v4200_v28 = vrot.slane %v4199_v17, 4  ;;  %v4218_v59 = vrot.slane %v4216_v24, 5  ;;  %v4220_v7 = vshrl.u32 %v4099_v43, 16  ;;  %6733 = vmatprep.subr.bf16.mxu0 %v7269_v14 }
 0x296   : > { %v2544_v34 = vsel %vm8952_vm8, %v6044_v37, %v8906_v18  ;;  %v4213_v26 = vor.u32 %v4212_v61, %v4209_v4  ;;  %v4226_v25 = vshll.u32 %v4100_v42, 16  ;;  %v2555_v44 = vshrl.u32 %v2433_v53, 16  ;;  %v7272_v4 = vld [vmem:[%s9593_s3 + $0x1a8] sm:$0xff]  }
 0x297   : > { %v4205_v36 = vsel %vm7616_vm5, %v4200_v28, %v4204_v19  ;;  %6858 = vmatpush3.bf16.msra.mxu1 %v7266_v63  ;;  %v6084_v38 = vcombine.low %v2544_v34, %v2553_v62  ;;  %v4222_v32 = vrot.slane %v4220_v7, 4  ;;  %v2567_v35 = vrot.slane %v8829_v21, 4  ;;  %v4106_v7 = vld [vmem:[#allocation2 + $0x9c] sm:$0x1] }
 0x298   : > { %v6219_v33 = vcombine.low %v4195_v58, %v4205_v36  ;;  %6859 = vmatprep.subr.bf16.mxu1 %v7268_v0  ;;  %v4214_v18 = vrot.slane %v4213_v26, 4  ;;  %v4228_v10 = vrot.slane %v4226_v25, 5  ;;  %v6045_v48 = vrot.slane %v2555_v44, 11  ;;  %6734 = vmatpush3.bf16.msra.mxu0 %v7269_v14 }
 0x299   : > { %6717 = vmatprep.mubr.bf16.mxu0 %v6084_v38  ;;  %v4223_v43 = vor.u32 %v4222_v32, %v4218_v59  ;;  %v2575_v63 = vsel %vm8952_vm8, %v2567_v35, %v8934_v5  ;;  %v4231_v42 = vshrl.u32 %v4101_v31, 16  ;;  %v4234_v46 = vshll.u32 %v4101_v31, 16  ;;  %6735 = vmatprep.subr.bf16.mxu0 %v7271_v50  ;;  %v4104_v5 = vld [vmem:[#allocation2 + $0x94] sm:$0xf]  ;;  %v2439_v32 = vld [vmem:[#allocation2 + $0x90] sm:$0x8] }
 0x29a   : > { %6842 = vmatmul.mubr.bf16.gmra.mrb[4].mxu1 %v6219_v33  ;;  %v4219_v21 = vsel %vm7616_vm5, %v4214_v18, %v4218_v59  ;;  %v2566_v14 = vsel %vm8952_vm8, %v6045_v48, %v8928_v47  ;;  %v4240_v1 = vshll.u32 %v4102_v54, 16  ;;  %v4244_v13 = vshrl.u32 %v4102_v54, 16  ;;  %v7275_v47 = vld [vmem:[%s9593_s3 + $0xb8] sm:$0xff]   ;;  %v4107_v18 = vld [vmem:[#allocation2 + $0xa8] sm:$0xf] }
 0x29b   : > { %6860 = vmatpush3.bf16.msra.mxu1 %v7268_v0  ;;  %v4224_v53 = vrot.slane %v4223_v43, 4  ;;  %v6085_v23 = vcombine.low %v2566_v14, %v2575_v63  ;;  %v4233_v17 = vrot.slane %v4231_v42, 4  ;;  %v4236_v19 = vrot.slane %v4234_v46, 5  ;;  %v4105_v59 = vld [vmem:[#allocation2 + $0x98] sm:$0xf]  ;;  %v9108_v14 = vld [vmem:[%s9593_s3 + $0xc0] sm:$0xff]  }
 0x29c   : > { %v4242_v24 = vrot.slane %v4240_v1, 5  ;;  %v4246_v37 = vrot.slane %v4244_v13, 4  ;;  %v4250_v62 = vshll.u32 %v4103_v30, 16  ;;  %6861 = vmatprep.subr.bf16.mxu1 %v7270_v49  ;;  %6736 = vmatpush3.bf16.msra.mxu0 %v7271_v50  ;;  %v2577_v61 = vshrl.u32 %v2436_v12, 16  ;;  %v4108_v63 = vld [vmem:[#allocation2 + $0xac] sm:$0xf] }
 0x29d   : > { %v4229_v0 = vsel %vm7616_vm5, %v4224_v53, %v4228_v10  ;;  %6718 = vmatmul.mubr.bf16.gmra.mrb[28].mxu0 %v6085_v23  ;;  %v4237_v58 = vor.u32 %v4236_v19, %v4233_v17  ;;  %v2589_v28 = vrot.slane %v8875_v40, 4  ;;  %v4255_v34 = vshrl.u32 %v4104_v5, 16  ;;  %6737 = vmatprep.subr.bf16.mxu0 %v7273_v45 }
 0x29e   : > { %v6220_v26 = vcombine.low %v4219_v21, %v4229_v0  ;;  %v4247_v25 = vor.u32 %v4246_v37, %v4242_v24  ;;  %v4252_v44 = vrot.slane %v4250_v62, 5  ;;  %v6046_v50 = vrot.slane %v2577_v61, 11 }
 0x29f   : > { %v4238_v31 = vrot.slane %v4237_v58, 4  ;;  %6862 = vmatpush3.bf16.msra.mxu1 %v7270_v49  ;;  %v2597_v54 = vsel %vm8952_vm8, %v2589_v28, %v8939_v55  ;;  %v4257_v36 = vrot.slane %v4255_v34, 4  ;;  %v4258_v38 = vshll.u32 %v4104_v5, 16  ;;  %v7274_v49 = vld [vmem:[%s9593_s3 + $0x1b0] sm:$0xff]  }
 0x2a0   : > { %6845 = vmatprep.mubr.bf16.mxu1 %v6220_v26  ;;  %v4248_v35 = vrot.slane %v4247_v25, 4  ;;  %6863 = vmatprep.subr.bf16.mxu1 %v7272_v4  ;;  %v2588_v40 = vsel %vm8952_vm8, %v6046_v50, %v8937_v20  ;;  %v4264_v30 = vshll.u32 %v4105_v59, 16  ;;  %v4268_v33 = vshrl.u32 %v4105_v59, 16  ;;  %v3023_v59 = vld [vmem:[#allocation2 + $0x8] sm:$0xf] }
 0x2a1   : > { %v4243_v55 = vsel %vm7616_vm5, %v4238_v31, %v4242_v24  ;;  %v6086_v10 = vcombine.low %v2588_v40, %v2597_v54  ;;  %v4260_v48 = vrot.slane %v4258_v38, 5  ;;  %v4274_v43 = vshll.u32 %v4106_v7, 16  ;;  %6738 = vmatpush3.bf16.msra.mxu0 %v7273_v45  ;;  %v4109_v45 = vld [vmem:[#allocation2 + $0xb0] sm:$0x1]  ;;  %v7276_v24 = vld [vmem:[%s9593_s3 + $0x1b8] sm:$0xff]   ;;  %v9128_v54 = vld [vmem:[%s9593_s3 + $0x1c0] sm:$0xff]  }
 0x2a2   : > { %v4253_v42 = vsel %vm7616_vm5, %v4248_v35, %v4252_v44  ;;  %v4266_v46 = vrot.slane %v4264_v30, 5  ;;  %v4270_v20 = vrot.slane %v4268_v33, 4  ;;  %v2599_v21 = vshrl.u32 %v2439_v32, 16  ;;  %6739 = vmatprep.subr.bf16.mxu0 %v7275_v47  ;;  %v4513_v40 = vld [vmem:[#allocation2 + $0x2c] sm:$0x8] }
 0x2a3   : > { %v6221_v1 = vcombine.low %v4243_v55, %v4253_v42  ;;  %6864 = vmatpush3.bf16.msra.mxu1 %v7272_v4  ;;  %6721 = vmatprep.mubr.bf16.mxu0 %v6086_v10  ;;  %v4261_v13 = vor.u32 %v4260_v48, %v4257_v36  ;;  %v4276_v12 = vrot.slane %v4274_v43, 5  ;;  %v2611_v53 = vrot.slane %v8897_v11, 4  ;;  %v9130_v30 = vld [vmem:[#allocation2 + $0x30] sm:$0xf]  ;;  %v9132_v10 = vld [vmem:[#allocation2 + $0x34] sm:$0xf] }
 0x2a4   : > { %v4271_v23 = vor.u32 %v4270_v20, %v4266_v46  ;;  %v6047_v17 = vrot.slane %v2599_v21, 11  ;;  %v4279_v19 = vshrl.u32 %v4107_v18, 16  ;;  %v4282_v5 = vshll.u32 %v4107_v18, 16  ;;  %6865 = vmatprep.subr.bf16.mxu1 %v7274_v49 }
 0x2a5   : > { %6846 = vmatmul.mubr.bf16.gmra.mrb[8].mxu1 %v6221_v1  ;;  %v4262_v37 = vrot.slane %v4261_v13, 4  ;;  %v2619_v62 = vsel %vm8952_vm8, %v2611_v53, %v8961_v41  ;;  %v4288_v4 = vshll.u32 %v4108_v63, 16  ;;  %v4292_v61 = vshrl.u32 %v4108_v63, 16  ;;  %6740 = vmatpush3.bf16.msra.mxu0 %v7275_v47  ;;  %v3024_v41 = vld [vmem:[#allocation2 + $0xc] sm:$0xf] }
 0x2a6   : > { %v4272_v11 = vrot.slane %v4271_v23, 4  ;;  %v2610_v0 = vsel %vm8952_vm8, %v6047_v17, %v8942_v3  ;;  %v4281_v58 = vrot.slane %v4279_v19, 4  ;;  %v4284_v28 = vrot.slane %v4282_v5, 5  ;;  %6757 = vmatprep.subr.bf16.mxu0 %v9108_v14  ;;  %v3025_v3 = vld [vmem:[#allocation2 + $0x10] sm:$0x1] }
 0x2a7   : > { %v4267_v7 = vsel %vm7616_vm5, %v4262_v37, %v4266_v46  ;;  %v6087_v34 = vcombine.low %v2610_v0, %v2619_v62  ;;  %v4290_v26 = vrot.slane %v4288_v4, 5  ;;  %v4294_v25 = vrot.slane %v4292_v61, 4  ;;  %6866 = vmatpush3.bf16.msra.mxu1 %v7274_v49  ;;  %v3026_v46 = vld [vmem:[#allocation2 + $0x1c] sm:$0xf]  ;;  %v3027_v37 = vld [vmem:[#allocation2 + $0x20] sm:$0xf] }
 0x2a8   : > { %v4277_v47 = vsel %vm7616_vm5, %v4272_v11, %v4276_v12  ;;  %v4285_v44 = vor.u32 %v4284_v28, %v4281_v58  ;;  %v4298_v50 = vshll.u32 %v4109_v45, 16  ;;  %6867 = vmatprep.subr.bf16.mxu1 %v7276_v24  ;;  %v3048_v31 = vshrl.u32 %v3023_v59, 16  ;;  %v3028_v62 = vld [vmem:[#allocation2 + $0x24] sm:$0x1]  ;;  %v4516_v58 = vld [vmem:[#allocation2 + $0x40] sm:$0x8] }
 0x2a9   : > { %v6222_v36 = vcombine.low %v4267_v7, %v4277_v47  ;;  %6722 = vmatmul.mubr.bf16.gmra.mrb[32].mxu0 %v6087_v34  ;;  %v4295_v38 = vor.u32 %v4294_v25, %v4290_v26  ;;  %v3051_v32 = vshll.u32 %v3023_v59, 16  ;;  %v3057_v35 = vshll.u32 %v3024_v41, 16  ;;  %v9143_v28 = vld [vmem:[#allocation2 + $0x44] sm:$0xf]  ;;  %v9145_v25 = vld [vmem:[#allocation2 + $0x48] sm:$0xf] }
 0x2aa   : > { %v4286_v33 = vrot.slane %v4285_v44, 4  ;;  %v4300_v18 = vrot.slane %v4298_v50, 5  ;;  %v3050_v49 = vrot.slane %v3048_v31, 4  ;;  %v3061_v55 = vshrl.u32 %v3024_v41, 16 }
 0x2ab   : > { %6849 = vmatprep.mubr.bf16.mxu1 %v6222_v36  ;;  %v4296_v48 = vrot.slane %v4295_v38, 4  ;;  %6868 = vmatpush3.bf16.msra.mxu1 %v7276_v24  ;;  %v3053_v43 = vrot.slane %v3051_v32, 5  ;;  %v3059_v63 = vrot.slane %v3057_v35, 5  ;;  %v3067_v42 = vshll.u32 %v3025_v3, 16 }
 0x2ac   : > { %v4291_v20 = vsel %vm7616_vm5, %v4286_v33, %v4290_v26  ;;  %v3063_v21 = vrot.slane %v3061_v55, 4  ;;  %v4538_v1 = vshrl.u32 %v4513_v40, 16  ;;  %v4543_v13 = vshrl.u32 %v9130_v30, 16  ;;  %6885 = vmatprep.subr.bf16.mxu1 %v9128_v54 }
 0x2ad   : > { %v4301_v12 = vsel %vm7616_vm5, %v4296_v48, %v4300_v18  ;;  %v3054_v53 = vor.u32 %v3053_v43, %v3050_v49  ;;  %v3069_v45 = vrot.slane %v3067_v42, 5  ;;  %v4546_v23 = vshll.u32 %v9130_v30, 16  ;;  %v3029_v43 = vld [vmem:[#allocation2 + $0x30] sm:$0xf] }
 0x2ae   : > { %v6223_v17 = vcombine.low %v4291_v20, %v4301_v12  ;;  %v3064_v19 = vor.u32 %v3063_v21, %v3059_v63  ;;  %v6232_v5 = vrot.slane %v4538_v1, 11  ;;  %v4545_v24 = vrot.slane %v4543_v13, 7  ;;  %v3030_v21 = vld [vmem:[#allocation2 + $0x34] sm:$0xf] }
 0x2af   : > { %v3055_v4 = vrot.slane %v3054_v53, 4  ;;  %v4552_v61 = vshrl.u32 %v9132_v10, 16  ;;  %v4555_v11 = vshll.u32 %v9132_v10, 16  ;;  %v3072_v0 = vshrl.u32 %v3026_v46, 16 }
 0x2b0   : > { %6850 = vmatmul.mubr.bf16.gmra.mrb[12].mxu1 %v6223_v17  ;;  %v3065_v59 = vrot.slane %v3064_v19, 4  ;;  %v4548_v7 = vor.u32 %v4546_v23, %v4545_v24  ;;  %v4550_v34 = vrot.slane %v4545_v24, 4  ;;  %v3075_v26 = vshll.u32 %v3026_v46, 16  ;;  %v3031_v19 = vld [vmem:[#allocation2 + $0x38] sm:$0x1] }
 0x2b1   : > { %v3060_v41 = vsel %vm7616_vm5, %v3055_v4, %v3059_v63  ;;  %v4554_v47 = vrot.slane %v4552_v61, 7  ;;  %v3074_v44 = vrot.slane %v3072_v0, 4  ;;  %v3081_v50 = vshll.u32 %v3027_v37, 16  ;;  %v4519_v61 = vld [vmem:[#allocation2 + $0x54] sm:$0x8] }
 0x2b2   : > { %v3070_v3 = vsel %vm7616_vm5, %v3065_v59, %v3069_v45  ;;  %v4549_v31 = vsel %vm8952_vm8, %v6232_v5, %v4548_v7  ;;  %v3077_v36 = vrot.slane %v3075_v26, 5  ;;  %v3085_v38 = vshrl.u32 %v3027_v37, 16  ;;  %v9161_v7 = vld [vmem:[#allocation2 + $0x58] sm:$0xf] }
 0x2b3   : > { %v6112_v32 = vcombine.low %v3060_v41, %v3070_v3  ;;  %v4557_v35 = vor.u32 %v4555_v11, %v4554_v47  ;;  %v3083_v40 = vrot.slane %v3081_v50, 5  ;;  %v3091_v33 = vshll.u32 %v3028_v62, 16 }
 0x2b4   : > { %v3078_v18 = vor.u32 %v3077_v36, %v3074_v44  ;;  %v3087_v49 = vrot.slane %v3085_v38, 4  ;;  %v4560_v55 = vshrl.u32 %v4516_v58, 16  ;;  %v4565_v48 = vshrl.u32 %v9143_v28, 16  ;;  %v7279_v36 = vld [vmem:[%s9593_s3 + $0xc8] sm:$0xff]  }
 0x2b5   : > { %6741 = vmatprep.mubr.bf16.mxu0 %v6112_v32  ;;  %v4558_v63 = vsel %vm8952_vm8, %v4550_v34, %v4557_v35  ;;  %v3093_v42 = vrot.slane %v3091_v33, 5  ;;  %v4568_v46 = vshll.u32 %v9143_v28, 16  ;;  %v4574_v20 = vshrl.u32 %v9145_v25, 16  ;;  %v9163_v34 = vld [vmem:[#allocation2 + $0x5c] sm:$0xf]  ;;  %v7280_v38 = vld [vmem:[%s9593_s3 + $0x1c8] sm:$0xff]  }
 0x2b6   : > { %v6256_v1 = vcombine.low %v4549_v31, %v4558_v63  ;;  %v3079_v13 = vrot.slane %v3078_v18, 4  ;;  %v3088_v12 = vor.u32 %v3087_v49, %v3083_v40  ;;  %v6233_v53 = vrot.slane %v4560_v55, 11  ;;  %v3032_v49 = vld [vmem:[#allocation2 + $0x44] sm:$0xf]  ;;  %v3033_v55 = vld [vmem:[#allocation2 + $0x48] sm:$0xf] }
 0x2b7   : > { %v4567_v45 = vrot.slane %v4565_v48, 7  ;;  %v4576_v23 = vrot.slane %v4574_v20, 7  ;;  %v4577_v17 = vshll.u32 %v9145_v25, 16  ;;  %v3096_v5 = vshrl.u32 %v3029_v43, 16 }
 0x2b8   : > { %6869 = vmatprep.mubr.bf16.mxu1 %v6256_v1  ;;  %v3084_v24 = vsel %vm7616_vm5, %v3079_v13, %v3083_v40  ;;  %v3089_v37 = vrot.slane %v3088_v12, 4  ;;  %v3099_v62 = vshll.u32 %v3029_v43, 16  ;;  %v3105_v4 = vshll.u32 %v3030_v21, 16  ;;  %v3034_v13 = vld [vmem:[#allocation2 + $0x4c] sm:$0x1]  ;;  %v7281_v12 = vld [vmem:[%s9593_s3 + $0xd0] sm:$0xff]  }
 0x2b9   : > { %v4570_v11 = vor.u32 %v4568_v46, %v4567_v45  ;;  %v4572_v0 = vrot.slane %v4567_v45, 4  ;;  %v4579_v58 = vor.u32 %v4577_v17, %v4576_v23  ;;  %v3098_v59 = vrot.slane %v3096_v5, 4 }
 0x2ba   : > { %v3094_v26 = vsel %vm7616_vm5, %v3089_v37, %v3093_v42  ;;  %v3101_v41 = vrot.slane %v3099_v62, 5  ;;  %v3107_v47 = vrot.slane %v3105_v4, 5  ;;  %v3109_v44 = vshrl.u32 %v3030_v21, 16  ;;  %v9188_v62 = vld [vmem:[#allocation2 + $0x6c] sm:$0xf]  ;;  %v7282_v4 = vld [vmem:[%s9593_s3 + $0x1d0] sm:$0xff]  }
 0x2bb   : > { %v6113_v50 = vcombine.low %v3084_v24, %v3094_v26  ;;  %v4571_v3 = vsel %vm8952_vm8, %v6233_v53, %v4570_v11  ;;  %v4580_v31 = vsel %vm8952_vm8, %v4572_v0, %v4579_v58  ;;  %v3115_v32 = vshll.u32 %v3031_v19, 16  ;;  %v4522_v19 = vld [vmem:[#allocation2 + $0x68] sm:$0x8] }
 0x2bc   : > { %v6257_v35 = vcombine.low %v4571_v3, %v4580_v31  ;;  %v3102_v40 = vor.u32 %v3101_v41, %v3098_v59  ;;  %v3111_v33 = vrot.slane %v3109_v44, 4  ;;  %v4582_v18 = vshrl.u32 %v4519_v61, 16 }
 0x2bd   : > { %6742 = vmatmul.mubr.bf16.vlgmr.msra.gmra.mrb[20].mxu0 %v6113_v50  ;;  %v3117_v48 = vrot.slane %v3115_v32, 5  ;;  %v4587_v43 = vshrl.u32 %v9161_v7, 16  ;;  %v4590_v63 = vshll.u32 %v9161_v7, 16  ;;  %v4596_v42 = vshrl.u32 %v9163_v34, 16 }
 0x2be   : > { %6870 = vmatmul.mubr.bf16.vlgmr.msra.gmra.mrb[0].mxu1 %v6257_v35  ;;  %6758 = vmatpush3.bf16.msra.mxu0 %v9108_v14  ;;  %v3103_v46 = vrot.slane %v3102_v40, 4  ;;  %v3112_v20 = vor.u32 %v3111_v33, %v3107_v47  ;;  %v6234_v21 = vrot.slane %v4582_v18, 11  ;;  %v4599_v1 = vshll.u32 %v9163_v34, 16  ;;  %v3035_v18 = vld [vmem:[#allocation2 + $0x58] sm:$0xf] }
 0x2bf   : > { %6886 = vmatpush3.bf16.msra.mxu1 %v9128_v54  ;;  %6759 = vmatprep.subr.bf16.mxu0 %v7279_v36  ;;  %v4589_v53 = vrot.slane %v4587_v43, 7  ;;  %v4598_v45 = vrot.slane %v4596_v42, 7  ;;  %v3120_v23 = vshrl.u32 %v3032_v49, 16  ;;  %v3123_v17 = vshll.u32 %v3032_v49, 16 }
 0x2c0   : > { %6887 = vmatprep.subr.bf16.mxu1 %v7280_v38  ;;  %v3108_v14 = vsel %vm7616_vm5, %v3103_v46, %v3107_v47  ;;  %v3113_v5 = vrot.slane %v3112_v20, 4  ;;  %v3129_v24 = vshll.u32 %v3033_v55, 16  ;;  %v3133_v37 = vshrl.u32 %v3033_v55, 16  ;;  %v9195_v47 = vld [vmem:[#allocation2 + $0x70] sm:$0xf] }
 0x2c1   : > { %v4592_v54 = vor.u32 %v4590_v63, %v4589_v53  ;;  %v4594_v61 = vrot.slane %v4589_v53, 4  ;;  %v4601_v11 = vor.u32 %v4599_v1, %v4598_v45  ;;  %v3122_v0 = vrot.slane %v3120_v23, 4  ;;  %v3036_v63 = vld [vmem:[#allocation2 + $0x5c] sm:$0xf]  ;;  %v3037_v1 = vld [vmem:[#allocation2 + $0x60] sm:$0x1] }
 0x2c2   : > { %6760 = vmatpush3.bf16.msra.mxu0 %v7279_v36  ;;  %v3118_v58 = vsel %vm7616_vm5, %v3113_v5, %v3117_v48  ;;  %v3125_v59 = vrot.slane %v3123_v17, 5  ;;  %v3131_v26 = vrot.slane %v3129_v24, 5  ;;  %v3135_v41 = vrot.slane %v3133_v37, 4  ;;  %v7283_v36 = vld [vmem:[%s9593_s3 + $0xd8] sm:$0xff]   ;;  %v7286_v53 = vld [vmem:[%s9593_s3 + $0x1e0] sm:$0xff]  }
 0x2c3   : > { %6888 = vmatpush3.bf16.msra.mxu1 %v7280_v38  ;;  %v6114_v44 = vcombine.low %v3108_v14, %v3118_v58  ;;  %v4593_v50 = vsel %vm8952_vm8, %v6234_v21, %v4592_v54  ;;  %v4602_v3 = vsel %vm8952_vm8, %v4594_v61, %v4601_v11  ;;  %v3139_v31 = vshll.u32 %v3034_v13, 16  ;;  %6761 = vmatprep.subr.bf16.mxu0 %v7281_v12  ;;  %v7284_v38 = vld [vmem:[%s9593_s3 + $0x1d8] sm:$0xff]   ;;  %v7285_v13 = vld [vmem:[%s9593_s3 + $0xe0] sm:$0xff]  }
 0x2c4   : > { %v6258_v32 = vcombine.low %v4593_v50, %v4602_v3  ;;  %v3126_v35 = vor.u32 %v3125_v59, %v3122_v0  ;;  %v3136_v40 = vor.u32 %v3135_v41, %v3131_v26  ;;  %v4604_v33 = vshrl.u32 %v4522_v19, 16  ;;  %6889 = vmatprep.subr.bf16.mxu1 %v7282_v4  ;;  %v4525_v14 = vld [vmem:[#allocation2 + $0x7c] sm:$0x8]  ;;  %v9221_v54 = vld [vmem:[#allocation2 + $0x80] sm:$0xf]  ;;  %v7287_v59 = vld [vmem:[%s9593_s3 + $0xe8] sm:$0xff]  }
 0x2c5   : > { %6745 = vmatprep.mubr.bf16.mxu0 %v6114_v44  ;;  %v3141_v49 = vrot.slane %v3139_v31, 5  ;;  %v4609_v55 = vshrl.u32 %v9188_v62, 16  ;;  %v4612_v48 = vshll.u32 %v9188_v62, 16  ;;  %v4618_v43 = vshrl.u32 %v9195_v47, 16  ;;  %v3038_v3 = vld [vmem:[#allocation2 + $0x6c] sm:$0xf] }
 0x2c6   : > { %6873 = vmatprep.mubr.bf16.mxu1 %v6258_v32  ;;  %v3127_v42 = vrot.slane %v3126_v35, 4  ;;  %v3137_v46 = vrot.slane %v3136_v40, 4  ;;  %v6235_v20 = vrot.slane %v4604_v33, 11  ;;  %v4621_v21 = vshll.u32 %v9195_v47, 16  ;;  %6762 = vmatpush3.bf16.msra.mxu0 %v7281_v12  ;;  %v3039_v33 = vld [vmem:[#allocation2 + $0x70] sm:$0xf] }
 0x2c7   : > { %v4611_v45 = vrot.slane %v4609_v55, 7  ;;  %v4620_v23 = vrot.slane %v4618_v43, 7  ;;  %6890 = vmatpush3.bf16.msra.mxu1 %v7282_v4  ;;  %6763 = vmatprep.subr.bf16.mxu0 %v7283_v36  ;;  %v3144_v17 = vshrl.u32 %v3035_v18, 16  ;;  %v3147_v19 = vshll.u32 %v3035_v18, 16  ;;  %v9223_v4 = vld [vmem:[#allocation2 + $0x84] sm:$0xf] }
 0x2c8   : > { %v3132_v5 = vsel %vm7616_vm5, %v3127_v42, %v3131_v26  ;;  %v3142_v12 = vsel %vm7616_vm5, %v3137_v46, %v3141_v49  ;;  %6891 = vmatprep.subr.bf16.mxu1 %v7284_v38  ;;  %v3153_v24 = vshll.u32 %v3036_v63, 16  ;;  %v3157_v37 = vshrl.u32 %v3036_v63, 16  ;;  %v3040_v46 = vld [vmem:[#allocation2 + $0x74] sm:$0x1] }
 0x2c9   : > { %v6115_v61 = vcombine.low %v3132_v5, %v3142_v12  ;;  %v4614_v11 = vor.u32 %v4612_v48, %v4611_v45  ;;  %v4616_v0 = vrot.slane %v4611_v45, 4  ;;  %v4623_v58 = vor.u32 %v4621_v21, %v4620_v23  ;;  %v7288_v48 = vld [vmem:[%s9593_s3 + $0x1e8] sm:$0xff]   ;;  %v7289_v23 = vld [vmem:[%s9593_s3 + $0xf0] sm:$0xff]  }
 0x2ca   : > { %6764 = vmatpush3.bf16.msra.mxu0 %v7283_v36  ;;  %v3146_v26 = vrot.slane %v3144_v17, 4  ;;  %v3149_v41 = vrot.slane %v3147_v19, 5  ;;  %v3155_v44 = vrot.slane %v3153_v24, 5  ;;  %v3159_v50 = vrot.slane %v3157_v37, 4 }
 0x2cb   : > { %6746 = vmatmul.mubr.bf16.gmra.mrb[24].mxu0 %v6115_v61  ;;  %v4615_v31 = vsel %vm8952_vm8, %v6235_v20, %v4614_v11  ;;  %v4624_v32 = vsel %vm8952_vm8, %v4616_v0, %v4623_v58  ;;  %6892 = vmatpush3.bf16.msra.mxu1 %v7284_v38  ;;  %v3163_v35 = vshll.u32 %v3037_v1, 16  ;;  %v4626_v40 = vshrl.u32 %v4525_v14, 16  ;;  %v4528_v11 = vld [vmem:[#allocation2 + $0x90] sm:$0x8] }
 0x2cc   : > { %v6259_v18 = vcombine.low %v4615_v31, %v4624_v32  ;;  %v3150_v49 = vor.u32 %v3149_v41, %v3146_v26  ;;  %v3160_v55 = vor.u32 %v3159_v50, %v3155_v44  ;;  %v4631_v36 = vshrl.u32 %v9221_v54, 16  ;;  %6765 = vmatprep.subr.bf16.mxu0 %v7285_v13  ;;  %6893 = vmatprep.subr.bf16.mxu1 %v7286_v53  ;;  %v7290_v0 = vld [vmem:[%s9593_s3 + $0x1f0] sm:$0xff]   ;;  %v9253_v32 = vld [vmem:[#allocation2 + $0x98] sm:$0xf] }
 0x2cd   : > { %v3165_v43 = vrot.slane %v3163_v35, 5  ;;  %v6236_v63 = vrot.slane %v4626_v40, 11  ;;  %v4634_v42 = vshll.u32 %v9221_v54, 16  ;;  %v4640_v38 = vshrl.u32 %v9223_v4, 16  ;;  %v7291_v35 = vld [vmem:[%s9593_s3 + $0xf8] sm:$0xff]  }
 0x2ce   : > { %6874 = vmatmul.mubr.bf16.gmra.mrb[4].mxu1 %v6259_v18  ;;  %v3151_v20 = vrot.slane %v3150_v49, 4  ;;  %v3161_v21 = vrot.slane %v3160_v55, 4  ;;  %v4633_v1 = vrot.slane %v4631_v36, 7  ;;  %v4643_v45 = vshll.u32 %v9223_v4, 16  ;;  %6766 = vmatpush3.bf16.msra.mxu0 %v7285_v13  ;;  %v9246_v13 = vld [vmem:[#allocation2 + $0x94] sm:$0xf] }
 0x2cf   : > { %v4642_v17 = vrot.slane %v4640_v38, 7  ;;  %v3168_v19 = vshrl.u32 %v3038_v3, 16  ;;  %v3171_v14 = vshll.u32 %v3038_v3, 16  ;;  %v3177_v5 = vshll.u32 %v3039_v33, 16  ;;  %6894 = vmatpush3.bf16.msra.mxu1 %v7286_v53  ;;  %6767 = vmatprep.subr.bf16.mxu0 %v7287_v59  ;;  %v3041_v36 = vld [vmem:[#allocation2 + $0x80] sm:$0xf] }
 0x2d0   : > { %v3156_v12 = vsel %vm7616_vm5, %v3151_v20, %v3155_v44  ;;  %v3166_v24 = vsel %vm7616_vm5, %v3161_v21, %v3165_v43  ;;  %v4636_v37 = vor.u32 %v4634_v42, %v4633_v1  ;;  %v4638_v61 = vrot.slane %v4633_v1, 4  ;;  %6895 = vmatprep.subr.bf16.mxu1 %v7288_v48  ;;  %v3042_v43 = vld [vmem:[#allocation2 + $0x84] sm:$0xf]  ;;  %v3043_v38 = vld [vmem:[#allocation2 + $0x88] sm:$0x1] }
 0x2d1   : > { %v6116_v58 = vcombine.low %v3156_v12, %v3166_v24  ;;  %v4645_v26 = vor.u32 %v4643_v45, %v4642_v17  ;;  %v3170_v53 = vrot.slane %v3168_v19, 4  ;;  %v3173_v41 = vrot.slane %v3171_v14, 5  ;;  %v9270_v12 = vld [vmem:[%s9593_s3 + $0x200] sm:$0xff]  }
 0x2d2   : > { %v4637_v44 = vsel %vm8952_vm8, %v6236_v63, %v4636_v37  ;;  %v3179_v50 = vrot.slane %v3177_v5, 5  ;;  %v3181_v3 = vshrl.u32 %v3039_v33, 16  ;;  %v3187_v31 = vshll.u32 %v3040_v46, 16  ;;  %6768 = vmatpush3.bf16.msra.mxu0 %v7287_v59  ;;  %v7292_v46 = vld [vmem:[%s9593_s3 + $0x1f8] sm:$0xff]  }
 0x2d3   : > { %6749 = vmatprep.mubr.bf16.mxu0 %v6116_v58  ;;  %v4646_v40 = vsel %vm8952_vm8, %v4638_v61, %v4645_v26  ;;  %v3174_v18 = vor.u32 %v3173_v41, %v3170_v53  ;;  %v4648_v49 = vshrl.u32 %v4528_v11, 16  ;;  %v4653_v55 = vshrl.u32 %v9246_v13, 16  ;;  %6896 = vmatpush3.bf16.msra.mxu1 %v7288_v48  ;;  %v4531_v48 = vld [vmem:[#allocation2 + $0xa4] sm:$0x8]  ;;  %v9274_v58 = vld [vmem:[#allocation2 + $0xa8] sm:$0xf] }
 0x2d4   : > { %v6260_v33 = vcombine.low %v4637_v44, %v4646_v40  ;;  %v3183_v63 = vrot.slane %v3181_v3, 4  ;;  %v3189_v42 = vrot.slane %v3187_v31, 5  ;;  %v4656_v59 = vshll.u32 %v9246_v13, 16  ;;  %6769 = vmatprep.subr.bf16.mxu0 %v7289_v23  ;;  %6897 = vmatprep.subr.bf16.mxu1 %v7290_v0 }
 0x2d5   : > { %v3175_v20 = vrot.slane %v3174_v18, 4  ;;  %v6237_v21 = vrot.slane %v4648_v49, 11  ;;  %v4655_v1 = vrot.slane %v4653_v55, 7  ;;  %v4662_v45 = vshrl.u32 %v9253_v32, 16  ;;  %v3044_v18 = vld [vmem:[#allocation2 + $0x94] sm:$0xf] }
 0x2d6   : > { %6877 = vmatprep.mubr.bf16.mxu1 %v6260_v33  ;;  %v3184_v17 = vor.u32 %v3183_v63, %v3179_v50  ;;  %v4665_v19 = vshll.u32 %v9253_v32, 16  ;;  %v3192_v14 = vshrl.u32 %v3041_v36, 16  ;;  %v3195_v5 = vshll.u32 %v3041_v36, 16  ;;  %6770 = vmatpush3.bf16.msra.mxu0 %v7289_v23  ;;  %v9276_v23 = vld [vmem:[#allocation2 + $0xac] sm:$0xf] }
 0x2d7   : > { %v3180_v24 = vsel %vm7616_vm5, %v3175_v20, %v3179_v50  ;;  %v4658_v37 = vor.u32 %v4656_v59, %v4655_v1  ;;  %v4660_v61 = vrot.slane %v4655_v1, 4  ;;  %v4664_v11 = vrot.slane %v4662_v45, 7  ;;  %6898 = vmatpush3.bf16.msra.mxu1 %v7290_v0  ;;  %6771 = vmatprep.subr.bf16.mxu0 %v7291_v35  ;;  %v3045_v33 = vld [vmem:[#allocation2 + $0x98] sm:$0xf] }
 0x2d8   : > { %v3185_v26 = vrot.slane %v3184_v17, 4  ;;  %v3194_v53 = vrot.slane %v3192_v14, 4  ;;  %v3197_v41 = vrot.slane %v3195_v5, 5  ;;  %v3201_v44 = vshll.u32 %v3042_v43, 16  ;;  %6899 = vmatprep.subr.bf16.mxu1 %v7292_v46 }
 0x2d9   : > { %v4659_v3 = vsel %vm8952_vm8, %v6237_v21, %v4658_v37  ;;  %v4667_v31 = vor.u32 %v4665_v19, %v4664_v11  ;;  %v3205_v40 = vshrl.u32 %v3042_v43, 16  ;;  %v3211_v50 = vshll.u32 %v3043_v38, 16  ;;  %v3046_v19 = vld [vmem:[#allocation2 + $0x9c] sm:$0x1]  ;;  %v4534_v37 = vld [vmem:[#allocation2 + $0xb8] sm:$0x8] }
 0x2da   : > { %v3190_v49 = vsel %vm7616_vm5, %v3185_v26, %v3189_v42  ;;  %v3198_v55 = vor.u32 %v3197_v41, %v3194_v53  ;;  %v3203_v0 = vrot.slane %v3201_v44, 5  ;;  %v4670_v36 = vshrl.u32 %v4531_v48, 16  ;;  %6772 = vmatpush3.bf16.msra.mxu0 %v7291_v35 }
 0x2db   : > { %v6117_v63 = vcombine.low %v3180_v24, %v3190_v49  ;;  %v4668_v59 = vsel %vm8952_vm8, %v4660_v61, %v4667_v31  ;;  %v3207_v20 = vrot.slane %v3205_v40, 4  ;;  %v3213_v1 = vrot.slane %v3211_v50, 5  ;;  %6900 = vmatpush3.bf16.msra.mxu1 %v7292_v46  ;;  %v9291_v61 = vld [vmem:[#allocation2 + $0xbc] sm:$0xf] }
 0x2dc   : > { %v6261_v21 = vcombine.low %v4659_v3, %v4668_v59  ;;  %v3199_v45 = vrot.slane %v3198_v55, 4  ;;  %v6238_v43 = vrot.slane %v4670_v36, 11  ;;  %v4675_v38 = vshrl.u32 %v9274_v58, 16  ;;  %6917 = vmatprep.subr.bf16.mxu1 %v9270_v12 }
 0x2dd   : > { %6750 = vmatmul.mubr.bf16.gmra.mrb[28].mxu0 %v6117_v63  ;;  %v3208_v42 = vor.u32 %v3207_v20, %v3203_v0  ;;  %v4678_v48 = vshll.u32 %v9274_v58, 16  ;;  %v4684_v35 = vshrl.u32 %v9276_v23, 16  ;;  %v4687_v17 = vshll.u32 %v9276_v23, 16  ;;  %v9297_v20 = vld [vmem:[#allocation2 + $0xc0] sm:$0xf] }
 0x2de   : > { %6878 = vmatmul.mubr.bf16.gmra.mrb[8].mxu1 %v6261_v21  ;;  %v3204_v46 = vsel %vm7616_vm5, %v3199_v45, %v3203_v0  ;;  %v4677_v14 = vrot.slane %v4675_v38, 7  ;;  %v3216_v5 = vshrl.u32 %v3044_v18, 16  ;;  %v3219_v24 = vshll.u32 %v3044_v18, 16  ;;  %v3450_v21 = vld [vmem:[#allocation2 + $0x18] sm:$0x8] }
 0x2df   : > { %v3209_v11 = vrot.slane %v3208_v42, 4  ;;  %v4686_v26 = vrot.slane %v4684_v35, 7  ;;  %v3225_v53 = vshll.u32 %v3045_v33, 16  ;;  %v3229_v41 = vshrl.u32 %v3045_v33, 16 }
 0x2e0   : > { %v4680_v44 = vor.u32 %v4678_v48, %v4677_v14  ;;  %v4682_v3 = vrot.slane %v4677_v14, 4  ;;  %v3218_v31 = vrot.slane %v3216_v5, 4  ;;  %v3221_v40 = vrot.slane %v3219_v24, 5 }
 0x2e1   : > { %v3214_v50 = vsel %vm7616_vm5, %v3209_v11, %v3213_v1  ;;  %v4689_v49 = vor.u32 %v4687_v17, %v4686_v26  ;;  %v3227_v55 = vrot.slane %v3225_v53, 5  ;;  %v3231_v0 = vrot.slane %v3229_v41, 4  ;;  %v3453_v1 = vld [vmem:[#allocation2 + $0x2c] sm:$0x8]  ;;  %v3456_v26 = vld [vmem:[#allocation2 + $0x40] sm:$0x8] }
 0x2e2   : > { %v6118_v36 = vcombine.low %v3204_v46, %v3214_v50  ;;  %v4681_v18 = vsel %vm8952_vm8, %v6238_v43, %v4680_v44  ;;  %v3222_v63 = vor.u32 %v3221_v40, %v3218_v31  ;;  %v3235_v59 = vshll.u32 %v3046_v19, 16  ;;  %v3459_v53 = vld [vmem:[#allocation2 + $0x54] sm:$0x8] }
 0x2e3   : > { %v4690_v33 = vsel %vm8952_vm8, %v4682_v3, %v4689_v49  ;;  %v3232_v45 = vor.u32 %v3231_v0, %v3227_v55  ;;  %v4692_v38 = vshrl.u32 %v4534_v37, 16  ;;  %v4697_v42 = vshrl.u32 %v9291_v61, 16 }
 0x2e4   : > { %6753 = vmatprep.mubr.bf16.mxu0 %v6118_v36  ;;  %v6262_v48 = vcombine.low %v4681_v18, %v4690_v33  ;;  %v3223_v35 = vrot.slane %v3222_v63, 4  ;;  %v3237_v17 = vrot.slane %v3235_v59, 5  ;;  %v4700_v46 = vshll.u32 %v9291_v61, 16  ;;  %v3462_v33 = vld [vmem:[#allocation2 + $0x68] sm:$0x8] }
 0x2e5   : > { %v3233_v43 = vrot.slane %v3232_v45, 4  ;;  %v6239_v14 = vrot.slane %v4692_v38, 11  ;;  %v4699_v19 = vrot.slane %v4697_v42, 7  ;;  %v4706_v5 = vshrl.u32 %v9297_v20, 16 }
 0x2e6   : > { %6881 = vmatprep.mubr.bf16.mxu1 %v6262_v48  ;;  %v3228_v24 = vsel %vm7616_vm5, %v3223_v35, %v3227_v55  ;;  %v4709_v37 = vshll.u32 %v9297_v20, 16  ;;  %v3475_v11 = vshrl.u32 %v3450_v21, 16  ;;  %v9649_v41 = vshll.u32 %v8708_v15, 16 }
 0x2e7   : > { %v3238_v3 = vsel %vm7616_vm5, %v3233_v43, %v3237_v17  ;;  %v4702_v31 = vor.u32 %v4700_v46, %v4699_v19  ;;  %v4704_v40 = vrot.slane %v4699_v19, 4  ;;  %v4708_v50 = vrot.slane %v4706_v5, 7  ;;  %v9651_v43 = vld [vmem:[#allocation6_spill] sm:$0xff]  ;;  %v3465_v19 = vld [vmem:[#allocation2 + $0x7c] sm:$0x8] }
 0x2e8   : > { %v3551_v44 = vor.u32 %v9649_v41, %v8744_v27  ;;  %v6119_v49 = vcombine.low %v3228_v24, %v3238_v3  ;;  %v6128_v0 = vrot.slane %v3475_v11, 11  ;;  %v3497_v36 = vshrl.u32 %v3453_v1, 16  ;;  %v3468_v24 = vld [vmem:[#allocation2 + $0x90] sm:$0x8] }
 0x2e9   : > { %v9650_v55 = vshll.u32 %v8715_v9, 16  ;;  %v4703_v63 = vsel %vm8952_vm8, %v6239_v14, %v4702_v31  ;;  %v4711_v59 = vor.u32 %v4709_v37, %v4708_v50  ;;  %v3519_v21 = vshrl.u32 %v3456_v26, 16  ;;  %v9655_v41 = vld [vmem:[#allocation7_spill] sm:$0xff]  ;;  %v9657_v50 = vld [vmem:[#allocation12_spill] sm:$0xff] }
 0x2ea   : > { %v3531_v15 = vrot.slane %v8701_v2, 4  ;;  %6754 = vmatmul.mubr.bf16.gmra.mrb[32].mxu0 %v6119_v49  ;;  %v3486_v45 = vsel %vm8952_vm8, %v6128_v0, %v8796_v52  ;;  %v6288_v38 = vcombine.low %v9130_v30, %v9132_v10  ;;  %v6129_v42 = vrot.slane %v3497_v36, 11  ;;  %v9658_v49 = vld [vmem:[#allocation9_spill] sm:$0xff] }
 0x2eb   : > { %v3560_v18 = vor.u32 %v9650_v55, %v8753_v16  ;;  %v3541_v1 = vshrl.u32 %v3459_v53, 16  ;;  %v4712_v16 = vsel %vm8952_vm8, %v4704_v40, %v4711_v59  ;;  %v6152_v9 = vcombine.low %v3486_v45, %v9002_v6  ;;  %v9654_v53 = vld [vmem:[#allocation8_spill] sm:$0xff]  ;;  %v9660_v55 = vld [vmem:[#allocation13_spill] sm:$0xff] }
 0x2ec   : > { %v6130_v48 = vrot.slane %v3519_v21, 11  ;;  %v3539_v2 = vsel %vm8952_vm8, %v3531_v15, %v8966_v56  ;;  %v6263_v35 = vcombine.low %v4703_v63, %v4712_v16  ;;  %v3508_v52 = vsel %vm8952_vm8, %v6129_v42, %v8820_v29  ;;  %v3471_v45 = vld [vmem:[#allocation2 + $0xa4] sm:$0x8]  ;;  %v9663_v16 = vld [vmem:[#allocation15_spill] sm:$0xff] }
 0x2ed   : > { %v6131_v17 = vrot.slane %v3541_v1, 11  ;;  %v3553_v30 = vrot.slane %v8744_v27, 4  ;;  %6773 = vmatprep.mubr.bf16.mxu0 %v6152_v9  ;;  %v6153_v10 = vcombine.low %v3508_v52, %v9017_v8  ;;  %v3563_v46 = vshrl.u32 %v3462_v33, 16  ;;  %v9664_v9 = vld [vmem:[#allocation11_spill] sm:$0xff]  ;;  %v9666_v52 = vld [vmem:[#allocation17_spill] sm:$0xff] }
 0x2ee   : > { %v3530_v6 = vsel %vm8952_vm8, %v6130_v48, %v8947_v57  ;;  %v9652_v14 = vshll.u32 %v9651_v43, 16  ;;  %6882 = vmatmul.mubr.bf16.gmra.mrb[12].mxu1 %v6263_v35  ;;  %v3575_v8 = vrot.slane %v8775_v51, 4  ;;  %v9653_v37 = vshrl.u32 %v8901_v60, 16 }
 0x2ef   : > { %v6154_v5 = vcombine.low %v3530_v6, %v3539_v2  ;;  %v3552_v29 = vsel %vm8952_vm8, %v6131_v17, %v3551_v44  ;;  %v3561_v27 = vsel %vm8952_vm8, %v3553_v30, %v3560_v18  ;;  %6901 = vmatprep.mubr.bf16.mxu1 %v6288_v38  ;;  %v6132_v26 = vrot.slane %v3563_v46, 11  ;;  %v9667_v17 = vld [vmem:[#allocation14_spill] sm:$0xff]  ;;  %v5149_v6 = vld [vmem:[#allocation2 + $0x30] sm:$0xf] }
 0x2f0   : > { %v3573_v56 = vor.u32 %v9652_v14, %v8775_v51  ;;  %v3645_v57 = vrot.slane %v9653_v37, 7  ;;  %v6155_v11 = vcombine.low %v3552_v29, %v3561_v27  ;;  %v9656_v3 = vshll.u32 %v9655_v41, 16  ;;  %v9661_v51 = vld [vmem:[#allocation10_spill] sm:$0xff]  ;;  %v5150_v29 = vld [vmem:[#allocation2 + $0x34] sm:$0xf] }
 0x2f1   : > { %v3585_v40 = vshrl.u32 %v3465_v19, 16  ;;  %v9659_v44 = vshll.u32 %v9658_v49, 16  ;;  %v3597_v36 = vrot.slane %v9657_v50, 4  ;;  %v9662_v18 = vshll.u32 %v9661_v51, 16  ;;  %v7296_v46 = vld [vmem:[%s9593_s3 + $0x208] sm:$0xff]   ;;  %v9670_v19 = vld [vmem:[#allocation16_spill] sm:$0xff] }
 0x2f2   : > { %v3582_v31 = vor.u32 %v9656_v3, %v9654_v53  ;;  %v6289_v59 = vcombine.low %v9143_v28, %v9145_v25  ;;  %v3574_v21 = vsel %vm8952_vm8, %v6132_v26, %v3573_v56  ;;  %v3607_v33 = vshrl.u32 %v3468_v24, 16  ;;  %6774 = vmatmul.mubr.bf16.vlgmr.msra.gmra.mrb[20].mxu0 %v6153_v10  ;;  %v9669_v56 = vld [vmem:[#allocation18_spill] sm:$0xff]  ;;  %v5152_v53 = vld [vmem:[#allocation2 + $0x44] sm:$0xf] }
 0x2f3   : > { %v3595_v0 = vor.u32 %v9659_v44, %v9657_v50  ;;  %v3604_v63 = vor.u32 %v9662_v18, %v9660_v55  ;;  %v6133_v42 = vrot.slane %v3585_v40, 11  ;;  %v9665_v48 = vshll.u32 %v9664_v9, 16  ;;  %6777 = vmatprep.mubr.bf16.mxu0 %v6154_v5 }
 0x2f4   : > { %v3583_v15 = vsel %vm8952_vm8, %v3575_v8, %v3582_v31  ;;  %v6290_v28 = vcombine.low %v9161_v7, %v9163_v34  ;;  %v6134_v25 = vrot.slane %v3607_v33, 11  ;;  %v3619_v35 = vrot.slane %v9663_v16, 4 }
 0x2f5   : > { %v6156_v38 = vcombine.low %v3574_v21, %v3583_v15  ;;  %v3605_v1 = vsel %vm8952_vm8, %v3597_v36, %v3604_v63  ;;  %v3617_v2 = vor.u32 %v9665_v48, %v9663_v16  ;;  %v9668_v30 = vshll.u32 %v9667_v17, 16  ;;  %v5156_v48 = vld [vmem:[#allocation2 + $0x5c] sm:$0xf] }
 0x2f6   : > { %v3596_v43 = vsel %vm8952_vm8, %v6133_v42, %v3595_v0  ;;  %v3629_v14 = vshrl.u32 %v3471_v45, 16  ;;  %v9671_v5 = vshll.u32 %v9670_v19, 16  ;;  %v3641_v34 = vrot.slane %v9669_v56, 4  ;;  %6902 = vmatmul.mubr.bf16.vlgmr.msra.gmra.mrb[0].mxu1 %v6289_v59  ;;  %v5153_v0 = vld [vmem:[#allocation2 + $0x48] sm:$0xf] }
 0x2f7   : > { %v3626_v10 = vor.u32 %v9668_v30, %v9666_v52  ;;  %v9383_v27 = vcombine.low %v3596_v43, %v3605_v1  ;;  %v3618_v8 = vsel %vm8952_vm8, %v6134_v25, %v3617_v2  ;;  %v9672_v37 = vshll.u32 %v8901_v60, 16  ;;  %6918 = vmatpush3.bf16.msra.mxu1 %v9270_v12  ;;  %6905 = vmatprep.mubr.bf16.mxu1 %v6290_v28  ;;  %v7299_v60 = vld [vmem:[%s9593_s3 + $0x210] sm:$0xff]   ;;  %v5151_v12 = vld [vmem:[#allocation2 + $0x38] sm:$0x1] }
 0x2f8   : > { %v3639_v7 = vor.u32 %v9671_v5, %v9669_v56  ;;  %v6135_v3 = vrot.slane %v3629_v14, 11  ;;  %v5174_v31 = vshrl.u32 %v5149_v6, 16  ;;  %v5177_v50 = vshll.u32 %v5149_v6, 16  ;;  %6919 = vmatprep.subr.bf16.mxu1 %v7296_v46  ;;  %v5155_v45 = vld [vmem:[#allocation2 + $0x58] sm:$0xf] }
 0x2f9   : > { %v3627_v24 = vsel %vm8952_vm8, %v3619_v35, %v3626_v10  ;;  %v3648_v26 = vor.u32 %v9672_v37, %v3645_v57  ;;  %v5183_v49 = vshll.u32 %v5150_v29, 16  ;;  %v5187_v44 = vshrl.u32 %v5150_v29, 16  ;;  %v7300_v1 = vld [vmem:[%s9593_s3 + $0x218] sm:$0xff]   ;;  %v5159_v19 = vld [vmem:[#allocation2 + $0x70] sm:$0xf] }
 0x2fa   : > { %v9391_v41 = vcombine.low %v3618_v8, %v3627_v24  ;;  %v3640_v57 = vsel %vm8952_vm8, %v6135_v3, %v3639_v7  ;;  %v5176_v36 = vrot.slane %v5174_v31, 4  ;;  %v5198_v55 = vshrl.u32 %v5152_v53, 16  ;;  %6778 = vmatmul.mubr.bf16.gmra.mrb[24].mxu0 %v6155_v11  ;;  %v5161_v29 = vld [vmem:[#allocation2 + $0x80] sm:$0xf] }
 0x2fb   : > { %v3649_v40 = vsel %vm8952_vm8, %v3641_v34, %v3648_v26  ;;  %v5179_v18 = vrot.slane %v5177_v50, 5  ;;  %v9403_v63 = vrot.slane %v5183_v49, 5  ;;  %v5189_v59 = vrot.slane %v5187_v44, 4  ;;  %6920 = vmatpush3.bf16.msra.mxu1 %v7296_v46  ;;  %6781 = vmatprep.mubr.bf16.mxu0 %v6156_v38  ;;  %v5158_v46 = vld [vmem:[#allocation2 + $0x6c] sm:$0xf] }
 0x2fc   : > { %v9401_v51 = vcombine.low %v3640_v57, %v3649_v40  ;;  %v6291_v21 = vcombine.low %v9188_v62, %v9195_v47  ;;  %v5201_v15 = vshll.u32 %v5152_v53, 16  ;;  %v5207_v33 = vshll.u32 %v5153_v0, 16  ;;  %6921 = vmatprep.subr.bf16.mxu1 %v7299_v60  ;;  %v5154_v62 = vld [vmem:[#allocation2 + $0x4c] sm:$0x1]  ;;  %v5162_v53 = vld [vmem:[#allocation2 + $0x84] sm:$0xf] }
 0x2fd   : > { %v6292_v22 = vcombine.low %v9221_v54, %v9223_v4  ;;  %v5211_v42 = vshrl.u32 %v5153_v0, 16  ;;  %v5180_v16 = vor.u32 %v5179_v18, %v5176_v36  ;;  %v5190_v11 = vor.u32 %v5189_v59, %v9403_v63  ;;  %v7303_v4 = vld [vmem:[%s9593_s3 + $0x220] sm:$0xff]   ;;  %v5160_v59 = vld [vmem:[#allocation2 + $0x74] sm:$0x1] }
 0x2fe   : > { %v5193_v9 = vshll.u32 %v5151_v12, 16  ;;  %v5200_v47 = vrot.slane %v5198_v55, 4  ;;  %v5203_v2 = vrot.slane %v5201_v15, 5  ;;  %v5222_v28 = vshrl.u32 %v5155_v45, 16  ;;  %6906 = vmatmul.mubr.bf16.gmra.mrb[4].mxu1 %v6291_v21 }
 0x2ff   : > { %v5225_v25 = vshll.u32 %v5155_v45, 16  ;;  %v9413_v38 = vrot.slane %v5207_v33, 5  ;;  %v5213_v54 = vrot.slane %v5211_v42, 4  ;;  %6922 = vmatpush3.bf16.msra.mxu1 %v7299_v60  ;;  %6909 = vmatprep.mubr.bf16.mxu1 %v6292_v22  ;;  %v5231_v35 = vshll.u32 %v5156_v48, 16  ;;  %v5163_v22 = vld [vmem:[#allocation2 + $0x88] sm:$0x1] }
 0x300   : > { %v5235_v52 = vshrl.u32 %v5156_v48, 16  ;;  %6923 = vmatprep.subr.bf16.mxu1 %v7300_v1  ;;  %v5181_v17 = vrot.slane %v5180_v16, 4  ;;  %v5191_v30 = vrot.slane %v5190_v11, 4  ;;  %v5195_v10 = vrot.slane %v5193_v9, 5  ;;  %v5164_v9 = vld [vmem:[#allocation2 + $0x94] sm:$0xf] }
 0x301   : > { %v5217_v6 = vshll.u32 %v5154_v62, 16  ;;  %v5204_v43 = vor.u32 %v5203_v2, %v5200_v47  ;;  %v5224_v14 = vrot.slane %v5222_v28, 4  ;;  %v5227_v56 = vrot.slane %v5225_v25, 5  ;;  %v5165_v28 = vld [vmem:[#allocation2 + $0x98] sm:$0xf] }
 0x302   : > { %6782 = vmatmul.mubr.bf16.gmra.mrb[28].mxu0 %v9383_v27  ;;  %v6293_v5 = vcombine.low %v9246_v13, %v9253_v32  ;;  %v6294_v7 = vcombine.low %v9274_v58, %v9276_v23  ;;  %v5214_v34 = vor.u32 %v5213_v54, %v9413_v38  ;;  %v9425_v8 = vrot.slane %v5231_v35, 5  ;;  %v7304_v13 = vld [vmem:[%s9593_s3 + $0x228] sm:$0xff]   ;;  %v5157_v27 = vld [vmem:[#allocation2 + $0x60] sm:$0x1]  ;;  %v7308_v25 = vld [vmem:[%s9593_s3 + $0x238] sm:$0xff]  }
 0x303   : > { %6924 = vmatpush3.bf16.msra.mxu1 %v7300_v1  ;;  %6785 = vmatprep.mubr.bf16.mxu0 %v9391_v41  ;;  %v5237_v24 = vrot.slane %v5235_v52, 4  ;;  %v5246_v37 = vshrl.u32 %v5158_v46, 16  ;;  %v5249_v26 = vshll.u32 %v5158_v46, 16  ;;  %v5186_v32 = vsel %vm7616_vm5, %v5181_v17, %v9403_v63  ;;  %v7307_v63 = vld [vmem:[%s9593_s3 + $0x230] sm:$0xff]   ;;  %v5167_v52 = vld [vmem:[#allocation2 + $0xa8] sm:$0xf] }
 0x304   : > { %6925 = vmatprep.subr.bf16.mxu1 %v7303_v4  ;;  %v5196_v58 = vsel %vm7616_vm5, %v5191_v30, %v5195_v10  ;;  %v5219_v23 = vrot.slane %v5217_v6, 5  ;;  %v5255_v41 = vshll.u32 %v5159_v19, 16  ;;  %v5205_v3 = vrot.slane %v5204_v43, 4  ;;  %v5168_v17 = vld [vmem:[#allocation2 + $0xac] sm:$0xf] }
 0x305   : > { %v5228_v31 = vor.u32 %v5227_v56, %v5224_v14  ;;  %v5259_v40 = vshrl.u32 %v5159_v19, 16  ;;  %v5270_v50 = vshrl.u32 %v5161_v29, 16  ;;  %v5215_v49 = vrot.slane %v5214_v34, 4 }
 0x306   : > { %6910 = vmatmul.mubr.bf16.gmra.mrb[8].mxu1 %v6293_v5  ;;  %v5273_v44 = vshll.u32 %v5161_v29, 16  ;;  %v5279_v0 = vshll.u32 %v5162_v53, 16  ;;  %v5283_v60 = vshrl.u32 %v5162_v53, 16  ;;  %v5238_v57 = vor.u32 %v5237_v24, %v9425_v8 }
 0x307   : > { %6926 = vmatpush3.bf16.msra.mxu1 %v7303_v4  ;;  %6913 = vmatprep.mubr.bf16.mxu1 %v6294_v7  ;;  %v5241_v36 = vshll.u32 %v5157_v27, 16  ;;  %v5248_v55 = vrot.slane %v5246_v37, 4  ;;  %v5251_v12 = vrot.slane %v5249_v26, 5  ;;  %v6295_v18 = vcombine.low %v9291_v61, %v9297_v20 }
 0x308   : > { %6927 = vmatprep.subr.bf16.mxu1 %v7304_v13  ;;  %v9441_v21 = vrot.slane %v5255_v41, 5  ;;  %v5261_v15 = vrot.slane %v5259_v40, 4  ;;  %v6320_v33 = vcombine.low %v5186_v32, %v5196_v58  ;;  %v5210_v45 = vsel %vm7616_vm5, %v5205_v3, %v9413_v38  ;;  %v5166_v32 = vld [vmem:[#allocation2 + $0x9c] sm:$0x1] }
 0x309   : > { %v5272_v42 = vrot.slane %v5270_v50, 4  ;;  %v5275_v1 = vrot.slane %v5273_v44, 5  ;;  %v5220_v61 = vsel %vm7616_vm5, %v5215_v49, %v5219_v23  ;;  %v5229_v20 = vrot.slane %v5228_v31, 4  ;;  %v5170_v41 = vld [vmem:[#allocation2 + $0xbc] sm:$0xf] }
 0x30a   : > { %6786 = vmatmul.mubr.bf16.gmra.mrb[32].mxu0 %v9401_v51  ;;  %v9449_v16 = vrot.slane %v5279_v0, 5  ;;  %v5285_v11 = vrot.slane %v5283_v60, 4  ;;  %v5239_v48 = vrot.slane %v5238_v57, 4  ;;  %v5243_v62 = vrot.slane %v5241_v36, 5  ;;  %v5171_v49 = vld [vmem:[#allocation2 + $0xc0] sm:$0xf] }
 0x30b   : > { %6928 = vmatpush3.bf16.msra.mxu1 %v7304_v13  ;;  %v5252_v47 = vor.u32 %v5251_v12, %v5248_v55  ;;  %v5265_v2 = vshll.u32 %v5160_v59, 16  ;;  %v5262_v51 = vor.u32 %v5261_v15, %v9441_v21  ;;  %v6321_v38 = vcombine.low %v5210_v45, %v5220_v61  ;;  %v5169_v57 = vld [vmem:[#allocation2 + $0xb0] sm:$0x1] }
 0x30c   : > { %6929 = vmatprep.subr.bf16.mxu1 %v7307_v63  ;;  %v5276_v54 = vor.u32 %v5275_v1, %v5272_v42  ;;  %v5289_v4 = vshll.u32 %v5163_v22, 16  ;;  %v5294_v35 = vshrl.u32 %v5164_v9, 16  ;;  %v5286_v30 = vor.u32 %v5285_v11, %v9449_v16 }
 0x30d   : > { %v5297_v10 = vshll.u32 %v5164_v9, 16  ;;  %v5303_v6 = vshll.u32 %v5165_v28, 16  ;;  %v5307_v46 = vshrl.u32 %v5165_v28, 16  ;;  %v5234_v43 = vsel %vm7616_vm5, %v5229_v20, %v9425_v8 }
 0x30e   : > { %6914 = vmatmul.mubr.bf16.gmra.mrb[12].mxu1 %v6295_v18  ;;  %v5244_v14 = vsel %vm7616_vm5, %v5239_v48, %v5243_v62  ;;  %v5253_v56 = vrot.slane %v5252_v47, 4  ;;  %v5267_v19 = vrot.slane %v5265_v2, 5  ;;  %v5263_v5 = vrot.slane %v5262_v51, 4 }
 0x30f   : > { %6930 = vmatpush3.bf16.msra.mxu1 %v7307_v63  ;;  %6933 = vmatprep.mubr.bf16.mxu1 %v6320_v33  ;;  %v5318_v7 = vshrl.u32 %v5167_v52, 16  ;;  %v5321_v34 = vshll.u32 %v5167_v52, 16  ;;  %v5327_v29 = vshll.u32 %v5168_v17, 16  ;;  %v5277_v24 = vrot.slane %v5276_v54, 4 }
 0x310   : > { %6931 = vmatprep.subr.bf16.mxu1 %v7308_v25  ;;  %v5291_v37 = vrot.slane %v5289_v4, 5  ;;  %v5296_v26 = vrot.slane %v5294_v35, 4  ;;  %v5331_v53 = vshrl.u32 %v5168_v17, 16  ;;  %v5287_v13 = vrot.slane %v5286_v30, 4 }
 0x311   : > { %v5299_v58 = vrot.slane %v5297_v10, 5  ;;  %v5305_v23 = vrot.slane %v5303_v6, 5  ;;  %v5309_v27 = vrot.slane %v5307_v46, 4  ;;  %v6322_v8 = vcombine.low %v5234_v43, %v5244_v14 }
 0x312   : > { %v5320_v3 = vrot.slane %v5318_v7, 4  ;;  %v5323_v31 = vrot.slane %v5321_v34, 5  ;;  %v5329_v40 = vrot.slane %v5327_v29, 5  ;;  %v5333_v50 = vrot.slane %v5331_v53, 4 }
 0x313   : > { %6932 = vmatpush3.bf16.msra.mxu1 %v7308_v25  ;;  %v5258_v44 = vsel %vm7616_vm5, %v5253_v56, %v9441_v21  ;;  %v5268_v0 = vsel %vm7616_vm5, %v5263_v5, %v5267_v19  ;;  %v5313_v60 = vshll.u32 %v5166_v32, 16  ;;  %v5282_v36 = vsel %vm7616_vm5, %v5277_v24, %v9449_v16  ;;  %v5172_v25 = vld [vmem:[#allocation2 + $0xc4] sm:$0x1] }
 0x314   : > { %v5292_v55 = vsel %vm7616_vm5, %v5287_v13, %v5291_v37  ;;  %v5300_v12 = vor.u32 %v5299_v58, %v5296_v26  ;;  %v5310_v18 = vor.u32 %v5309_v27, %v5305_v23  ;;  %v5342_v63 = vshrl.u32 %v5170_v41, 16 }
 0x315   : > { %v5345_v59 = vshll.u32 %v5170_v41, 16  ;;  %v5351_v15 = vshll.u32 %v5171_v49, 16  ;;  %v5355_v21 = vshrl.u32 %v5171_v49, 16  ;;  %v5324_v33 = vor.u32 %v5323_v31, %v5320_v3  ;;  %v9494_v31 = vld [vmem:[%s9594_s4] ss:$0 sm:$0xff] }
 0x316   : > { %6934 = vmatmul.mubr.bf16.vlgmr.msra.gmra.mrb[0].mxu1 %v6321_v38  ;;  %v5334_v45 = vor.u32 %v5333_v50, %v5329_v40  ;;  %v5337_v22 = vshll.u32 %v5169_v57, 16  ;;  %v6323_v42 = vcombine.low %v5258_v44, %v5268_v0  ;;  %v6324_v1 = vcombine.low %v5282_v36, %v5292_v55 }
 0x317   : > { %6937 = vmatprep.mubr.bf16.mxu1 %v6322_v8  ;;  %v5301_v61 = vrot.slane %v5300_v12, 4  ;;  %v5311_v20 = vrot.slane %v5310_v18, 4  ;;  %v5315_v11 = vrot.slane %v5313_v60, 5  ;;  %v5344_v9 = vrot.slane %v5342_v63, 4 }
 0x318   : > { %v5347_v16 = vrot.slane %v5345_v59, 5  ;;  %v5353_v48 = vrot.slane %v5351_v15, 5  ;;  %v5357_v62 = vrot.slane %v5355_v21, 4  ;;  %v5325_v47 = vrot.slane %v5324_v33, 4 }
 0x319   : > { %v5335_v2 = vrot.slane %v5334_v45, 4  ;;  %v5339_v28 = vrot.slane %v5337_v22, 5  ;;  %v5306_v51 = vsel %vm7616_vm5, %v5301_v61, %v5305_v23  ;;  %v5316_v38 = vsel %vm7616_vm5, %v5311_v20, %v5315_v11 }
 0x31a   : > { %v5348_v54 = vor.u32 %v5347_v16, %v5344_v9  ;;  %v5358_v4 = vor.u32 %v5357_v62, %v5353_v48  ;;  %v5361_v35 = vshll.u32 %v5172_v25, 16  ;;  %v5330_v52 = vsel %vm7616_vm5, %v5325_v47, %v5329_v40 }
 0x31b   : > { %v5340_v17 = vsel %vm7616_vm5, %v5335_v2, %v5339_v28  ;;  %v6325_v30 = vcombine.low %v5306_v51, %v5316_v38 }
 0x31c   : > { %v6326_v10 = vcombine.low %v5330_v52, %v5340_v17  ;;  %v5349_v6 = vrot.slane %v5348_v54, 4  ;;  %v5359_v46 = vrot.slane %v5358_v4, 4  ;;  %v5363_v43 = vrot.slane %v5361_v35, 5 }
 0x31e   : > { %6938 = vmatmul.mubr.bf16.gmra.mrb[4].mxu1 %v6323_v42  ;;  %v5354_v14 = vsel %vm7616_vm5, %v5349_v6, %v5353_v48  ;;  %v5364_v56 = vsel %vm7616_vm5, %v5359_v46, %v5363_v43 }
 0x31f   : > { %6941 = vmatprep.mubr.bf16.mxu1 %v6324_v1  ;;  %v6327_v19 = vcombine.low %v5354_v14, %v5364_v56 }
 0x326   : > { %6942 = vmatmul.mubr.bf16.gmra.mrb[8].mxu1 %v6325_v30 }
 0x327   : > { %6945 = vmatprep.mubr.bf16.mxu1 %v6326_v10 }
 0x32e   : > { %6946 = vmatmul.mubr.bf16.gmra.mrb[12].mxu1 %v6327_v19 }
 0x3c5   : > { %v6775_v5 = vpop.f32.mrb[20].mxu0 }
 0x3c6   : > { %v3781_v7 = vpop.f32.mrb[21].mxu0 }
 0x3c7   : > { %v6776_v34 = vpop.f32.mrb[22].mxu0 }
 0x3c8   : > { %v3784_v29 = vpop.f32.mrb[23].mxu0 }
 0x3cd   : > { %v6779_v24 = vpop.f32.mrb[24].mxu0 }
 0x3ce   : > { %v3797_v37 = vpop.f32.mrb[25].mxu0 }
 0x3cf   : > { %v6780_v26 = vpop.f32.mrb[26].mxu0 }
 0x3d0   : > { %v3800_v53 = vpop.f32.mrb[27].mxu0 }
 0x3d5   : > { %v6783_v13 = vpop.f32.mrb[28].mxu0 }
 0x3d6   : > { %v3813_v32 = vpop.f32.mrb[29].mxu0 }
 0x3d7   : > { %v6784_v58 = vpop.f32.mrb[30].mxu0 }
 0x3d8   : > { %v3816_v23 = vpop.f32.mrb[31].mxu0 }
 0x3dd   : > { %v9483_v27 = vpop.f32.mrb[32].mxu0 }
 0x3de   : > { %v9485_v8 = vpop.f32.mrb[33].mxu0 }
 0x3df   : > { %v9487_v39 = vpop.f32.mrb[34].mxu0 }
 0x3e0   : > { %v9489_v41 = vpop.f32.mrb[35].mxu0 }
 0x3e9   : > { %v6935_v3 = vpop.f32.mrb[0].mxu1 }
 0x3ea   : > { %v6949_v40 = vadd.f32 %v6935_v3, %v6775_v5  ;;  %v5496_v50 = vpop.f32.mrb[1].mxu1 }
 0x3eb   : > { %v6950_v49 = vadd.f32 %v5496_v50, %v3781_v7  ;;  %v6936_v44 = vpop.f32.mrb[2].mxu1 }
 0x3ec   : > { %v5584_v0 = vadd.f32 %v6949_v40, %v9494_v31  ;;  %v6951_v60 = vadd.f32 %v6936_v44, %v6776_v34  ;;  %v5499_v57 = vpop.f32.mrb[3].mxu1 }
 0x3ed   : > { %v5582_v36 = vadd.f32 %v6950_v49, %v9494_v31  ;;  %v6952_v55 = vadd.f32 %v5499_v57, %v3784_v29 }
 0x3ee   : > { %v5585_v12 = vadd.f32 %v6951_v60, %v9494_v31  ;;  %v5600_v63 = vmax.f32 %v5584_v0, 0.0 }
 0x3ef   : > { %v5583_v18 = vadd.f32 %v6952_v55, %v9494_v31  ;;  %v5598_v15 = vmax.f32 %v5582_v36, 0.0 }
 0x3f0   : > { %v5601_v59 = vmax.f32 %v5585_v12, 0.0 }
 0x3f1   : > { %v5599_v21 = vmax.f32 %v5583_v18, 0.0  ;;  %v6939_v33 = vpop.f32.mrb[4].mxu1 }
 0x3f2   : > { %v6428_v45 = vpack.c.bf16 %v5601_v59, %v5600_v63  ;;  %v6953_v22 = vadd.f32 %v6939_v33, %v6779_v24  ;;  %v5512_v42 = vpop.f32.mrb[5].mxu1 }
 0x3f3   : > { %v6423_v1 = vpack.c.bf16 %v5599_v21, %v5598_v15  ;;  %v6954_v61 = vadd.f32 %v5512_v42, %v3797_v37  ;;  %v6940_v20 = vpop.f32.mrb[6].mxu1 }
 0x3f4   : > { %6465 = vst [vmem:[%s8549_s9 + $0x8] sm:$0xff] %v6428_v45   ;;  %v5588_v11 = vadd.f32 %v6953_v22, %v9494_v31  ;;  %v6955_v9 = vadd.f32 %v6940_v20, %v6780_v26  ;;  %v5515_v16 = vpop.f32.mrb[7].mxu1 }
 0x3f5   : > { %6424 = vst [vmem:[%s8549_s9] sm:$0xff] %v6423_v1   ;;  %v5586_v48 = vadd.f32 %v6954_v61, %v9494_v31  ;;  %v6956_v62 = vadd.f32 %v5515_v16, %v3800_v53 }
 0x3f6   : > { %v5589_v47 = vadd.f32 %v6955_v9, %v9494_v31  ;;  %v5604_v28 = vmax.f32 %v5588_v11, 0.0 }
 0x3f7   : > { %v5587_v2 = vadd.f32 %v6956_v62, %v9494_v31  ;;  %v5602_v51 = vmax.f32 %v5586_v48, 0.0 }
 0x3f8   : > { %v5605_v25 = vmax.f32 %v5589_v47, 0.0 }
 0x3f9   : > { %v5603_v38 = vmax.f32 %v5587_v2, 0.0  ;;  %v6943_v54 = vpop.f32.mrb[8].mxu1 }
 0x3fa   : > { %v6438_v4 = vpack.c.bf16 %v5605_v25, %v5604_v28  ;;  %v6957_v35 = vadd.f32 %v6943_v54, %v6783_v13  ;;  %v5528_v52 = vpop.f32.mrb[9].mxu1 }
 0x3fb   : > { %v6433_v17 = vpack.c.bf16 %v5603_v38, %v5602_v51  ;;  %v6958_v30 = vadd.f32 %v5528_v52, %v3813_v32  ;;  %v6944_v10 = vpop.f32.mrb[10].mxu1 }
 0x3fc   : > { %6467 = vst [vmem:[%s8549_s9 + $0x18] sm:$0xff] %v6438_v4   ;;  %v5592_v6 = vadd.f32 %v6957_v35, %v9494_v31  ;;  %v6959_v46 = vadd.f32 %v6944_v10, %v6784_v58  ;;  %v5531_v43 = vpop.f32.mrb[11].mxu1 }
 0x3fd   : > { %6466 = vst [vmem:[%s8549_s9 + $0x10] sm:$0xff] %v6433_v17   ;;  %v5590_v14 = vadd.f32 %v6958_v30, %v9494_v31  ;;  %v6960_v56 = vadd.f32 %v5531_v43, %v3816_v23 }
 0x3fe   : > { %v5593_v19 = vadd.f32 %v6959_v46, %v9494_v31  ;;  %v5608_v7 = vmax.f32 %v5592_v6, 0.0 }
 0x3ff   : > { %v5591_v5 = vadd.f32 %v6960_v56, %v9494_v31  ;;  %v5606_v29 = vmax.f32 %v5590_v14, 0.0 }
 0x400   : > { %v5609_v34 = vmax.f32 %v5593_v19, 0.0 }
 0x401   : > { %v5607_v24 = vmax.f32 %v5591_v5, 0.0  ;;  %v6947_v37 = vpop.f32.mrb[12].mxu1 }
 0x402   : > { %v6448_v26 = vpack.c.bf16 %v5609_v34, %v5608_v7  ;;  %v6961_v53 = vadd.f32 %v6947_v37, %v9483_v27  ;;  %v5544_v13 = vpop.f32.mrb[13].mxu1 }
 0x403   : > { %v6443_v32 = vpack.c.bf16 %v5607_v24, %v5606_v29  ;;  %v6962_v58 = vadd.f32 %v5544_v13, %v9485_v8  ;;  %v6948_v23 = vpop.f32.mrb[14].mxu1 }
 0x404   : > { %6469 = vst [vmem:[%s8549_s9 + $0x28] sm:$0xff] %v6448_v26   ;;  %v5596_v3 = vadd.f32 %v6961_v53, %v9494_v31  ;;  %v6963_v40 = vadd.f32 %v6948_v23, %v9487_v39  ;;  %v5547_v50 = vpop.f32.mrb[15].mxu1 }
 0x405   : > { %6468 = vst [vmem:[%s8549_s9 + $0x20] sm:$0xff] %v6443_v32   ;;  %v5594_v49 = vadd.f32 %v6962_v58, %v9494_v31  ;;  %v6964_v27 = vadd.f32 %v5547_v50, %v9489_v41 }
 0x406   : > { %v5597_v44 = vadd.f32 %v6963_v40, %v9494_v31  ;;  %v5612_v0 = vmax.f32 %v5596_v3, 0.0 }
 0x407   : > { %v5595_v8 = vadd.f32 %v6964_v27, %v9494_v31  ;;  %v5610_v39 = vmax.f32 %v5594_v49, 0.0 }
 0x408   : > { %v5613_v60 = vmax.f32 %v5597_v44, 0.0 }
 0x409   : > { %v5611_v57 = vmax.f32 %v5595_v8, 0.0 }
 0x40a   : > { %v6458_v36 = vpack.c.bf16 %v5613_v60, %v5612_v0 }
 0x40b   : > { %v6453_v55 = vpack.c.bf16 %v5611_v57, %v5610_v39 }
 0x40c   : > { %6471 = vst [vmem:[%s8549_s9 + $0x38] sm:$0xff] %v6458_v36  }
 0x40d   : > { %6470 = vst [vmem:[%s8549_s9 + $0x30] sm:$0xff] %v6453_v55  }
 0x40e   : > { %7322 = shalt.err (!%p7319_p10)
}
 0x40f   : > { %s7323_s9 = scalar_lea.hbm %s9528_s15, 1024  ;;  %s7327_s8 = scalar_lea.hbm %s9595_s5, 4096 }
 0x410   : > { %p7324_p11 = scmp.ne.s32.totalorder %s9528_s15, %s7323_s9  ;;  %p7328_p0 = scmp.lt.u32.totalorder %s9528_s15, %s9595_s5 }
 0x411   : > { %p7329_p1 = scmp.lt.u32.totalorder %s7327_s8, %s7323_s9  ;;  %p7331_p4 = scmp.lt.u32.totalorder %s7323_s9, %s9528_s15 }
 0x412   : > { %p7325_p12 = pnand %p7324_p11, %p7498_p3 }
 0x413   : > { %p7330_p2 = por %p7329_p1, %p7328_p0 }
 0x414   : > { %p7326_p13 = pneg %p7325_p12 }
 0x415   : > { %p7332_p5 = por %p7331_p4, %p7330_p2 }
 0x417   : > { %p7333_p6 = pnand %p7332_p5, %p7326_p13 }
 0x419   : > { %7336 = shalt.err (!%p7333_p6)
}
 0x41a   : > { %s7416_s27 = smov 4  }
 0x41b   : > { %7080 = dma.vmem_to_hbm [thread:$0]  (%p7498_p3), %s9530_s22, 1024, %s9528_s15, %s9536_s26, %s7412_s14, %s7412_s14, %s7416_s27  }
 0x41c PF: > { %p7086_p7 = scmp.ge.s32.totalorder %s7403_s25, 2  ;;  %s5725_s17 = sand.u32 1, %s7375_s18  }
 0x41d   : > { %s5726_s12 = scalar_lea.sflag [#allocation4], %s5725_s17 }
 0x41e   : > { %p7083_p9 = pnand %p7086_p7, %p7507_p8 }
 0x420   : > { %7370 = dma.done.wait (!%p7083_p9), %s5726_s12, 1024  }
 0x421   : > { %7372 = vsyncadd (!%p7083_p9), %s5726_s12, 4294966272  ;;  %s18_s25 = sadd.s32 1, %s7403_s25   ;;  %s9674_s18 = smov %s7379_s19 }
 0x422   : > { %p15_p10 = scmp.ge.s32.totalorder %s18_s25, 6   ;;  %s9675_s19 = smov %s7383_s20 }
 0x423   : > { %s9676_s20 = smov %s7516_s11  ;;  %s9677_s21 = smov %s7395_s23 }
 0x424   : > { %s9678_s22 = smov %s7399_s24  ;;  %s9679_s23 = smov %s9682_s28 }
 0x425   : > { %s9680_s24 = smov %s9686_s29  ;;  %17 = sbr.rel (!%p15_p10) target bundleno = 5 (0x5), region = 96 }
 0x42c   :  { %5731 = vsyncpa [#allocation4], 1 }
 0x42d   :  { %5733 = vsyncpa [#allocation4 + $0x1], 1 }

</bundles_post_ra>
